<compile_context>
chip_gen: v5e
topology: v5e:2x2
jax: 0.10.0
libtpu: 0.0.40
codegen_flags: <defaults>
</compile_context>

<pallas_src>
import jax
import jax.numpy as jnp
import numpy as np
from jax.experimental import pallas as pl
from jax.experimental.pallas import tpu as pltpu

N_BONDS = 7          # Single, Double, Triple, Quadruple, Aromatic, Pi, Universal
N_MLP_LAYERS = 8     # 8 bias-free Linear layers, ReLU between (no ReLU after last)
N_GRU_SETS = 6       # top-4 atoms + atom "0" + catchall
N_GW = 2 * 3         # (gate r/z/n, which normal/universal) output column blocks


# ----------------------------- Pallas kernel --------------------------------
def _mpnn_fused_kernel(h0_ref, ohw2_ref, brows_ref, aflat_ref, auni_ref,
                       wblk_ref, wi_ref, wh_ref, out_ref, ht_ref):
    p = pl.program_id(0)
    S = N_GRU_SETS
    BN, M = ht_ref.shape
    GWM = N_GW * M

    # h_t lives in VMEM scratch across all message passes.
    @pl.when(p == 0)
    def _():
        ht_ref[...] = h0_ref[...]

    h = ht_ref[...]                                           # [BN, M]

    # ---- per-bond 8-layer MLP, all 7 bonds fused via block-diagonal weights ----
    x = jnp.concatenate([h] * N_BONDS, axis=1)                # [BN, 7M]
    for layer in range(N_MLP_LAYERS):
        x = jnp.dot(x, wblk_ref[layer], preferred_element_type=jnp.float32)
        if layer < N_MLP_LAYERS - 1:
            x = jnp.maximum(x, 0.0)

    # ---- adjacency contraction ----
    # 6 non-universal bonds as one matmul: stack per-bond MLP outputs along
    # sublanes (bond-major) and contract against the fused adjacency.
    x6 = jnp.concatenate([x[:, b * M:(b + 1) * M] for b in range(N_BONDS - 1)],
                         axis=0)                              # [6*BN, M]
    m_non = jnp.dot(aflat_ref[...], x6,
                    preferred_element_type=jnp.float32)       # [BN, M]
    m_uni = jnp.dot(auni_ref[...], x[:, (N_BONDS - 1) * M:],
                    preferred_element_type=jnp.float32)       # [BN, M]

    # ---- per-atom-type GRUs (normal + universal), selection folded into MXU ----
    # PyTorch call is GRUCell(h_t, m): input x = h_t, hidden state = message m.
    ohw2 = ohw2_ref[...]                                      # [BN, 2*S*M]
    brows = brows_ref[...]                                    # [BN, 2*GW*M]
    h_m = jnp.concatenate([h] * S, axis=1) * ohw2[:, :S * M]            # [BN, S*M]
    hx_m = jnp.concatenate([m_non] * S + [m_uni] * S, axis=1) * ohw2    # [BN, 2*S*M]

    gi = jnp.dot(h_m, wi_ref[...], preferred_element_type=jnp.float32) \
        + brows[:, :GWM]                                      # [BN, GW*M]
    gh = jnp.dot(hx_m, wh_ref[...], preferred_element_type=jnp.float32) \
        + brows[:, GWM:]                                      # [BN, GW*M]

    # column blocks (each M wide): [r_w0 | r_w1 | z_w0 | z_w1 | n_w0 | n_w1]
    rz = jax.nn.sigmoid(gi[:, :4 * M] + gh[:, :4 * M])        # [BN, 4M]
    r = rz[:, :2 * M]
    z = rz[:, 2 * M:]
    n = jnp.tanh(gi[:, 4 * M:] + r * gh[:, 4 * M:])           # [BN, 2M]
    hx = jnp.concatenate([m_non, m_uni], axis=1)              # [BN, 2M]
    newh = (1.0 - z) * n + z * hx                             # [BN, 2M]
    h_next = newh[:, :M] + newh[:, M:]                        # gru + gru_uni

    ht_ref[...] = h_next

    @pl.when(p == pl.num_programs(0) - 1)
    def _():
        out_ref[...] = h_next.astype(out_ref.dtype)


# ------------------------- wrapper-side packing ------------------------------
def _block_diag_batch(mats):
    """mats: [B, N, N] -> [B*N, B*N] block-diagonal over batch."""
    B, N, _ = mats.shape
    out = jnp.zeros((B * N, B * N), mats.dtype)
    for b in range(B):
        out = out.at[b * N:(b + 1) * N, b * N:(b + 1) * N].set(mats[b])
    return out


def pack_params(params):
    """Repack raw per-bond / per-set weights into the fused kernel layouts."""
    wmsg, wih, whh, bih, bhh = params
    nb, nl, M, _ = wmsg.shape
    S = N_GRU_SETS

    # block-diagonal message-MLP weights: [layer, 7M, 7M]
    wblk = jnp.zeros((nl, nb * M, nb * M), wmsg.dtype)
    for l in range(nl):
        for b in range(nb):
            wblk = wblk.at[l, b * M:(b + 1) * M, b * M:(b + 1) * M].set(wmsg[b, l])

    # GRU weights: contraction dim = (set, M), output cols = (gate, which) blocks
    wi = jnp.zeros((S * M, N_GW * M), wih.dtype)          # shared input h_t
    wh = jnp.zeros((2 * S * M, N_GW * M), whh.dtype)      # hidden differs per which
    bias_cat = jnp.zeros((S, 2 * N_GW * M), bih.dtype)    # [set, ih-bias | hh-bias]
    for s in range(S):
        for gate in range(3):
            for which in range(2):
                col = (gate * 2 + which) * M
                wi = wi.at[s * M:(s + 1) * M, col:col + M].set(wih[which, s, gate])
                row = which * S * M + s * M
                wh = wh.at[row:row + M, col:col + M].set(whh[which, s, gate])
                bias_cat = bias_cat.at[s, col:col + M].set(bih[which, s, gate])
                bias_cat = bias_cat.at[s, N_GW * M + col:N_GW * M + col + M].set(
                    bhh[which, s, gate])
    return wblk, wi, wh, bias_cat


def make_selector(h, top4_atoms):
    """Map each node's atom number (h[:, :, 0]) to one of 6 GRU parameter sets."""
    atom_numbers = h[:, :, 0]
    sel = jnp.full(atom_numbers.shape, N_GRU_SETS - 1, jnp.int32)   # catchall
    for i, a in enumerate(top4_atoms):
        sel = jnp.where(atom_numbers == float(a), i, sel)
    return jax.nn.one_hot(sel, N_GRU_SETS, dtype=jnp.float32)


def big_mpnn_forward(g, h, params, top4_atoms, message_size, message_passes):
    B, N, F = h.shape
    M = message_size
    BN = B * N

    h_t0 = jnp.concatenate([h, jnp.zeros((B, N, M - F), h.dtype)], axis=2)
    h0 = h_t0.reshape(BN, M).astype(jnp.float32)

    # per-node GRU parameter-set selection (computed once, from the ORIGINAL h)
    oh = make_selector(h, top4_atoms).reshape(BN, N_GRU_SETS)        # [BN, 6]
    ohw = jnp.repeat(oh, M, axis=1)                                  # [BN, 6M]
    ohw2 = jnp.concatenate([ohw, ohw], axis=1)                       # [BN, 12M]

    wblk, wi, wh, bias_cat = pack_params(params)
    bias_rows = oh @ bias_cat                                        # [BN, 2*GW*M]

    # fused, batch-block-diagonal adjacency (constant across passes)
    aflat = jnp.concatenate(
        [_block_diag_batch(g[:, bond]) for bond in range(N_BONDS - 1)], axis=1)
    auni = _block_diag_batch(g[:, N_BONDS - 1])

    grid_spec = pltpu.PrefetchScalarGridSpec(
        num_scalar_prefetch=0,
        grid=(message_passes,),
        in_specs=[
            pl.BlockSpec(h0.shape, lambda p: (0, 0)),
            pl.BlockSpec(ohw2.shape, lambda p: (0, 0)),
            pl.BlockSpec(bias_rows.shape, lambda p: (0, 0)),
            pl.BlockSpec(aflat.shape, lambda p: (0, 0)),
            pl.BlockSpec(auni.shape, lambda p: (0, 0)),
            pl.BlockSpec(wblk.shape, lambda p: (0, 0, 0)),
            pl.BlockSpec(wi.shape, lambda p: (0, 0)),
            pl.BlockSpec(wh.shape, lambda p: (0, 0)),
        ],
        out_specs=pl.BlockSpec((BN, M), lambda p: (0, 0)),
        scratch_shapes=[pltpu.VMEM((BN, M), jnp.float32)],
    )
    # TODO(synk): on v7x a second grid axis marked "parallel" could shard work
    # over the two TensorCores; at these sizes one core is sufficient.
    out = pl.pallas_call(
        _mpnn_fused_kernel,
        out_shape=jax.ShapeDtypeStruct((BN, M), jnp.float32),
        grid_spec=grid_spec,
        compiler_params=pltpu.CompilerParams(
            dimension_semantics=("arbitrary",)),
    )(h0, ohw2, bias_rows, aflat, auni, wblk, wi, wh)
    return out.reshape(B, N, M)


# ------------------------- pure-JAX reference --------------------------------
def ref_step(g, h_t, onehot, params):
    wmsg, wih, whh, bih, bhh = params
    msgs = []
    for bond in range(N_BONDS):
        x = h_t
        for layer in range(N_MLP_LAYERS):
            x = jnp.einsum('bnm,mk->bnk', x, wmsg[bond, layer])
            if layer < N_MLP_LAYERS - 1:
                x = jnp.maximum(x, 0.0)
        msgs.append(jnp.einsum('bij,bjm->bim', g[:, bond], x))
    m_nonuni = sum(msgs[:N_BONDS - 1])
    m_uni = msgs[-1]

    def gru(hx, which):
        gates_i, gates_h = [], []
        for gate in range(3):
            gi = jnp.zeros_like(hx)
            gh = jnp.zeros_like(hx)
            for s in range(N_GRU_SETS):
                sel = onehot[:, :, s:s + 1]
                gi = gi + sel * (jnp.einsum('bnm,mk->bnk', h_t, wih[which, s, gate])
                                 + bih[which, s, gate])
                gh = gh + sel * (jnp.einsum('bnm,mk->bnk', hx, whh[which, s, gate])
                                 + bhh[which, s, gate])
            gates_i.append(gi)
            gates_h.append(gh)
        r = jax.nn.sigmoid(gates_i[0] + gates_h[0])
        z = jax.nn.sigmoid(gates_i[1] + gates_h[1])
        n = jnp.tanh(gates_i[2] + r * gates_h[2])
        return (1.0 - z) * n + z * hx

    return gru(m_nonuni, 0) + gru(m_uni, 1)


# ------------------------------ params ---------------------------------------
def init_params(key, M):
    k1, k2, k3, k4, k5 = jax.random.split(key, 5)
    scale = 1.0 / np.sqrt(M)
    # message MLP weights: [bond, layer, in, out]
    wmsg = jax.random.normal(k1, (N_BONDS, N_MLP_LAYERS, M, M), jnp.float32) * scale
    # GRU weights: [which(0=normal,1=universal), param-set, gate(r,z,n), in, out]
    wih = jax.random.normal(k2, (2, N_GRU_SETS, 3, M, M), jnp.float32) * scale
    whh = jax.random.normal(k3, (2, N_GRU_SETS, 3, M, M), jnp.float32) * scale
    bih = jax.random.normal(k4, (2, N_GRU_SETS, 3, M), jnp.float32) * scale
    bhh = jax.random.normal(k5, (2, N_GRU_SETS, 3, M), jnp.float32) * scale
    return wmsg, wih, whh, bih, bhh


if __name__ == "__main__":
    key = jax.random.PRNGKey(0)
    B, Nn, F, M = 2, 16, 8, 32
    message_passes = 2
    ranked_unique_atoms = [6, 8, 7, 1, 16, 9]
    top4_atoms = ranked_unique_atoms[:4] + [0]      # [6, 8, 7, 1, 0]

    kg, kh, ka, kp = jax.random.split(key, 4)
    g = jax.random.uniform(kg, (B, N_BONDS, Nn, Nn), jnp.float32)
    atom_vals = jnp.array([6, 8, 7, 1, 0, 16, 9], jnp.float32)
    atoms = atom_vals[jax.random.randint(ka, (B, Nn), 0, atom_vals.shape[0])]
    feats = jax.random.normal(kh, (B, Nn, F - 1), jnp.float32)
    h = jnp.concatenate([atoms[:, :, None], feats], axis=2)   # h[:, :, 0] = atom number

    params = init_params(kp, M)

    out = big_mpnn_forward(g, h, params, top4_atoms, M, message_passes)
    out = jax.block_until_ready(out)

    # pure-JAX reference check
    h_t_ref = jnp.concatenate([h, jnp.zeros((B, Nn, M - F), h.dtype)], axis=2)
    onehot = make_selector(h, top4_atoms)
    for _ in range(message_passes):
        h_t_ref = ref_step(g, h_t_ref, onehot, params)

    np.testing.assert_allclose(np.asarray(out), np.asarray(h_t_ref),
                               rtol=2e-2, atol=2e-2)
    print("KERNEL_OK")
</pallas_src>

<mosaic_0001>
module attributes {stable_mosaic.version = 11 : i64} {
  func.func @_mpnn_fused_kernel(%arg0: i32, %arg1: memref<32x32xf32, #tpu.memory_space<vmem>>, %arg2: memref<32x384xf32, #tpu.memory_space<vmem>>, %arg3: memref<32x384xf32, #tpu.memory_space<vmem>>, %arg4: memref<32x192xf32, #tpu.memory_space<vmem>>, %arg5: memref<32x32xf32, #tpu.memory_space<vmem>>, %arg6: memref<8x224x224xf32, #tpu.memory_space<vmem>>, %arg7: memref<192x192xf32, #tpu.memory_space<vmem>>, %arg8: memref<384x192xf32, #tpu.memory_space<vmem>>, %arg9: memref<32x32xf32, #tpu.memory_space<vmem>>, %arg10: memref<32x32xf32, #tpu.memory_space<vmem>>) attributes {dimension_semantics = [#tpu.dimension_semantics<arbitrary>], iteration_bounds = array<i64: 2>, scalar_prefetch = 0 : i64, scratch_operands = 1 : i64, tpu.core_type = #tpu.core_type<tc>, window_params = [{pipeline_mode = #tpu.pipeline_mode<synchronous>, transform_indices = @transform_0, window_bounds = array<i64: 32, 32>}, {pipeline_mode = #tpu.pipeline_mode<synchronous>, transform_indices = @transform_1, window_bounds = array<i64: 32, 384>}, {pipeline_mode = #tpu.pipeline_mode<synchronous>, transform_indices = @transform_2, window_bounds = array<i64: 32, 384>}, {pipeline_mode = #tpu.pipeline_mode<synchronous>, transform_indices = @transform_3, window_bounds = array<i64: 32, 192>}, {pipeline_mode = #tpu.pipeline_mode<synchronous>, transform_indices = @transform_4, window_bounds = array<i64: 32, 32>}, {pipeline_mode = #tpu.pipeline_mode<synchronous>, transform_indices = @transform_5, window_bounds = array<i64: 8, 224, 224>}, {pipeline_mode = #tpu.pipeline_mode<synchronous>, transform_indices = @transform_6, window_bounds = array<i64: 192, 192>}, {pipeline_mode = #tpu.pipeline_mode<synchronous>, transform_indices = @transform_7, window_bounds = array<i64: 384, 192>}, {pipeline_mode = #tpu.pipeline_mode<synchronous>, transform_indices = @transform_8, window_bounds = array<i64: 32, 32>}]} {
    %c0_i32 = arith.constant 0 : i32
    %0 = arith.cmpi eq, %arg0, %c0_i32 : i32
    %1 = arith.extui %0 : i1 to i32
    %c0_i32_0 = arith.constant 0 : i32
    %2 = arith.cmpi ne, %1, %c0_i32_0 : i32
    scf.if %2 {
      %c0_54 = arith.constant 0 : index
      %c0_55 = arith.constant 0 : index
      %98 = vector.load %arg1[%c0_54, %c0_55] : memref<32x32xf32, #tpu.memory_space<vmem>>, vector<32x32xf32>
      %c0_56 = arith.constant 0 : index
      %c0_57 = arith.constant 0 : index
      %99 = vector.load %arg10[%c0_56, %c0_57] : memref<32x32xf32, #tpu.memory_space<vmem>>, vector<32x32xf32>
      tpu.vector_store %arg10[%c0_56, %c0_57], %98 {strides = array<i32>} : memref<32x32xf32, #tpu.memory_space<vmem>>, vector<32x32xf32>,
    } else {
    }
    %c0 = arith.constant 0 : index
    %c0_1 = arith.constant 0 : index
    %3 = vector.load %arg10[%c0, %c0_1] : memref<32x32xf32, #tpu.memory_space<vmem>>, vector<32x32xf32>
    %4 = tpu.concatenate %3, %3, %3, %3, %3, %3, %3 in 1 : vector<32x32xf32>, vector<32x32xf32>, vector<32x32xf32>, vector<32x32xf32>, vector<32x32xf32>, vector<32x32xf32>, vector<32x32xf32> -> vector<32x224xf32>
    %c0_2 = arith.constant 0 : index
    %c0_3 = arith.constant 0 : index
    %c0_4 = arith.constant 0 : index
    %5 = vector.load %arg6[%c0_2, %c0_3, %c0_4] : memref<8x224x224xf32, #tpu.memory_space<vmem>>, vector<1x224x224xf32>
    %6 = vector.shape_cast %5 : vector<1x224x224xf32> to vector<224x224xf32>
    %cst = arith.constant dense<0.000000e+00> : vector<32x224xf32>
    %7 = tpu.matmul %4, %6, %cst {dimension_numbers = #tpu.dot_dimension_numbers<[1], [0], [0], [1], [0, 0, 1, 1], [], []>} : vector<32x224xf32>, vector<224x224xf32>, vector<32x224xf32> -> vector<32x224xf32>
    %cst_5 = arith.constant 0.000000e+00 : f32
    %8 = vector.broadcast %cst_5 : f32 to vector<32x224xf32>
    %9 = arith.maximumf %7, %8 : vector<32x224xf32>
    %c1 = arith.constant 1 : index
    %c0_6 = arith.constant 0 : index
    %c0_7 = arith.constant 0 : index
    %10 = vector.load %arg6[%c1, %c0_6, %c0_7] : memref<8x224x224xf32, #tpu.memory_space<vmem>>, vector<1x224x224xf32>
    %11 = vector.shape_cast %10 : vector<1x224x224xf32> to vector<224x224xf32>
    %cst_8 = arith.constant dense<0.000000e+00> : vector<32x224xf32>
    %12 = tpu.matmul %9, %11, %cst_8 {dimension_numbers = #tpu.dot_dimension_numbers<[1], [0], [0], [1], [0, 0, 1, 1], [], []>} : vector<32x224xf32>, vector<224x224xf32>, vector<32x224xf32> -> vector<32x224xf32>
    %cst_9 = arith.constant 0.000000e+00 : f32
    %13 = vector.broadcast %cst_9 : f32 to vector<32x224xf32>
    %14 = arith.maximumf %12, %13 : vector<32x224xf32>
    %c2 = arith.constant 2 : index
    %c0_10 = arith.constant 0 : index
    %c0_11 = arith.constant 0 : index
    %15 = vector.load %arg6[%c2, %c0_10, %c0_11] : memref<8x224x224xf32, #tpu.memory_space<vmem>>, vector<1x224x224xf32>
    %16 = vector.shape_cast %15 : vector<1x224x224xf32> to vector<224x224xf32>
    %cst_12 = arith.constant dense<0.000000e+00> : vector<32x224xf32>
    %17 = tpu.matmul %14, %16, %cst_12 {dimension_numbers = #tpu.dot_dimension_numbers<[1], [0], [0], [1], [0, 0, 1, 1], [], []>} : vector<32x224xf32>, vector<224x224xf32>, vector<32x224xf32> -> vector<32x224xf32>
    %cst_13 = arith.constant 0.000000e+00 : f32
    %18 = vector.broadcast %cst_13 : f32 to vector<32x224xf32>
    %19 = arith.maximumf %17, %18 : vector<32x224xf32>
    %c3 = arith.constant 3 : index
    %c0_14 = arith.constant 0 : index
    %c0_15 = arith.constant 0 : index
    %20 = vector.load %arg6[%c3, %c0_14, %c0_15] : memref<8x224x224xf32, #tpu.memory_space<vmem>>, vector<1x224x224xf32>
    %21 = vector.shape_cast %20 : vector<1x224x224xf32> to vector<224x224xf32>
    %cst_16 = arith.constant dense<0.000000e+00> : vector<32x224xf32>
    %22 = tpu.matmul %19, %21, %cst_16 {dimension_numbers = #tpu.dot_dimension_numbers<[1], [0], [0], [1], [0, 0, 1, 1], [], []>} : vector<32x224xf32>, vector<224x224xf32>, vector<32x224xf32> -> vector<32x224xf32>
    %cst_17 = arith.constant 0.000000e+00 : f32
    %23 = vector.broadcast %cst_17 : f32 to vector<32x224xf32>
    %24 = arith.maximumf %22, %23 : vector<32x224xf32>
    %c4 = arith.constant 4 : index
    %c0_18 = arith.constant 0 : index
    %c0_19 = arith.constant 0 : index
    %25 = vector.load %arg6[%c4, %c0_18, %c0_19] : memref<8x224x224xf32, #tpu.memory_space<vmem>>, vector<1x224x224xf32>
    %26 = vector.shape_cast %25 : vector<1x224x224xf32> to vector<224x224xf32>
    %cst_20 = arith.constant dense<0.000000e+00> : vector<32x224xf32>
    %27 = tpu.matmul %24, %26, %cst_20 {dimension_numbers = #tpu.dot_dimension_numbers<[1], [0], [0], [1], [0, 0, 1, 1], [], []>} : vector<32x224xf32>, vector<224x224xf32>, vector<32x224xf32> -> vector<32x224xf32>
    %cst_21 = arith.constant 0.000000e+00 : f32
    %28 = vector.broadcast %cst_21 : f32 to vector<32x224xf32>
    %29 = arith.maximumf %27, %28 : vector<32x224xf32>
    %c5 = arith.constant 5 : index
    %c0_22 = arith.constant 0 : index
    %c0_23 = arith.constant 0 : index
    %30 = vector.load %arg6[%c5, %c0_22, %c0_23] : memref<8x224x224xf32, #tpu.memory_space<vmem>>, vector<1x224x224xf32>
    %31 = vector.shape_cast %30 : vector<1x224x224xf32> to vector<224x224xf32>
    %cst_24 = arith.constant dense<0.000000e+00> : vector<32x224xf32>
    %32 = tpu.matmul %29, %31, %cst_24 {dimension_numbers = #tpu.dot_dimension_numbers<[1], [0], [0], [1], [0, 0, 1, 1], [], []>} : vector<32x224xf32>, vector<224x224xf32>, vector<32x224xf32> -> vector<32x224xf32>
    %cst_25 = arith.constant 0.000000e+00 : f32
    %33 = vector.broadcast %cst_25 : f32 to vector<32x224xf32>
    %34 = arith.maximumf %32, %33 : vector<32x224xf32>
    %c6 = arith.constant 6 : index
    %c0_26 = arith.constant 0 : index
    %c0_27 = arith.constant 0 : index
    %35 = vector.load %arg6[%c6, %c0_26, %c0_27] : memref<8x224x224xf32, #tpu.memory_space<vmem>>, vector<1x224x224xf32>
    %36 = vector.shape_cast %35 : vector<1x224x224xf32> to vector<224x224xf32>
    %cst_28 = arith.constant dense<0.000000e+00> : vector<32x224xf32>
    %37 = tpu.matmul %34, %36, %cst_28 {dimension_numbers = #tpu.dot_dimension_numbers<[1], [0], [0], [1], [0, 0, 1, 1], [], []>} : vector<32x224xf32>, vector<224x224xf32>, vector<32x224xf32> -> vector<32x224xf32>
    %cst_29 = arith.constant 0.000000e+00 : f32
    %38 = vector.broadcast %cst_29 : f32 to vector<32x224xf32>
    %39 = arith.maximumf %37, %38 : vector<32x224xf32>
    %c7 = arith.constant 7 : index
    %c0_30 = arith.constant 0 : index
    %c0_31 = arith.constant 0 : index
    %40 = vector.load %arg6[%c7, %c0_30, %c0_31] : memref<8x224x224xf32, #tpu.memory_space<vmem>>, vector<1x224x224xf32>
    %41 = vector.shape_cast %40 : vector<1x224x224xf32> to vector<224x224xf32>
    %cst_32 = arith.constant dense<0.000000e+00> : vector<32x224xf32>
    %42 = tpu.matmul %39, %41, %cst_32 {dimension_numbers = #tpu.dot_dimension_numbers<[1], [0], [0], [1], [0, 0, 1, 1], [], []>} : vector<32x224xf32>, vector<224x224xf32>, vector<32x224xf32> -> vector<32x224xf32>
    %43 = vector.extract_strided_slice %42 {offsets = [0, 0], sizes = [32, 32], strides = [1, 1]} : vector<32x224xf32> to vector<32x32xf32>
    %44 = vector.extract_strided_slice %42 {offsets = [0, 32], sizes = [32, 32], strides = [1, 1]} : vector<32x224xf32> to vector<32x32xf32>
    %45 = vector.extract_strided_slice %42 {offsets = [0, 64], sizes = [32, 32], strides = [1, 1]} : vector<32x224xf32> to vector<32x32xf32>
    %46 = vector.extract_strided_slice %42 {offsets = [0, 96], sizes = [32, 32], strides = [1, 1]} : vector<32x224xf32> to vector<32x32xf32>
    %47 = vector.extract_strided_slice %42 {offsets = [0, 128], sizes = [32, 32], strides = [1, 1]} : vector<32x224xf32> to vector<32x32xf32>
    %48 = vector.extract_strided_slice %42 {offsets = [0, 160], sizes = [32, 32], strides = [1, 1]} : vector<32x224xf32> to vector<32x32xf32>
    %49 = tpu.concatenate %43, %44, %45, %46, %47, %48 in 0 : vector<32x32xf32>, vector<32x32xf32>, vector<32x32xf32>, vector<32x32xf32>, vector<32x32xf32>, vector<32x32xf32> -> vector<192x32xf32>
    %c0_33 = arith.constant 0 : index
    %c0_34 = arith.constant 0 : index
    %50 = vector.load %arg4[%c0_33, %c0_34] : memref<32x192xf32, #tpu.memory_space<vmem>>, vector<32x192xf32>
    %cst_35 = arith.constant dense<0.000000e+00> : vector<32x32xf32>
    %51 = tpu.matmul %50, %49, %cst_35 {dimension_numbers = #tpu.dot_dimension_numbers<[1], [0], [0], [1], [0, 0, 1, 1], [], []>} : vector<32x192xf32>, vector<192x32xf32>, vector<32x32xf32> -> vector<32x32xf32>
    %c0_36 = arith.constant 0 : index
    %c0_37 = arith.constant 0 : index
    %52 = vector.load %arg5[%c0_36, %c0_37] : memref<32x32xf32, #tpu.memory_space<vmem>>, vector<32x32xf32>
    %53 = vector.extract_strided_slice %42 {offsets = [0, 192], sizes = [32, 32], strides = [1, 1]} : vector<32x224xf32> to vector<32x32xf32>
    %cst_38 = arith.constant dense<0.000000e+00> : vector<32x32xf32>
    %54 = tpu.matmul %52, %53, %cst_38 {dimension_numbers = #tpu.dot_dimension_numbers<[1], [0], [0], [1], [0, 0, 1, 1], [], []>} : vector<32x32xf32>, vector<32x32xf32>, vector<32x32xf32> -> vector<32x32xf32>
    %c0_39 = arith.constant 0 : index
    %c0_40 = arith.constant 0 : index
    %55 = vector.load %arg2[%c0_39, %c0_40] : memref<32x384xf32, #tpu.memory_space<vmem>>, vector<32x384xf32>
    %c0_41 = arith.constant 0 : index
    %c0_42 = arith.constant 0 : index
    %56 = vector.load %arg3[%c0_41, %c0_42] : memref<32x384xf32, #tpu.memory_space<vmem>>, vector<32x384xf32>
    %57 = tpu.concatenate %3, %3, %3, %3, %3, %3 in 1 : vector<32x32xf32>, vector<32x32xf32>, vector<32x32xf32>, vector<32x32xf32>, vector<32x32xf32>, vector<32x32xf32> -> vector<32x192xf32>
    %58 = vector.extract_strided_slice %55 {offsets = [0, 0], sizes = [32, 192], strides = [1, 1]} : vector<32x384xf32> to vector<32x192xf32>
    %59 = arith.mulf %57, %58 : vector<32x192xf32>
    %60 = tpu.concatenate %51, %51, %51, %51, %51, %51, %54, %54, %54, %54, %54, %54 in 1 : vector<32x32xf32>, vector<32x32xf32>, vector<32x32xf32>, vector<32x32xf32>, vector<32x32xf32>, vector<32x32xf32>, vector<32x32xf32>, vector<32x32xf32>, vector<32x32xf32>, vector<32x32xf32>, vector<32x32xf32>, vector<32x32xf32> -> vector<32x384xf32>
    %61 = arith.mulf %60, %55 : vector<32x384xf32>
    %c0_43 = arith.constant 0 : index
    %c0_44 = arith.constant 0 : index
    %62 = vector.load %arg7[%c0_43, %c0_44] : memref<192x192xf32, #tpu.memory_space<vmem>>, vector<192x192xf32>
    %cst_45 = arith.constant dense<0.000000e+00> : vector<32x192xf32>
    %63 = tpu.matmul %59, %62, %cst_45 {dimension_numbers = #tpu.dot_dimension_numbers<[1], [0], [0], [1], [0, 0, 1, 1], [], []>} : vector<32x192xf32>, vector<192x192xf32>, vector<32x192xf32> -> vector<32x192xf32>
    %64 = vector.extract_strided_slice %56 {offsets = [0, 0], sizes = [32, 192], strides = [1, 1]} : vector<32x384xf32> to vector<32x192xf32>
    %65 = arith.addf %63, %64 : vector<32x192xf32>
    %c0_46 = arith.constant 0 : index
    %c0_47 = arith.constant 0 : index
    %66 = vector.load %arg8[%c0_46, %c0_47] : memref<384x192xf32, #tpu.memory_space<vmem>>, vector<384x192xf32>
    %cst_48 = arith.constant dense<0.000000e+00> : vector<32x192xf32>
    %67 = tpu.matmul %61, %66, %cst_48 {dimension_numbers = #tpu.dot_dimension_numbers<[1], [0], [0], [1], [0, 0, 1, 1], [], []>} : vector<32x384xf32>, vector<384x192xf32>, vector<32x192xf32> -> vector<32x192xf32>
    %68 = vector.extract_strided_slice %56 {offsets = [0, 192], sizes = [32, 192], strides = [1, 1]} : vector<32x384xf32> to vector<32x192xf32>
    %69 = arith.addf %67, %68 : vector<32x192xf32>
    %70 = vector.extract_strided_slice %65 {offsets = [0, 0], sizes = [32, 128], strides = [1, 1]} : vector<32x192xf32> to vector<32x128xf32>
    %71 = vector.extract_strided_slice %69 {offsets = [0, 0], sizes = [32, 128], strides = [1, 1]} : vector<32x192xf32> to vector<32x128xf32>
    %72 = arith.addf %70, %71 : vector<32x128xf32>
    %73 = arith.negf %72 : vector<32x128xf32>
    %74 = math.exp %73 : vector<32x128xf32>
    %cst_49 = arith.constant 1.000000e+00 : f32
    %75 = vector.broadcast %cst_49 : f32 to vector<32x128xf32>
    %76 = arith.addf %75, %74 : vector<32x128xf32>
    %77 = arith.divf %75, %76 : vector<32x128xf32>
    %78 = vector.extract_strided_slice %77 {offsets = [0, 0], sizes = [32, 64], strides = [1, 1]} : vector<32x128xf32> to vector<32x64xf32>
    %79 = vector.extract_strided_slice %77 {offsets = [0, 64], sizes = [32, 64], strides = [1, 1]} : vector<32x128xf32> to vector<32x64xf32>
    %80 = vector.extract_strided_slice %65 {offsets = [0, 128], sizes = [32, 64], strides = [1, 1]} : vector<32x192xf32> to vector<32x64xf32>
    %81 = vector.extract_strided_slice %69 {offsets = [0, 128], sizes = [32, 64], strides = [1, 1]} : vector<32x192xf32> to vector<32x64xf32>
    %82 = arith.mulf %78, %81 : vector<32x64xf32>
    %83 = arith.addf %80, %82 : vector<32x64xf32>
    %84 = math.tanh %83 : vector<32x64xf32>
    %85 = tpu.concatenate %51, %54 in 1 : vector<32x32xf32>, vector<32x32xf32> -> vector<32x64xf32>
    %cst_50 = arith.constant 1.000000e+00 : f32
    %86 = vector.broadcast %cst_50 : f32 to vector<32x64xf32>
    %87 = arith.subf %86, %79 : vector<32x64xf32>
    %88 = arith.mulf %87, %84 : vector<32x64xf32>
    %89 = arith.mulf %79, %85 : vector<32x64xf32>
    %90 = arith.addf %88, %89 : vector<32x64xf32>
    %91 = vector.extract_strided_slice %90 {offsets = [0, 0], sizes = [32, 32], strides = [1, 1]} : vector<32x64xf32> to vector<32x32xf32>
    %92 = vector.extract_strided_slice %90 {offsets = [0, 32], sizes = [32, 32], strides = [1, 1]} : vector<32x64xf32> to vector<32x32xf32>
    %93 = arith.addf %91, %92 : vector<32x32xf32>
    %c0_51 = arith.constant 0 : index
    %c0_52 = arith.constant 0 : index
    %94 = vector.load %arg10[%c0_51, %c0_52] : memref<32x32xf32, #tpu.memory_space<vmem>>, vector<32x32xf32>
    tpu.vector_store %arg10[%c0_51, %c0_52], %93 {strides = array<i32>} : memref<32x32xf32, #tpu.memory_space<vmem>>, vector<32x32xf32>,
    %c1_i32 = arith.constant 1 : i32
    %95 = arith.cmpi eq, %arg0, %c1_i32 : i32
    %96 = arith.extui %95 : i1 to i32
    %c0_i32_53 = arith.constant 0 : i32
    %97 = arith.cmpi ne, %96, %c0_i32_53 : i32
    scf.if %97 {
      %c0_54 = arith.constant 0 : index
      %c0_55 = arith.constant 0 : index
      %98 = vector.load %arg9[%c0_54, %c0_55] : memref<32x32xf32, #tpu.memory_space<vmem>>, vector<32x32xf32>
      tpu.vector_store %arg9[%c0_54, %c0_55], %93 {strides = array<i32>} : memref<32x32xf32, #tpu.memory_space<vmem>>, vector<32x32xf32>,
    } else {
    }
    return
  }
  func.func @transform_0(%arg0: i32) -> (i32, i32) {
    %c0_i32 = arith.constant 0 : i32
    %c0_i32_0 = arith.constant 0 : i32
    %c0_i32_1 = arith.constant 0 : i32
    return %c0_i32, %c0_i32_0 : i32, i32
  }
  func.func @transform_1(%arg0: i32) -> (i32, i32) {
    %c0_i32 = arith.constant 0 : i32
    %c0_i32_0 = arith.constant 0 : i32
    %c0_i32_1 = arith.constant 0 : i32
    return %c0_i32, %c0_i32_0 : i32, i32
  }
  func.func @transform_2(%arg0: i32) -> (i32, i32) {
    %c0_i32 = arith.constant 0 : i32
    %c0_i32_0 = arith.constant 0 : i32
    %c0_i32_1 = arith.constant 0 : i32
    return %c0_i32, %c0_i32_0 : i32, i32
  }
  func.func @transform_3(%arg0: i32) -> (i32, i32) {
    %c0_i32 = arith.constant 0 : i32
    %c0_i32_0 = arith.constant 0 : i32
    %c0_i32_1 = arith.constant 0 : i32
    return %c0_i32, %c0_i32_0 : i32, i32
  }
  func.func @transform_4(%arg0: i32) -> (i32, i32) {
    %c0_i32 = arith.constant 0 : i32
    %c0_i32_0 = arith.constant 0 : i32
    %c0_i32_1 = arith.constant 0 : i32
    return %c0_i32, %c0_i32_0 : i32, i32
  }
  func.func @transform_5(%arg0: i32) -> (i32, i32, i32) {
    %c0_i32 = arith.constant 0 : i32
    %c0_i32_0 = arith.constant 0 : i32
    %c0_i32_1 = arith.constant 0 : i32
    %c0_i32_2 = arith.constant 0 : i32
    return %c0_i32, %c0_i32_0, %c0_i32_1 : i32, i32, i32
  }
  func.func @transform_6(%arg0: i32) -> (i32, i32) {
    %c0_i32 = arith.constant 0 : i32
    %c0_i32_0 = arith.constant 0 : i32
    %c0_i32_1 = arith.constant 0 : i32
    return %c0_i32, %c0_i32_0 : i32, i32
  }
  func.func @transform_7(%arg0: i32) -> (i32, i32) {
    %c0_i32 = arith.constant 0 : i32
    %c0_i32_0 = arith.constant 0 : i32
    %c0_i32_1 = arith.constant 0 : i32
    return %c0_i32, %c0_i32_0 : i32, i32
  }
  func.func @transform_8(%arg0: i32) -> (i32, i32) {
    %c0_i32 = arith.constant 0 : i32
    %c0_i32_0 = arith.constant 0 : i32
    %c0_i32_1 = arith.constant 0 : i32
    return %c0_i32, %c0_i32_0 : i32, i32
  }
}

</mosaic_0001>

<bundles_post_ra>
// kernel: tpu_custom_call.1
= control target key start
LH: loop header
LB: loop body
LE: loop exit
PB: predicated region body
PF: predicated region fallthrough
CT: control target
= control target key end

     0   :  { %13 = vsyncpa [#allocation4], 0  ;;  %s4666_s0 = inlined_call_operand.hbm [shape: f32[32,32], index: 0, kind: input, shape index: {}]   ;;  %s4667_s1 = inlined_call_operand.hbm [shape: f32[32,384], index: 1, kind: input, shape index: {}]   ;;  %s4668_s2 = inlined_call_operand.hbm [shape: f32[32,384], index: 2, kind: input, shape index: {}]   ;;  %s4669_s3 = inlined_call_operand.hbm [shape: f32[32,192], index: 3, kind: input, shape index: {}]   ;;  %s4670_s4 = inlined_call_operand.hbm [shape: f32[32,32], index: 4, kind: input, shape index: {}]   ;;  %s4671_s5 = inlined_call_operand.hbm [shape: f32[8,224,224], index: 5, kind: input, shape index: {}]   ;;  %s4672_s6 = inlined_call_operand.hbm [shape: f32[192,192], index: 6, kind: input, shape index: {}]   ;;  %s4673_s7 = inlined_call_operand.vmem [shape: f32[384,192], index: 7, kind: input, shape index: {}]   ;;  %s4674_s8 = inlined_call_operand.hbm [shape: f32[32,32], index: 8, kind: output, shape index: {}]  }
   0x1   :  { %14 = vsyncpa [#allocation7], 0 }
   0x2   :  { %15 = vsyncpa [#allocation10], 0 }
   0x3   :  { %16 = vsyncpa [#allocation13], 0 }
   0x4   :  { %17 = vsyncpa [#allocation5], 0  ;;  %s3750_s27 = smov 0  }
   0x5 LB: > { %s242_s30 = sshll.u32 %s4667_s1, 4  ;;  %s3759_s9 = sadd.s32 4294967295, %s3684_s27   ;;  %s3684_s27 = sphi %s3750_s27, %s23_s27   ;;  %s243_s30 = int_to_ptr.hbm [resolvable:$true] %s242_s30 }
   0x6   : > { %p3124_p0 = scmp.ge.s32.totalorder %s3684_s27, 1  ;;  %p217_p1 = scmp.lt.s32.totalorder %s3684_s27, 3 }
   0x7   : > { %p3125_p2 = scmp.ne.s32.totalorder %s3759_s9, 0  ;;  %p3300_p3 = scmp.eq.s32.totalorder %s3759_s9, 0 }
   0x8   : > { %p3765_p4 = pnand %p3124_p0, %p217_p1  ;;  %s3686_s11 = smov [#allocation6]  }
   0x9   : > { %s244_s12 = sshll.u32 %s3686_s11, 4  ;;  %s270_s15 = sshll.u32 %s4669_s3, 4  ;;  %s245_s12 = int_to_ptr.vmem [resolvable:$true] %s244_s12  ;;  %s271_s15 = int_to_ptr.hbm [resolvable:$true] %s270_s15 }
   0xa   : > { %p3278_p5 = pneg %p3765_p4  ;;  %s3687_s17 = smov [#allocation9]  }
   0xb   : > { %s272_s18 = sshll.u32 %s3687_s17, 4  ;;  %s3688_s19 = smov 384   ;;  %s273_s18 = int_to_ptr.vmem [resolvable:$true] %s272_s18 }
   0xc   : > { %p3776_p6 = pnand %p3300_p3, %p3278_p5  ;;  %s3689_s20 = smov 24  }
   0xd   : > { %s298_s23 = sshll.u32 %s4671_s5, 4  ;;  %s3690_s24 = smov 256   ;;  %s299_s23 = int_to_ptr.hbm [resolvable:$true] %s298_s23 }
   0xe   : > { %3284 = dma.hbm_to_vmem [thread:$0]  (!%p3776_p6), %s243_s30, 1536, %s245_s12, [#allocation7], %s3688_s19, %s3688_s19, %s3689_s20  }
   0xf   : > { %s3691_s25 = smov 16   ;;  %s3692_s26 = smov [#allocation12]  }
  0x10   : > { %3290 = dma.hbm_to_vmem [thread:$0]  (!%p3776_p6), %s271_s15, 1024, %s273_s18, [#allocation10], %s3690_s24, %s3690_s24, %s3691_s25  }
  0x11   : > { %s300_s28 = sshll.u32 %s3692_s26, 4  ;;  %s228_s13 = sshll.u32 %s4666_s0, 4  ;;  %s301_s28 = int_to_ptr.vmem [resolvable:$true] %s300_s28  ;;  %s229_s13 = int_to_ptr.hbm [resolvable:$true] %s228_s13 }
  0x12   : > { %3296 = dma.hbm_to_vmem [thread:$0]  (!%p3776_p6), %s299_s23, 57344, %s301_s28, [#allocation13], %s3690_s24, %s3690_s24, %s3691_s25  }
  0x13   : > { %s3693_s30 = smov [#allocation3]   ;;  %s256_s17 = sshll.u32 %s4668_s2, 4  ;;  %s257_s17 = int_to_ptr.hbm [resolvable:$true] %s256_s17 }
  0x14   : > { %s230_s12 = sshll.u32 %s3693_s30, 4  ;;  %s3694_s18 = smov 128   ;;  %s231_s12 = int_to_ptr.vmem [resolvable:$true] %s230_s12 }
  0x15   : > { %s3695_s21 = smov 8   ;;  %s3696_s22 = smov [#allocation8]  }
  0x16   : > { %3281 = dma.hbm_to_vmem [thread:$0]  (!%p3776_p6), %s229_s13, 512, %s231_s12, [#allocation4], %s3694_s18, %s3694_s18, %s3695_s21  }
  0x17   : > { %s258_s26 = sshll.u32 %s3696_s22, 4  ;;  %s284_s23 = sshll.u32 %s4670_s4, 4  ;;  %s259_s26 = int_to_ptr.vmem [resolvable:$true] %s258_s26  ;;  %s285_s23 = int_to_ptr.hbm [resolvable:$true] %s284_s23 }
  0x18   : > { %3287 = dma.hbm_to_vmem [thread:$0]  (!%p3776_p6), %s257_s17, 1536, %s259_s26, [#allocation7], %s3688_s19, %s3688_s19, %s3689_s20  }
  0x19   : > { %s312_s14 = sshll.u32 %s4672_s6, 4  ;;  %s3697_s13 = smov [#allocation11]   ;;  %s313_s14 = int_to_ptr.hbm [resolvable:$true] %s312_s14 }
  0x1a   : > { %s286_s12 = sshll.u32 %s3697_s13, 4  ;;  %s3698_s15 = smov [#allocation14]   ;;  %s287_s12 = int_to_ptr.vmem [resolvable:$true] %s286_s12 }
  0x1b   : > { %3293 = dma.hbm_to_vmem [thread:$0]  (!%p3776_p6), %s285_s23, 512, %s287_s12, [#allocation10], %s3694_s18, %s3694_s18, %s3695_s21  }
  0x1c   : > { %s314_s22 = sshll.u32 %s3698_s15, 4  ;;  %333 = sbr.rel (%p3765_p4) target bundleno = 2268 (0x8dc), region = 52  ;;  %s315_s22 = int_to_ptr.vmem [resolvable:$true] %s314_s22 }
  0x1d   : > { %3299 = dma.hbm_to_vmem [thread:$0]  (!%p3776_p6), %s313_s14, 6144, %s315_s22, [#allocation13], %s3690_s24, %s3690_s24, %s3691_s25  }
  0x21   : > { %3663 = dma.done.wait (%p3300_p3), [#allocation4], 512  }
  0x22   : > { %3665 = vsyncadd (%p3300_p3), [#allocation4], 4294966784 }
  0x23   : > { %3667 = dma.done.wait (%p3300_p3), [#allocation7], 3072  }
  0x24   : > { %3669 = vsyncadd (%p3300_p3), [#allocation7], 4294964224 }
  0x25   : > { %3671 = dma.done.wait (%p3300_p3), [#allocation10], 1536  }
  0x26   : > { %3673 = vsyncadd (%p3300_p3), [#allocation10], 4294965760 }
  0x27   : > { %3675 = dma.done.wait (%p3300_p3), [#allocation13], 63488  }
  0x28   : > { %3677 = vsyncadd (%p3300_p3), [#allocation13], 4294903808  ;;  %391 = sbr.rel (%p3125_p2) target bundleno = 50 (0x32), region = 84 }
  0x2d   : > { %v392_v0 = vld [vmem:[#allocation3] sm:$0xff]  ;;  %vm396_vm0 = vcmask 261120   ;;  %v393_v1 = vld [vmem:[#allocation3 + $0x8] sm:$0xff]  ;;  %v394_v2 = vld [vmem:[#allocation3 + $0x10] sm:$0xff] }
  0x2e   : > { %397 = vst.msk [vmem:[#allocation2] sm:$0xff] %vm396_vm0, %v392_v0  ;;  %v395_v3 = vld [vmem:[#allocation3 + $0x18] sm:$0xff] }
  0x2f   : > { %398 = vst.msk [vmem:[#allocation2 + $0x8] sm:$0xff] %vm396_vm0, %v393_v1 }
  0x30   : > { %399 = vst.msk [vmem:[#allocation2 + $0x10] sm:$0xff] %vm396_vm0, %v394_v2 }
  0x31   : > { %400 = vst.msk [vmem:[#allocation2 + $0x18] sm:$0xff] %vm396_vm0, %v395_v3 }
  0x32 PF: > { %s3699_s10 = smov 96   ;;  %s3700_s16 = smov 32   ;;  %v490_v6 = vld [vmem:[#allocation12 + $0xf0] sm:$0xff]  ;;  %v491_v7 = vld [vmem:[#allocation12 + $0xf8] sm:$0xff]  ;;  %v488_v8 = vld [vmem:[#allocation12 + $0xe0] sm:$0xff]  ;;  %vm445_vm1 = vcmask 261120  }
  0x33   : > { %s3701_s19 = smov 64   ;;  %528 = vmatpush.msra.mxu0 %v490_v6  ;;  %v489_v9 = vld [vmem:[#allocation12 + $0xe8] sm:$0xff]  ;;  %586 = vmatpush.msra.mxu2 %v491_v7  ;;  %v486_v10 = vld [vmem:[#allocation12 + $0xd0] sm:$0xff]  ;;  %v487_v11 = vld [vmem:[#allocation12 + $0xd8] sm:$0xff]  ;;  %vm450_vm2 = vcmask 523264   ;;  %vm455_vm3 = vcmask 785408  }
  0x34   : > { %v514_v12 = vld [vmem:[#allocation12 + $0x1b0] sm:$0xff]  ;;  %v515_v13 = vld [vmem:[#allocation12 + $0x1b8] sm:$0xff]  ;;  %v484_v14 = vld [vmem:[#allocation12 + $0xc0] sm:$0xff]  ;;  %p3225_p7 = scmp.ne.s32.totalorder %s3759_s9, 1 }
  0x35   : > { %v3844_v4 = vld [vmem:[#allocation2] sm:$0xff]  ;;  %529 = vmatpush.msra.mxu0 %v488_v8  ;;  %587 = vmatpush.msra.mxu2 %v489_v9  ;;  %v513_v16 = vld [vmem:[#allocation12 + $0x1a8] sm:$0xff]  ;;  %v482_v18 = vld [vmem:[#allocation12 + $0xb0] sm:$0xff] }
  0x36   : > { %433 = vrot.lane.b32.xlu1 %v3844_v4, %s3699_s10  ;;  %409 = vrot.lane.b32.xlu0 %v3844_v4, %s3700_s16  ;;  %v3850_v5 = vld [vmem:[#allocation2 + $0x8] sm:$0xff]  ;;  %v512_v15 = vld [vmem:[#allocation12 + $0x1a0] sm:$0xff]  ;;  %v510_v19 = vld [vmem:[#allocation12 + $0x190] sm:$0xff] }
  0x37   : > { %423 = vrot.lane.b32.xlu2 %v3850_v5, %s3701_s19  ;;  %561 = vmatpush.msra.mxu1 %v514_v12  ;;  %v485_v17 = vld [vmem:[#allocation12 + $0xc8] sm:$0xff]  ;;  %v483_v20 = vld [vmem:[#allocation12 + $0xb8] sm:$0xff]  ;;  %v480_v22 = vld [vmem:[#allocation12 + $0xa0] sm:$0xff] }
  0x38   : > { %530 = vmatpush.msra.mxu0 %v486_v10  ;;  %619 = vmatpush.msra.mxu3 %v515_v13  ;;  %v511_v21 = vld [vmem:[#allocation12 + $0x198] sm:$0xff]  ;;  %v508_v23 = vld [vmem:[#allocation12 + $0x180] sm:$0xff]  ;;  %v481_v24 = vld [vmem:[#allocation12 + $0xa8] sm:$0xff] }
  0x39   : > { %588 = vmatpush.msra.mxu2 %v487_v11  ;;  %562 = vmatpush.msra.mxu1 %v512_v15  ;;  %v509_v25 = vld [vmem:[#allocation12 + $0x188] sm:$0xff]  ;;  %v478_v26 = vld [vmem:[#allocation12 + $0x90] sm:$0xff]  ;;  %v479_v28 = vld [vmem:[#allocation12 + $0x98] sm:$0xff] }
  0x3a   : > { %531 = vmatpush.msra.mxu0 %v484_v14  ;;  %620 = vmatpush.msra.mxu3 %v513_v16  ;;  %v506_v27 = vld [vmem:[#allocation12 + $0x170] sm:$0xff]  ;;  %v507_v29 = vld [vmem:[#allocation12 + $0x178] sm:$0xff]  ;;  %v476_v31 = vld [vmem:[#allocation12 + $0x80] sm:$0xff] }
  0x3b   : > { %589 = vmatpush.msra.mxu2 %v485_v17  ;;  %563 = vmatpush.msra.mxu1 %v510_v19  ;;  %v3860_v30 = vld [vmem:[#allocation2 + $0x10] sm:$0xff]  ;;  %v477_v32 = vld [vmem:[#allocation12 + $0x88] sm:$0xff]  ;;  %v504_v33 = vld [vmem:[#allocation12 + $0x160] sm:$0xff] }
  0x3c   : > { %532 = vmatpush.msra.mxu0 %v482_v18  ;;  %621 = vmatpush.msra.mxu3 %v511_v21  ;;  %v474_v34 = vld [vmem:[#allocation12 + $0x70] sm:$0xff]  ;;  %v505_v35 = vld [vmem:[#allocation12 + $0x168] sm:$0xff]  ;;  %v475_v36 = vld [vmem:[#allocation12 + $0x78] sm:$0xff] }
  0x3d   : > { %590 = vmatpush.msra.mxu2 %v483_v20  ;;  %564 = vmatpush.msra.mxu1 %v508_v23  ;;  %v502_v37 = vld [vmem:[#allocation12 + $0x150] sm:$0xff]  ;;  %v472_v38 = vld [vmem:[#allocation12 + $0x60] sm:$0xff]  ;;  %v503_v39 = vld [vmem:[#allocation12 + $0x158] sm:$0xff] }
  0x3e   : > { %411 = vrot.lane.b32.xlu1 %v3850_v5, %s3700_s16  ;;  %421 = vrot.lane.b32.xlu0 %v3844_v4, %s3701_s19  ;;  %v473_v40 = vld [vmem:[#allocation12 + $0x68] sm:$0xff]  ;;  %v470_v41 = vld [vmem:[#allocation12 + $0x50] sm:$0xff]  ;;  %v3868_v42 = vld [vmem:[#allocation2 + $0x18] sm:$0xff] }
  0x3f   : > { %435 = vrot.lane.b32.xlu2 %v3850_v5, %s3699_s10  ;;  %533 = vmatpush.msra.mxu0 %v480_v22  ;;  %v471_v43 = vld [vmem:[#allocation12 + $0x58] sm:$0xff]  ;;  %v500_v44 = vld [vmem:[#allocation12 + $0x140] sm:$0xff]  ;;  %v501_v45 = vld [vmem:[#allocation12 + $0x148] sm:$0xff] }
  0x40   : > { %591 = vmatpush.msra.mxu2 %v481_v24  ;;  %622 = vmatpush.msra.mxu3 %v509_v25  ;;  %v468_v46 = vld [vmem:[#allocation12 + $0x40] sm:$0xff]  ;;  %v469_v47 = vld [vmem:[#allocation12 + $0x48] sm:$0xff]  ;;  %v498_v48 = vld [vmem:[#allocation12 + $0x130] sm:$0xff] }
  0x41   : > { %534 = vmatpush.msra.mxu0 %v478_v26  ;;  %565 = vmatpush.msra.mxu1 %v506_v27  ;;  %v499_v49 = vld [vmem:[#allocation12 + $0x138] sm:$0xff]  ;;  %v466_v50 = vld [vmem:[#allocation12 + $0x30] sm:$0xff]  ;;  %v496_v52 = vld [vmem:[#allocation12 + $0x120] sm:$0xff] }
  0x42   : > { %592 = vmatpush.msra.mxu2 %v479_v28  ;;  %623 = vmatpush.msra.mxu3 %v507_v29  ;;  %v467_v51 = vld [vmem:[#allocation12 + $0x38] sm:$0xff]  ;;  %v497_v53 = vld [vmem:[#allocation12 + $0x128] sm:$0xff]  ;;  %v464_v54 = vld [vmem:[#allocation12 + $0x20] sm:$0xff] }
  0x43   : > { %535 = vmatpush.msra.mxu0 %v476_v31  ;;  %566 = vmatpush.msra.mxu1 %v504_v33  ;;  %v465_v55 = vld [vmem:[#allocation12 + $0x28] sm:$0xff]  ;;  %v494_v56 = vld [vmem:[#allocation12 + $0x110] sm:$0xff]  ;;  %v495_v57 = vld [vmem:[#allocation12 + $0x118] sm:$0xff] }
  0x44   : > { %593 = vmatpush.msra.mxu2 %v477_v32  ;;  %624 = vmatpush.msra.mxu3 %v505_v35  ;;  %v462_v58 = vld [vmem:[#allocation12 + $0x10] sm:$0xff]  ;;  %v463_v59 = vld [vmem:[#allocation12 + $0x18] sm:$0xff]  ;;  %v492_v60 = vld [vmem:[#allocation12 + $0x100] sm:$0xff] }
  0x45   : > { %536 = vmatpush.msra.mxu0 %v474_v34  ;;  %567 = vmatpush.msra.mxu1 %v502_v37  ;;  %v493_v61 = vld [vmem:[#allocation12 + $0x108] sm:$0xff]  ;;  %v460_v62 = vld [vmem:[#allocation12] sm:$0xff]  ;;  %v683_v3 = vld [vmem:[#allocation12 + $0x2b0] sm:$0xff] }
  0x46   : > { %413 = vrot.lane.b32.xlu0 %v3860_v30, %s3700_s16  ;;  %425 = vrot.lane.b32.xlu1 %v3860_v30, %s3701_s19  ;;  %v461_v63 = vld [vmem:[#allocation12 + $0x8] sm:$0xff]  ;;  %v684_v6 = vld [vmem:[#allocation12 + $0x2b8] sm:$0xff]  ;;  %v681_v7 = vld [vmem:[#allocation12 + $0x2a0] sm:$0xff] }
  0x47   : > { %437 = vrot.lane.b32.xlu2 %v3860_v30, %s3699_s10  ;;  %594 = vmatpush.msra.mxu2 %v475_v36  ;;  %v682_v8 = vld [vmem:[#allocation12 + $0x2a8] sm:$0xff]  ;;  %v679_v9 = vld [vmem:[#allocation12 + $0x290] sm:$0xff]  ;;  %v680_v10 = vld [vmem:[#allocation12 + $0x298] sm:$0xff] }
  0x48   : > { %537 = vmatpush.msra.mxu0 %v472_v38  ;;  %625 = vmatpush.msra.mxu3 %v503_v39  ;;  %v707_v14 = vld [vmem:[#allocation12 + $0x370] sm:$0xff]  ;;  %v708_v15 = vld [vmem:[#allocation12 + $0x378] sm:$0xff]  ;;  %v677_v17 = vld [vmem:[#allocation12 + $0x280] sm:$0xff] }
  0x49   : > { %595 = vmatpush.msra.mxu2 %v473_v40  ;;  %568 = vmatpush.msra.mxu1 %v500_v44  ;;  %v678_v18 = vld [vmem:[#allocation12 + $0x288] sm:$0xff]  ;;  %v705_v19 = vld [vmem:[#allocation12 + $0x360] sm:$0xff]  ;;  %v675_v22 = vld [vmem:[#allocation12 + $0x270] sm:$0xff] }
  0x4a   : > { %538 = vmatpush.msra.mxu0 %v470_v41  ;;  %626 = vmatpush.msra.mxu3 %v501_v45  ;;  %v706_v20 = vld [vmem:[#allocation12 + $0x368] sm:$0xff]  ;;  %v676_v23 = vld [vmem:[#allocation12 + $0x278] sm:$0xff]  ;;  %v703_v25 = vld [vmem:[#allocation12 + $0x350] sm:$0xff] }
  0x4b   : > { %596 = vmatpush.msra.mxu2 %v471_v43  ;;  %569 = vmatpush.msra.mxu1 %v498_v48  ;;  %v704_v26 = vld [vmem:[#allocation12 + $0x358] sm:$0xff]  ;;  %v673_v27 = vld [vmem:[#allocation12 + $0x260] sm:$0xff]  ;;  %v674_v28 = vld [vmem:[#allocation12 + $0x268] sm:$0xff] }
  0x4c   : > { %539 = vmatpush.msra.mxu0 %v468_v46  ;;  %627 = vmatpush.msra.mxu3 %v499_v49  ;;  %v701_v29 = vld [vmem:[#allocation12 + $0x340] sm:$0xff]  ;;  %v702_v31 = vld [vmem:[#allocation12 + $0x348] sm:$0xff]  ;;  %v671_v34 = vld [vmem:[#allocation12 + $0x250] sm:$0xff] }
  0x4d   : > { %597 = vmatpush.msra.mxu2 %v469_v47  ;;  %570 = vmatpush.msra.mxu1 %v496_v52  ;;  %v672_v35 = vld [vmem:[#allocation12 + $0x258] sm:$0xff]  ;;  %v699_v38 = vld [vmem:[#allocation12 + $0x330] sm:$0xff]  ;;  %v669_v41 = vld [vmem:[#allocation12 + $0x240] sm:$0xff] }
  0x4e   : > { %415 = vrot.lane.b32.xlu0 %v3868_v42, %s3700_s16  ;;  %427 = vrot.lane.b32.xlu1 %v3868_v42, %s3701_s19  ;;  %v700_v39 = vld [vmem:[#allocation12 + $0x338] sm:$0xff]  ;;  %v670_v43 = vld [vmem:[#allocation12 + $0x248] sm:$0xff]  ;;  %v697_v44 = vld [vmem:[#allocation12 + $0x320] sm:$0xff] }
  0x4f   : > { %439 = vrot.lane.b32.xlu2 %v3868_v42, %s3699_s10  ;;  %540 = vmatpush.msra.mxu0 %v466_v50  ;;  %v698_v45 = vld [vmem:[#allocation12 + $0x328] sm:$0xff]  ;;  %v667_v47 = vld [vmem:[#allocation12 + $0x230] sm:$0xff]  ;;  %v668_v48 = vld [vmem:[#allocation12 + $0x238] sm:$0xff] }
  0x50   : > { %598 = vmatpush.msra.mxu2 %v467_v51  ;;  %628 = vmatpush.msra.mxu3 %v497_v53  ;;  %v665_v50 = vld [vmem:[#allocation12 + $0x220] sm:$0xff]  ;;  %v666_v51 = vld [vmem:[#allocation12 + $0x228] sm:$0xff] }
  0x51   : > { %541 = vmatpush.msra.mxu0 %v464_v54  ;;  %571 = vmatpush.msra.mxu1 %v494_v56  ;;  %v663_v54 = vld [vmem:[#allocation12 + $0x210] sm:$0xff] }
  0x52   : > { %599 = vmatpush.msra.mxu2 %v465_v55  ;;  %629 = vmatpush.msra.mxu3 %v495_v57  ;;  %v664_v55 = vld [vmem:[#allocation12 + $0x218] sm:$0xff] }
  0x53   : > { %542 = vmatpush.msra.mxu0 %v462_v58  ;;  %572 = vmatpush.msra.mxu1 %v492_v60  ;;  %v661_v58 = vld [vmem:[#allocation12 + $0x200] sm:$0xff]  ;;  %v659_v60 = vld [vmem:[#allocation12 + $0x1f0] sm:$0xff] }
  0x54   : > { %600 = vmatpush.msra.mxu2 %v463_v59  ;;  %630 = vmatpush.msra.mxu3 %v493_v61  ;;  %v662_v59 = vld [vmem:[#allocation12 + $0x208] sm:$0xff]  ;;  %v660_v61 = vld [vmem:[#allocation12 + $0x1f8] sm:$0xff] }
  0x55   : > { %543 = vmatpush.msra.mxu0 %v460_v62  ;;  %721 = vmatpush.msrb.mxu1 %v683_v3  ;;  %v657_v62 = vld [vmem:[#allocation12 + $0x1e0] sm:$0xff] }
  0x56   : > { %601 = vmatpush.msra.mxu2 %v461_v63  ;;  %754 = vmatpush.msrb.mxu3 %v707_v14  ;;  %v695_v63 = vld [vmem:[#allocation12 + $0x310] sm:$0xff]  ;;  %v693_v3 = vld [vmem:[#allocation12 + $0x300] sm:$0xff]  ;;  %v690_v14 = vld [vmem:[#allocation12 + $0x2e8] sm:$0xff] }
  0x57   : > { %779 = vmatpush.msrb.mxu0 %v684_v6  ;;  %722 = vmatpush.msrb.mxu1 %v681_v7  ;;  %v656_v6 = vld [vmem:[#allocation12 + $0x1d8] sm:$0xff]  ;;  %v694_v7 = vld [vmem:[#allocation12 + $0x308] sm:$0xff] }
  0x58   : > { %812 = vmatpush.msrb.mxu2 %v708_v15  ;;  %755 = vmatpush.msrb.mxu3 %v705_v19  ;;  %v687_v15 = vld [vmem:[#allocation12 + $0x2d0] sm:$0xff] }
  0x59   : > { %780 = vmatpush.msrb.mxu0 %v682_v8  ;;  %723 = vmatpush.msrb.mxu1 %v679_v9  ;;  %v653_v8 = vld [vmem:[#allocation12 + $0x1c0] sm:$0xff]  ;;  %v691_v9 = vld [vmem:[#allocation12 + $0x2f0] sm:$0xff] }
  0x5a   : > { %813 = vmatpush.msrb.mxu2 %v706_v20  ;;  %756 = vmatpush.msrb.mxu3 %v703_v25  ;;  %v877_v25 = vld [vmem:[#allocation12 + $0x478] sm:$0xff] }
  0x5b   : > { %781 = vmatpush.msrb.mxu0 %v680_v10  ;;  %724 = vmatpush.msrb.mxu1 %v677_v17  ;;  %v654_v10 = vld [vmem:[#allocation12 + $0x1c8] sm:$0xff]  ;;  %v685_v17 = vld [vmem:[#allocation12 + $0x2c0] sm:$0xff] }
  0x5c   : > { %814 = vmatpush.msrb.mxu2 %v704_v26  ;;  %757 = vmatpush.msrb.mxu3 %v701_v29  ;;  %v874_v26 = vld [vmem:[#allocation12 + $0x460] sm:$0xff]  ;;  %v872_v29 = vld [vmem:[#allocation12 + $0x450] sm:$0xff] }
  0x5d   : > { %782 = vmatpush.msrb.mxu0 %v678_v18  ;;  %725 = vmatpush.msrb.mxu1 %v675_v22  ;;  %v686_v18 = vld [vmem:[#allocation12 + $0x2c8] sm:$0xff] }
  0x5e   : > { %815 = vmatpush.msrb.mxu2 %v702_v31  ;;  %758 = vmatpush.msrb.mxu3 %v699_v38  ;;  %v873_v31 = vld [vmem:[#allocation12 + $0x458] sm:$0xff]  ;;  %v870_v38 = vld [vmem:[#allocation12 + $0x440] sm:$0xff] }
  0x5f   : > { %783 = vmatpush.msrb.mxu0 %v676_v23  ;;  %726 = vmatpush.msrb.mxu1 %v673_v27  ;;  %v876_v23 = vld [vmem:[#allocation12 + $0x470] sm:$0xff]  ;;  %v875_v27 = vld [vmem:[#allocation12 + $0x468] sm:$0xff] }
  0x60   : > { %816 = vmatpush.msrb.mxu2 %v700_v39  ;;  %759 = vmatpush.msrb.mxu3 %v697_v44  ;;  %v871_v39 = vld [vmem:[#allocation12 + $0x448] sm:$0xff] }
  0x61   : > { %784 = vmatpush.msrb.mxu0 %v674_v28  ;;  %727 = vmatpush.msrb.mxu1 %v671_v34 }
  0x62   : > { %817 = vmatpush.msrb.mxu2 %v698_v45  ;;  %760 = vmatpush.msrb.mxu3 %v695_v63 }
  0x63   : > { %785 = vmatpush.msrb.mxu0 %v672_v35  ;;  %728 = vmatpush.msrb.mxu1 %v669_v41 }
  0x64   : > { %761 = vmatpush.msrb.mxu3 %v693_v3 }
  0x65   : > { %786 = vmatpush.msrb.mxu0 %v670_v43  ;;  %729 = vmatpush.msrb.mxu1 %v667_v47  ;;  %v899_v43 = vld [vmem:[#allocation12 + $0x528] sm:$0xff]  ;;  %v869_v47 = vld [vmem:[#allocation12 + $0x438] sm:$0xff] }
  0x66   : > { %762 = vmatpush.msrb.mxu3 %v691_v9 }
  0x67   : > { %787 = vmatpush.msrb.mxu0 %v668_v48  ;;  %730 = vmatpush.msrb.mxu1 %v665_v50  ;;  %v867_v50 = vld [vmem:[#allocation12 + $0x428] sm:$0xff] }
  0x69   : > { %788 = vmatpush.msrb.mxu0 %v666_v51  ;;  %731 = vmatpush.msrb.mxu1 %v663_v54  ;;  %v896_v51 = vld [vmem:[#allocation12 + $0x510] sm:$0xff] }
  0x6b   : > { %789 = vmatpush.msrb.mxu0 %v664_v55  ;;  %732 = vmatpush.msrb.mxu1 %v661_v58  ;;  %v864_v55 = vld [vmem:[#allocation12 + $0x410] sm:$0xff] }
  0x6d   : > { %790 = vmatpush.msrb.mxu0 %v662_v59  ;;  %733 = vmatpush.msrb.mxu1 %v659_v60 }
  0x6f   : > { %791 = vmatpush.msrb.mxu0 %v660_v61  ;;  %734 = vmatpush.msrb.mxu1 %v657_v62 }
  0x91   : > { %v424_v2 = vpop.permute.xlu2 %423 }
  0x99   : > { %v436_v21 = vpop.permute.xlu2 %435 }
  0xa1   : > { %v438_v40 = vpop.permute.xlu2 %437 }
  0xa8   : > { %v434_v0 = vpop.permute.xlu1 %433  ;;  %v410_v1 = vpop.permute.xlu0 %409 }
  0xa9   : > { %v3878_v11 = vsel %vm445_vm1, %v3844_v4, %v410_v1  ;;  %v440_v56 = vpop.permute.xlu2 %439  ;;  %v696_v1 = vld [vmem:[#allocation12 + $0x318] sm:$0xff] }
  0xaa   : > { %818 = vmatpush.msrb.mxu2 %v696_v1 }
  0xac   : > { %819 = vmatpush.msrb.mxu2 %v694_v7 }
  0xb0   : > { %v412_v12 = vpop.permute.xlu1 %411  ;;  %v422_v13 = vpop.permute.xlu0 %421 }
  0xb1   : > { %v451_v16 = vsel %vm450_vm2, %v3878_v11, %v422_v13  ;;  %v3891_v24 = vsel %vm445_vm1, %v3850_v5, %v412_v12  ;;  %v692_v12 = vld [vmem:[#allocation12 + $0x2f8] sm:$0xff]  ;;  %v689_v13 = vld [vmem:[#allocation12 + $0x2e0] sm:$0xff] }
  0xb2   : > { %3141 = vmatmul.msk.f32.vlgmr.msra.gmra.mxu1 %vm455_vm3, %v451_v16  ;;  %3145 = vmatmul.msk.f32.vlgmr.msra.gmra.mxu3 %vm455_vm3, %v451_v16  ;;  %v3885_v4 = vsel %vm455_vm3, %v451_v16, %v434_v0  ;;  %v452_v32 = vsel %vm450_vm2, %v3891_v24, %v424_v2  ;;  %v658_v0 = vld [vmem:[#allocation12 + $0x1e8] sm:$0xff]  ;;  %v655_v2 = vld [vmem:[#allocation12 + $0x1d0] sm:$0xff]  ;;  %v688_v16 = vld [vmem:[#allocation12 + $0x2d8] sm:$0xff] }
  0xb3   : > { %544 = vmatmul.f32.vlgmr.msra.gmra.mxu0 %v3885_v4  ;;  %602 = vmatmul.f32.vlgmr.msra.gmra.mxu2 %v3885_v4  ;;  %v3898_v36 = vsel %vm455_vm3, %v452_v32, %v436_v21 }
  0xb4   : > { %792 = vmatpush.msrb.mxu0 %v658_v0  ;;  %735 = vmatpush.msrb.mxu1 %v655_v2 }
  0xb5   : > { %820 = vmatpush.msrb.mxu2 %v692_v12  ;;  %763 = vmatpush.msrb.mxu3 %v689_v13 }
  0xb6   : > { %793 = vmatpush.msrb.mxu0 %v656_v6  ;;  %736 = vmatpush.msrb.mxu1 %v653_v8 }
  0xb7   : > { %821 = vmatpush.msrb.mxu2 %v690_v14  ;;  %764 = vmatpush.msrb.mxu3 %v687_v15  ;;  %v862_v15 = vld [vmem:[#allocation12 + $0x400] sm:$0xff] }
  0xb8   : > { %v414_v33 = vpop.permute.xlu0 %413  ;;  %v426_v5 = vpop.permute.xlu1 %425  ;;  %794 = vmatpush.msrb.mxu0 %v654_v10  ;;  %914 = vmatpush.msra.mxu1 %v876_v23  ;;  %v858_v23 = vld [vmem:[#allocation12 + $0x3e0] sm:$0xff] }
  0xb9   : > { %v3902_v37 = vsel %vm445_vm1, %v3860_v30, %v414_v33  ;;  %822 = vmatpush.msrb.mxu2 %v688_v16  ;;  %765 = vmatpush.msrb.mxu3 %v685_v17  ;;  %v900_v33 = vld [vmem:[#allocation12 + $0x530] sm:$0xff]  ;;  %v894_v16 = vld [vmem:[#allocation12 + $0x500] sm:$0xff]  ;;  %v863_v17 = vld [vmem:[#allocation12 + $0x408] sm:$0xff] }
  0xba   : > { %3142 = vmatmul.msk.f32.gmra.mxu1 %vm455_vm3, %v452_v32  ;;  %3146 = vmatmul.msk.f32.gmra.mxu3 %vm455_vm3, %v452_v32  ;;  %v453_v46 = vsel %vm450_vm2, %v3902_v37, %v426_v5  ;;  %v901_v5 = vld [vmem:[#allocation12 + $0x538] sm:$0xff] }
  0xbb   : > { %547 = vmatmul.f32.gmra.mxu0 %v3898_v36  ;;  %605 = vmatmul.f32.gmra.mxu2 %v3898_v36  ;;  %v3909_v30 = vsel %vm455_vm3, %v453_v46, %v438_v40  ;;  %v898_v40 = vld [vmem:[#allocation12 + $0x520] sm:$0xff] }
  0xbc   : > { %823 = vmatpush.msrb.mxu2 %v686_v18  ;;  %972 = vmatpush.msra.mxu0 %v877_v25  ;;  %v895_v18 = vld [vmem:[#allocation12 + $0x508] sm:$0xff]  ;;  %v890_v25 = vld [vmem:[#allocation12 + $0x4e0] sm:$0xff] }
  0xbd   : > { %915 = vmatpush.msra.mxu1 %v874_v26  ;;  %947 = vmatpush.msra.mxu3 %v900_v33  ;;  %v859_v26 = vld [vmem:[#allocation12 + $0x3e8] sm:$0xff]  ;;  %v854_v33 = vld [vmem:[#allocation12 + $0x3c0] sm:$0xff] }
  0xbe   : > { %973 = vmatpush.msra.mxu0 %v875_v27  ;;  %1005 = vmatpush.msra.mxu2 %v901_v5  ;;  %v891_v27 = vld [vmem:[#allocation12 + $0x4e8] sm:$0xff]  ;;  %v886_v5 = vld [vmem:[#allocation12 + $0x4c0] sm:$0xff] }
  0xbf   : > { %916 = vmatpush.msra.mxu1 %v872_v29  ;;  %948 = vmatpush.msra.mxu3 %v898_v40  ;;  %v888_v29 = vld [vmem:[#allocation12 + $0x4d0] sm:$0xff]  ;;  %v853_v40 = vld [vmem:[#allocation12 + $0x3b8] sm:$0xff] }
  0xc0   : > { %v416_v49 = vpop.permute.xlu0 %415  ;;  %v428_v53 = vpop.permute.xlu1 %427  ;;  %974 = vmatpush.msra.mxu0 %v873_v31  ;;  %1006 = vmatpush.msra.mxu2 %v899_v43  ;;  %v857_v31 = vld [vmem:[#allocation12 + $0x3d8] sm:$0xff]  ;;  %v850_v43 = vld [vmem:[#allocation12 + $0x3a0] sm:$0xff] }
  0xc1   : > { %v3915_v52 = vsel %vm445_vm1, %v3868_v42, %v416_v49  ;;  %917 = vmatpush.msra.mxu1 %v870_v38  ;;  %v866_v49 = vld [vmem:[#allocation12 + $0x420] sm:$0xff]  ;;  %949 = vmatpush.msra.mxu3 %v896_v51  ;;  %v852_v38 = vld [vmem:[#allocation12 + $0x3b0] sm:$0xff] }
  0xc2   : > { %3143 = vmatmul.msk.f32.gmra.mxu1 %vm455_vm3, %v453_v46  ;;  %3147 = vmatmul.msk.f32.gmra.mxu3 %vm455_vm3, %v453_v46  ;;  %v454_v57 = vsel %vm450_vm2, %v3915_v52, %v428_v53  ;;  %v868_v46 = vld [vmem:[#allocation12 + $0x430] sm:$0xff]  ;;  %v897_v53 = vld [vmem:[#allocation12 + $0x518] sm:$0xff]  ;;  %v846_v51 = vld [vmem:[#allocation12 + $0x380] sm:$0xff] }
  0xc3   : > { %550 = vmatmul.f32.gmra.mxu0 %v3909_v30  ;;  %608 = vmatmul.f32.gmra.mxu2 %v3909_v30  ;;  %v3922_v42 = vsel %vm455_vm3, %v454_v57, %v440_v56  ;;  %v865_v56 = vld [vmem:[#allocation12 + $0x418] sm:$0xff] }
  0xc4   : > { %975 = vmatpush.msra.mxu0 %v871_v39  ;;  %918 = vmatpush.msra.mxu1 %v868_v46  ;;  %v884_v39 = vld [vmem:[#allocation12 + $0x4b0] sm:$0xff]  ;;  %v883_v46 = vld [vmem:[#allocation12 + $0x4a8] sm:$0xff] }
  0xc5   : > { %1007 = vmatpush.msra.mxu2 %v897_v53  ;;  %950 = vmatpush.msra.mxu3 %v894_v16  ;;  %v878_v53 = vld [vmem:[#allocation12 + $0x480] sm:$0xff]  ;;  %v1064_v16 = vld [vmem:[#allocation12 + $0x608] sm:$0xff] }
  0xc6   : > { %976 = vmatpush.msra.mxu0 %v869_v47  ;;  %919 = vmatpush.msra.mxu1 %v866_v49  ;;  %v848_v47 = vld [vmem:[#allocation12 + $0x390] sm:$0xff]  ;;  %v849_v49 = vld [vmem:[#allocation12 + $0x398] sm:$0xff] }
  0xc7   : > { %1008 = vmatpush.msra.mxu2 %v895_v18  ;;  %v1090_v18 = vld [vmem:[#allocation12 + $0x6d8] sm:$0xff] }
  0xc8   : > { %977 = vmatpush.msra.mxu0 %v867_v50  ;;  %920 = vmatpush.msra.mxu1 %v864_v55  ;;  %v881_v50 = vld [vmem:[#allocation12 + $0x498] sm:$0xff]  ;;  %v879_v55 = vld [vmem:[#allocation12 + $0x488] sm:$0xff] }
  0xca   : > { %3144 = vmatmul.msk.f32.gmra.mxu1 %vm455_vm3, %v454_v57  ;;  %3148 = vmatmul.msk.f32.gmra.mxu3 %vm455_vm3, %v454_v57 }
  0xcb   : > { %553 = vmatmul.f32.gmra.mxu0 %v3922_v42  ;;  %611 = vmatmul.f32.gmra.mxu2 %v3922_v42 }
  0xcc   : > { %978 = vmatpush.msra.mxu0 %v865_v56  ;;  %921 = vmatpush.msra.mxu1 %v862_v15  ;;  %v1063_v15 = vld [vmem:[#allocation12 + $0x600] sm:$0xff] }
  0xce   : > { %979 = vmatpush.msra.mxu0 %v863_v17  ;;  %v1089_v17 = vld [vmem:[#allocation12 + $0x6d0] sm:$0xff] }
 0x12f   : > { %v574_v19 = vpop.f32.mrf.mxu1 }
 0x130   : > { %v545_v20 = vpop.f32.mrf.mxu0 }
 0x131   : > { %v575_v21 = vadd.f32 %v574_v19, %v545_v20  ;;  %v860_v19 = vld [vmem:[#allocation12 + $0x3f0] sm:$0xff] }
 0x132   : > { %v892_v20 = vld [vmem:[#allocation12 + $0x4f0] sm:$0xff]  ;;  %922 = vmatpush.msra.mxu1 %v860_v19 }
 0x133   : > { %v644_v22 = vmax.f32 %v575_v21, 0.0  ;;  %v861_v21 = vld [vmem:[#allocation12 + $0x3f8] sm:$0xff]  ;;  %951 = vmatpush.msra.mxu3 %v892_v20  ;;  %v1061_v19 = vld [vmem:[#allocation12 + $0x5f0] sm:$0xff] }
 0x134   : > { %980 = vmatpush.msra.mxu0 %v861_v21  ;;  %923 = vmatpush.msra.mxu1 %v858_v23  ;;  %v1062_v20 = vld [vmem:[#allocation12 + $0x5f8] sm:$0xff]  ;;  %v1087_v21 = vld [vmem:[#allocation12 + $0x6c0] sm:$0xff] }
 0x135   : > { %v632_v28 = vpop.f32.mrf.mxu3  ;;  %737 = vmatmul.f32.vlgmr.msrb.gmra.mxu1 %v644_v22  ;;  %795 = vmatmul.f32.vlgmr.msrb.gmra.mxu0 %v644_v22  ;;  %v893_v22 = vld [vmem:[#allocation12 + $0x4f8] sm:$0xff] }
 0x136   : > { %v603_v32 = vpop.f32.mrf.mxu2  ;;  %1009 = vmatpush.msra.mxu2 %v893_v22  ;;  %952 = vmatpush.msra.mxu3 %v890_v25  ;;  %v1088_v22 = vld [vmem:[#allocation12 + $0x6c8] sm:$0xff] }
 0x137   : > { %v633_v34 = vadd.f32 %v632_v28, %v603_v32  ;;  %v577_v35 = vpop.f32.mrf.mxu1  ;;  %v856_v28 = vld [vmem:[#allocation12 + $0x3d0] sm:$0xff]  ;;  %v889_v32 = vld [vmem:[#allocation12 + $0x4d8] sm:$0xff]  ;;  %981 = vmatpush.msra.mxu0 %v859_v26  ;;  %v1059_v26 = vld [vmem:[#allocation12 + $0x5e0] sm:$0xff] }
 0x138   : > { %v548_v41 = vpop.f32.mrf.mxu0  ;;  %1010 = vmatpush.msra.mxu2 %v891_v27  ;;  %924 = vmatpush.msra.mxu1 %v856_v28  ;;  %v1060_v27 = vld [vmem:[#allocation12 + $0x5e8] sm:$0xff] }
 0x139   : > { %v645_v44 = vmax.f32 %v633_v34, 0.0  ;;  %v578_v45 = vadd.f32 %v577_v35, %v548_v41  ;;  %953 = vmatpush.msra.mxu3 %v888_v29  ;;  %982 = vmatpush.msra.mxu0 %v857_v31  ;;  %v855_v34 = vld [vmem:[#allocation12 + $0x3c8] sm:$0xff]  ;;  %v885_v41 = vld [vmem:[#allocation12 + $0x4b8] sm:$0xff]  ;;  %v1085_v31 = vld [vmem:[#allocation12 + $0x6b0] sm:$0xff] }
 0x13a   : > { %1011 = vmatpush.msra.mxu2 %v889_v32  ;;  %925 = vmatpush.msra.mxu1 %v854_v33  ;;  %v887_v35 = vld [vmem:[#allocation12 + $0x4c8] sm:$0xff]  ;;  %v1086_v32 = vld [vmem:[#allocation12 + $0x6b8] sm:$0xff] }
 0x13b   : > { %3149 = vmatmul.msk.f32.vlgmr.msrb.gmra.mxu3 %vm455_vm3, %v645_v44  ;;  %3153 = vmatmul.msk.f32.vlgmr.msrb.gmra.mxu2 %vm455_vm3, %v645_v44  ;;  %v646_v48 = vmax.f32 %v578_v45, 0.0  ;;  %v882_v44 = vld [vmem:[#allocation12 + $0x4a0] sm:$0xff]  ;;  %v851_v45 = vld [vmem:[#allocation12 + $0x3a8] sm:$0xff] }
 0x13c   : > { %954 = vmatpush.msra.mxu3 %v886_v5  ;;  %983 = vmatpush.msra.mxu0 %v855_v34  ;;  %v1057_v34 = vld [vmem:[#allocation12 + $0x5d0] sm:$0xff] }
 0x13d   : > { %v635_v54 = vpop.f32.mrf.mxu3  ;;  %740 = vmatmul.f32.gmra.mxu1 %v646_v48  ;;  %798 = vmatmul.f32.gmra.mxu0 %v646_v48  ;;  %v880_v48 = vld [vmem:[#allocation12 + $0x490] sm:$0xff] }
 0x13e   : > { %v606_v57 = vpop.f32.mrf.mxu2  ;;  %1012 = vmatpush.msra.mxu2 %v887_v35  ;;  %926 = vmatpush.msra.mxu1 %v852_v38  ;;  %v1058_v35 = vld [vmem:[#allocation12 + $0x5d8] sm:$0xff] }
 0x13f   : > { %v636_v58 = vadd.f32 %v635_v54, %v606_v57  ;;  %v580_v59 = vpop.f32.mrf.mxu1  ;;  %955 = vmatpush.msra.mxu3 %v884_v39  ;;  %984 = vmatpush.msra.mxu0 %v853_v40  ;;  %v847_v54 = vld [vmem:[#allocation12 + $0x388] sm:$0xff]  ;;  %v1083_v40 = vld [vmem:[#allocation12 + $0x6a0] sm:$0xff] }
 0x140   : > { %v551_v60 = vpop.f32.mrf.mxu0  ;;  %1013 = vmatpush.msra.mxu2 %v885_v41  ;;  %927 = vmatpush.msra.mxu1 %v850_v43  ;;  %v1084_v41 = vld [vmem:[#allocation12 + $0x6a8] sm:$0xff]  ;;  %v1055_v43 = vld [vmem:[#allocation12 + $0x5c0] sm:$0xff] }
 0x141   : > { %v647_v61 = vmax.f32 %v636_v58, 0.0  ;;  %v581_v62 = vadd.f32 %v580_v59, %v551_v60  ;;  %956 = vmatpush.msra.mxu3 %v882_v44  ;;  %985 = vmatpush.msra.mxu0 %v851_v45  ;;  %v1069_v58 = vld [vmem:[#allocation12 + $0x630] sm:$0xff]  ;;  %v1070_v59 = vld [vmem:[#allocation12 + $0x638] sm:$0xff]  ;;  %v1067_v60 = vld [vmem:[#allocation12 + $0x620] sm:$0xff] }
 0x142   : > { %1014 = vmatpush.msra.mxu2 %v883_v46  ;;  %928 = vmatpush.msra.mxu1 %v848_v47  ;;  %v1056_v44 = vld [vmem:[#allocation12 + $0x5c8] sm:$0xff]  ;;  %v1053_v47 = vld [vmem:[#allocation12 + $0x5b0] sm:$0xff] }
 0x143   : > { %3150 = vmatmul.msk.f32.gmra.mxu3 %vm455_vm3, %v647_v61  ;;  %3154 = vmatmul.msk.f32.gmra.mxu2 %vm455_vm3, %v647_v61  ;;  %v648_v63 = vmax.f32 %v581_v62, 0.0  ;;  %v1068_v61 = vld [vmem:[#allocation12 + $0x628] sm:$0xff] }
 0x144   : > { %957 = vmatpush.msra.mxu3 %v880_v48  ;;  %986 = vmatpush.msra.mxu0 %v849_v49  ;;  %v1054_v48 = vld [vmem:[#allocation12 + $0x5b8] sm:$0xff] }
 0x145   : > { %v638_v0 = vpop.f32.mrf.mxu3  ;;  %743 = vmatmul.f32.gmra.mxu1 %v648_v63  ;;  %801 = vmatmul.f32.gmra.mxu0 %v648_v63 }
 0x146   : > { %v609_v1 = vpop.f32.mrf.mxu2  ;;  %1015 = vmatpush.msra.mxu2 %v881_v50  ;;  %929 = vmatpush.msra.mxu1 %v846_v51 }
 0x147   : > { %v639_v2 = vadd.f32 %v638_v0, %v609_v1  ;;  %v583_v3 = vpop.f32.mrf.mxu1  ;;  %958 = vmatpush.msra.mxu3 %v878_v53  ;;  %987 = vmatpush.msra.mxu0 %v847_v54  ;;  %v1065_v0 = vld [vmem:[#allocation12 + $0x610] sm:$0xff]  ;;  %v1066_v1 = vld [vmem:[#allocation12 + $0x618] sm:$0xff]  ;;  %v1051_v54 = vld [vmem:[#allocation12 + $0x5a0] sm:$0xff] }
 0x148   : > { %v554_v6 = vpop.f32.mrf.mxu0  ;;  %1016 = vmatpush.msra.mxu2 %v879_v55  ;;  %1107 = vmatpush.msrb.mxu1 %v1069_v58  ;;  %v1052_v55 = vld [vmem:[#allocation12 + $0x5a8] sm:$0xff] }
 0x149   : > { %v649_v7 = vmax.f32 %v639_v2, 0.0  ;;  %v584_v8 = vadd.f32 %v583_v3, %v554_v6  ;;  %1165 = vmatpush.msrb.mxu0 %v1070_v59  ;;  %v1093_v6 = vld [vmem:[#allocation12 + $0x6f0] sm:$0xff] }
 0x14a   : > { %1108 = vmatpush.msrb.mxu1 %v1067_v60  ;;  %1140 = vmatpush.msrb.mxu3 %v1093_v6  ;;  %v1047_v6 = vld [vmem:[#allocation12 + $0x580] sm:$0xff] }
 0x14b   : > { %3151 = vmatmul.msk.f32.gmra.mxu3 %vm455_vm3, %v649_v7  ;;  %3155 = vmatmul.msk.f32.gmra.mxu2 %vm455_vm3, %v649_v7  ;;  %v650_v9 = vmax.f32 %v584_v8, 0.0  ;;  %v1094_v7 = vld [vmem:[#allocation12 + $0x6f8] sm:$0xff]  ;;  %v1091_v8 = vld [vmem:[#allocation12 + $0x6e0] sm:$0xff] }
 0x14c   : > { %1166 = vmatpush.msrb.mxu0 %v1068_v61  ;;  %1198 = vmatpush.msrb.mxu2 %v1094_v7  ;;  %v1079_v7 = vld [vmem:[#allocation12 + $0x680] sm:$0xff] }
 0x14d   : > { %v641_v10 = vpop.f32.mrf.mxu3  ;;  %746 = vmatmul.f32.gmra.mxu1 %v650_v9  ;;  %804 = vmatmul.f32.gmra.mxu0 %v650_v9 }
 0x14e   : > { %v612_v12 = vpop.f32.mrf.mxu2  ;;  %1109 = vmatpush.msrb.mxu1 %v1065_v0  ;;  %1167 = vmatpush.msrb.mxu0 %v1066_v1  ;;  %v1049_v0 = vld [vmem:[#allocation12 + $0x590] sm:$0xff] }
 0x14f   : > { %v642_v13 = vadd.f32 %v641_v10, %v612_v12  ;;  %1141 = vmatpush.msrb.mxu3 %v1091_v8  ;;  %v1081_v1 = vld [vmem:[#allocation12 + $0x690] sm:$0xff]  ;;  %v1048_v8 = vld [vmem:[#allocation12 + $0x588] sm:$0xff] }
 0x150   : > { %1110 = vmatpush.msrb.mxu1 %v1063_v15  ;;  %1168 = vmatpush.msrb.mxu0 %v1064_v16  ;;  %v1043_v15 = vld [vmem:[#allocation12 + $0x560] sm:$0xff] }
 0x151   : > { %v651_v14 = vmax.f32 %v642_v13, 0.0  ;;  %1142 = vmatpush.msrb.mxu3 %v1089_v17  ;;  %v1075_v16 = vld [vmem:[#allocation12 + $0x660] sm:$0xff]  ;;  %v1044_v17 = vld [vmem:[#allocation12 + $0x568] sm:$0xff] }
 0x152   : > { %1111 = vmatpush.msrb.mxu1 %v1061_v19  ;;  %1169 = vmatpush.msrb.mxu0 %v1062_v20  ;;  %v1041_v19 = vld [vmem:[#allocation12 + $0x550] sm:$0xff] }
 0x153   : > { %3152 = vmatmul.msk.f32.gmra.mxu3 %vm455_vm3, %v651_v14  ;;  %3156 = vmatmul.msk.f32.gmra.mxu2 %vm455_vm3, %v651_v14  ;;  %v1092_v14 = vld [vmem:[#allocation12 + $0x6e8] sm:$0xff]  ;;  %v1073_v20 = vld [vmem:[#allocation12 + $0x650] sm:$0xff] }
 0x154   : > { %1199 = vmatpush.msrb.mxu2 %v1092_v14  ;;  %1143 = vmatpush.msrb.mxu3 %v1087_v21  ;;  %v1078_v14 = vld [vmem:[#allocation12 + $0x678] sm:$0xff] }
 0x155   : > { %1112 = vmatpush.msrb.mxu1 %v1059_v26  ;;  %1170 = vmatpush.msrb.mxu0 %v1060_v27  ;;  %v1042_v21 = vld [vmem:[#allocation12 + $0x558] sm:$0xff]  ;;  %v1040_v26 = vld [vmem:[#allocation12 + $0x548] sm:$0xff] }
 0x156   : > { %1200 = vmatpush.msrb.mxu2 %v1090_v18  ;;  %1144 = vmatpush.msrb.mxu3 %v1085_v31  ;;  %v1076_v18 = vld [vmem:[#allocation12 + $0x668] sm:$0xff]  ;;  %v1262_v31 = vld [vmem:[#allocation12 + $0x7f0] sm:$0xff] }
 0x157   : > { %1113 = vmatpush.msrb.mxu1 %v1057_v34  ;;  %1171 = vmatpush.msrb.mxu0 %v1058_v35  ;;  %v1072_v27 = vld [vmem:[#allocation12 + $0x648] sm:$0xff]  ;;  %v1258_v35 = vld [vmem:[#allocation12 + $0x7d0] sm:$0xff] }
 0x158   : > { %1201 = vmatpush.msrb.mxu2 %v1088_v22  ;;  %1145 = vmatpush.msrb.mxu3 %v1083_v40  ;;  %v1074_v22 = vld [vmem:[#allocation12 + $0x658] sm:$0xff] }
 0x159   : > { %1114 = vmatpush.msrb.mxu1 %v1055_v43  ;;  %1172 = vmatpush.msrb.mxu0 %v1056_v44  ;;  %v1287_v43 = vld [vmem:[#allocation12 + $0x8b8] sm:$0xff] }
 0x15a   : > { %1202 = vmatpush.msrb.mxu2 %v1086_v32  ;;  %1146 = vmatpush.msrb.mxu3 %v1081_v1  ;;  %v1263_v32 = vld [vmem:[#allocation12 + $0x7f8] sm:$0xff]  ;;  %v1278_v1 = vld [vmem:[#allocation12 + $0x870] sm:$0xff] }
 0x15b   : > { %1115 = vmatpush.msrb.mxu1 %v1053_v47  ;;  %1173 = vmatpush.msrb.mxu0 %v1054_v48  ;;  %v1285_v47 = vld [vmem:[#allocation12 + $0x8a8] sm:$0xff] }
 0x15c   : > { %1203 = vmatpush.msrb.mxu2 %v1084_v41  ;;  %1147 = vmatpush.msrb.mxu3 %v1079_v7  ;;  %v1286_v41 = vld [vmem:[#allocation12 + $0x8b0] sm:$0xff] }
 0x15d   : > { %1116 = vmatpush.msrb.mxu1 %v1051_v54  ;;  %1174 = vmatpush.msrb.mxu0 %v1052_v55  ;;  %v1282_v54 = vld [vmem:[#allocation12 + $0x890] sm:$0xff]  ;;  %v1283_v55 = vld [vmem:[#allocation12 + $0x898] sm:$0xff] }
 0x15f   : > { %1117 = vmatpush.msrb.mxu1 %v1049_v0 }
 0x161   : > { %1118 = vmatpush.msrb.mxu1 %v1047_v6 }
 0x1b2   : > { %v738_v56 = vpop.f32.mrf.mxu1  ;;  %v796_v57 = vpop.f32.mrf.mxu0 }
 0x1ba   : > { %v741_v9 = vpop.f32.mrf.mxu1  ;;  %v799_v10 = vpop.f32.mrf.mxu0 }
 0x1be   : > { %v767_v62 = vpop.f32.mrf.mxu3  ;;  %v825_v63 = vpop.f32.mrf.mxu2 }
 0x1bf   : > { %v768_v2 = vadd.f32 %v767_v62, %v738_v56  ;;  %v826_v3 = vadd.f32 %v825_v63, %v796_v57 }
 0x1c1   : > { %v837_v12 = vmax.f32 %v768_v2, 0.0  ;;  %v838_v13 = vmax.f32 %v826_v3, 0.0  ;;  %v1050_v2 = vld [vmem:[#allocation12 + $0x598] sm:$0xff] }
 0x1c2   : > { %v744_v38 = vpop.f32.mrf.mxu1  ;;  %v802_v39 = vpop.f32.mrf.mxu0  ;;  %v1082_v3 = vld [vmem:[#allocation12 + $0x698] sm:$0xff]  ;;  %1175 = vmatpush.msrb.mxu0 %v1050_v2 }
 0x1c3   : > { %930 = vmatmul.f32.vlgmr.msra.gmra.mxu1 %v837_v12  ;;  %3157 = vmatmul.msk.f32.vlgmr.msra.gmra.mxu3 %vm455_vm3, %v838_v13  ;;  %v1279_v2 = vld [vmem:[#allocation12 + $0x878] sm:$0xff] }
 0x1c4   : > { %988 = vmatmul.f32.vlgmr.msra.gmra.mxu0 %v837_v12  ;;  %3161 = vmatmul.msk.f32.vlgmr.msra.gmra.mxu2 %vm455_vm3, %v838_v13  ;;  %v1077_v12 = vld [vmem:[#allocation12 + $0x670] sm:$0xff]  ;;  %v1046_v13 = vld [vmem:[#allocation12 + $0x578] sm:$0xff] }
 0x1c5   : > { %1204 = vmatpush.msrb.mxu2 %v1082_v3  ;;  %1176 = vmatpush.msrb.mxu0 %v1048_v8  ;;  %v1250_v8 = vld [vmem:[#allocation12 + $0x790] sm:$0xff] }
 0x1c6   : > { %v770_v23 = vpop.f32.mrf.mxu3  ;;  %v828_v25 = vpop.f32.mrf.mxu2  ;;  %1148 = vmatpush.msrb.mxu3 %v1077_v12  ;;  %v1277_v12 = vld [vmem:[#allocation12 + $0x868] sm:$0xff] }
 0x1c7   : > { %v771_v28 = vadd.f32 %v770_v23, %v741_v9  ;;  %v829_v29 = vadd.f32 %v828_v25, %v799_v10  ;;  %v1080_v9 = vld [vmem:[#allocation12 + $0x688] sm:$0xff]  ;;  %v1045_v10 = vld [vmem:[#allocation12 + $0x570] sm:$0xff]  ;;  %1177 = vmatpush.msrb.mxu0 %v1046_v13  ;;  %v1039_v23 = vld [vmem:[#allocation12 + $0x540] sm:$0xff] }
 0x1c8   : > { %1205 = vmatpush.msrb.mxu2 %v1080_v9  ;;  %1119 = vmatpush.msrb.mxu1 %v1045_v10  ;;  %v1071_v25 = vld [vmem:[#allocation12 + $0x640] sm:$0xff]  ;;  %v1251_v9 = vld [vmem:[#allocation12 + $0x798] sm:$0xff] }
 0x1c9   : > { %v840_v33 = vmax.f32 %v829_v29, 0.0  ;;  %v839_v5 = vmax.f32 %v771_v28, 0.0  ;;  %1149 = vmatpush.msrb.mxu3 %v1075_v16  ;;  %1178 = vmatpush.msrb.mxu0 %v1044_v17  ;;  %v1276_v10 = vld [vmem:[#allocation12 + $0x860] sm:$0xff] }
 0x1ca   : > { %v747_v56 = vpop.f32.mrf.mxu1  ;;  %v805_v57 = vpop.f32.mrf.mxu0  ;;  %1206 = vmatpush.msrb.mxu2 %v1078_v14  ;;  %1120 = vmatpush.msrb.mxu1 %v1043_v15  ;;  %v1248_v14 = vld [vmem:[#allocation12 + $0x780] sm:$0xff]  ;;  %v1249_v15 = vld [vmem:[#allocation12 + $0x788] sm:$0xff] }
 0x1cb   : > { %933 = vmatmul.f32.gmra.mxu1 %v839_v5  ;;  %3158 = vmatmul.msk.f32.gmra.mxu3 %vm455_vm3, %v840_v33 }
 0x1cc   : > { %991 = vmatmul.f32.gmra.mxu0 %v839_v5  ;;  %3162 = vmatmul.msk.f32.gmra.mxu2 %vm455_vm3, %v840_v33  ;;  %v1260_v33 = vld [vmem:[#allocation12 + $0x7e0] sm:$0xff]  ;;  %v1261_v5 = vld [vmem:[#allocation12 + $0x7e8] sm:$0xff] }
 0x1cd   : > { %1207 = vmatpush.msrb.mxu2 %v1076_v18  ;;  %1121 = vmatpush.msrb.mxu1 %v1041_v19  ;;  %v1246_v18 = vld [vmem:[#allocation12 + $0x770] sm:$0xff]  ;;  %v1247_v19 = vld [vmem:[#allocation12 + $0x778] sm:$0xff] }
 0x1ce   : > { %v773_v45 = vpop.f32.mrf.mxu3  ;;  %v831_v46 = vpop.f32.mrf.mxu2  ;;  %1150 = vmatpush.msrb.mxu3 %v1073_v20  ;;  %1179 = vmatpush.msrb.mxu0 %v1042_v21 }
 0x1cf   : > { %v774_v49 = vadd.f32 %v773_v45, %v744_v38  ;;  %v832_v50 = vadd.f32 %v831_v46, %v802_v39  ;;  %1208 = vmatpush.msrb.mxu2 %v1074_v22  ;;  %1122 = vmatpush.msrb.mxu1 %v1039_v23  ;;  %v1259_v38 = vld [vmem:[#allocation12 + $0x7d8] sm:$0xff]  ;;  %v1284_v45 = vld [vmem:[#allocation12 + $0x8a0] sm:$0xff] }
 0x1d0   : > { %1151 = vmatpush.msrb.mxu3 %v1071_v25  ;;  %1180 = vmatpush.msrb.mxu0 %v1040_v26  ;;  %v1244_v26 = vld [vmem:[#allocation12 + $0x760] sm:$0xff] }
 0x1d1   : > { %v842_v51 = vmax.f32 %v832_v50, 0.0  ;;  %v841_v53 = vmax.f32 %v774_v49, 0.0  ;;  %1209 = vmatpush.msrb.mxu2 %v1072_v27  ;;  %1300 = vmatpush.msra.mxu1 %v1262_v31  ;;  %v1256_v50 = vld [vmem:[#allocation12 + $0x7c0] sm:$0xff]  ;;  %v1245_v27 = vld [vmem:[#allocation12 + $0x768] sm:$0xff] }
 0x1d2   : > { %1358 = vmatpush.msra.mxu0 %v1263_v32  ;;  %1333 = vmatpush.msra.mxu3 %v1286_v41  ;;  %v1275_v41 = vld [vmem:[#allocation12 + $0x858] sm:$0xff] }
 0x1d3   : > { %936 = vmatmul.f32.gmra.mxu1 %v841_v53  ;;  %3159 = vmatmul.msk.f32.gmra.mxu3 %vm455_vm3, %v842_v51 }
 0x1d4   : > { %994 = vmatmul.f32.gmra.mxu0 %v841_v53  ;;  %3163 = vmatmul.msk.f32.gmra.mxu2 %vm455_vm3, %v842_v51  ;;  %v1257_v51 = vld [vmem:[#allocation12 + $0x7c8] sm:$0xff] }
 0x1d5   : > { %1301 = vmatpush.msra.mxu1 %v1260_v33  ;;  %1359 = vmatpush.msra.mxu0 %v1261_v5 }
 0x1d6   : > { %v776_v58 = vpop.f32.mrf.mxu3  ;;  %v834_v59 = vpop.f32.mrf.mxu2  ;;  %1391 = vmatpush.msra.mxu2 %v1287_v43  ;;  %1334 = vmatpush.msra.mxu3 %v1284_v45  ;;  %v1240_v43 = vld [vmem:[#allocation12 + $0x740] sm:$0xff]  ;;  %v1241_v45 = vld [vmem:[#allocation12 + $0x748] sm:$0xff] }
 0x1d7   : > { %v777_v60 = vadd.f32 %v776_v58, %v747_v56  ;;  %v835_v61 = vadd.f32 %v834_v59, %v805_v57  ;;  %1302 = vmatpush.msra.mxu1 %v1258_v35  ;;  %1360 = vmatpush.msra.mxu0 %v1259_v38  ;;  %v1254_v56 = vld [vmem:[#allocation12 + $0x7b0] sm:$0xff]  ;;  %v1255_v57 = vld [vmem:[#allocation12 + $0x7b8] sm:$0xff]  ;;  %v1280_v58 = vld [vmem:[#allocation12 + $0x880] sm:$0xff] }
 0x1d8   : > { %1392 = vmatpush.msra.mxu2 %v1285_v47  ;;  %v1281_v59 = vld [vmem:[#allocation12 + $0x888] sm:$0xff]  ;;  %1335 = vmatpush.msra.mxu3 %v1282_v54  ;;  %v1242_v38 = vld [vmem:[#allocation12 + $0x750] sm:$0xff] }
 0x1d9   : > { %v844_v62 = vmax.f32 %v835_v61, 0.0  ;;  %v843_v63 = vmax.f32 %v777_v60, 0.0  ;;  %1303 = vmatpush.msra.mxu1 %v1256_v50  ;;  %1361 = vmatpush.msra.mxu0 %v1257_v51  ;;  %v1252_v61 = vld [vmem:[#allocation12 + $0x7a0] sm:$0xff]  ;;  %v1238_v47 = vld [vmem:[#allocation12 + $0x730] sm:$0xff]  ;;  %v1271_v50 = vld [vmem:[#allocation12 + $0x838] sm:$0xff] }
 0x1da   : > { %1393 = vmatpush.msra.mxu2 %v1283_v55  ;;  %1336 = vmatpush.msra.mxu3 %v1280_v58  ;;  %v1236_v51 = vld [vmem:[#allocation12 + $0x720] sm:$0xff]  ;;  %v1237_v54 = vld [vmem:[#allocation12 + $0x728] sm:$0xff]  ;;  %v1235_v58 = vld [vmem:[#allocation12 + $0x718] sm:$0xff] }
 0x1db   : > { %939 = vmatmul.f32.gmra.mxu1 %v843_v63  ;;  %3160 = vmatmul.msk.f32.gmra.mxu3 %vm455_vm3, %v844_v62  ;;  %v1269_v55 = vld [vmem:[#allocation12 + $0x828] sm:$0xff] }
 0x1dc   : > { %997 = vmatmul.f32.gmra.mxu0 %v843_v63  ;;  %3164 = vmatmul.msk.f32.gmra.mxu2 %vm455_vm3, %v844_v62  ;;  %v1253_v62 = vld [vmem:[#allocation12 + $0x7a8] sm:$0xff] }
 0x1dd   : > { %1304 = vmatpush.msra.mxu1 %v1254_v56  ;;  %1362 = vmatpush.msra.mxu0 %v1255_v57  ;;  %v1234_v56 = vld [vmem:[#allocation12 + $0x710] sm:$0xff] }
 0x1de   : > { %1394 = vmatpush.msra.mxu2 %v1281_v59  ;;  %1337 = vmatpush.msra.mxu3 %v1278_v1  ;;  %v1266_v57 = vld [vmem:[#allocation12 + $0x810] sm:$0xff]  ;;  %v1267_v59 = vld [vmem:[#allocation12 + $0x818] sm:$0xff] }
 0x1df   : > { %1305 = vmatpush.msra.mxu1 %v1252_v61  ;;  %1363 = vmatpush.msra.mxu0 %v1253_v62  ;;  %v1264_v61 = vld [vmem:[#allocation12 + $0x800] sm:$0xff]  ;;  %v1233_v62 = vld [vmem:[#allocation12 + $0x708] sm:$0xff] }
 0x1e0   : > { %1395 = vmatpush.msra.mxu2 %v1279_v2  ;;  %1338 = vmatpush.msra.mxu3 %v1276_v10  ;;  %v1455_v2 = vld [vmem:[#allocation12 + $0x9b0] sm:$0xff] }
 0x1e1   : > { %1306 = vmatpush.msra.mxu1 %v1250_v8  ;;  %1364 = vmatpush.msra.mxu0 %v1251_v9  ;;  %v1451_v10 = vld [vmem:[#allocation12 + $0x990] sm:$0xff] }
 0x1e2   : > { %1396 = vmatpush.msra.mxu2 %v1277_v12  ;;  %v1452_v12 = vld [vmem:[#allocation12 + $0x998] sm:$0xff] }
 0x1e3   : > { %1307 = vmatpush.msra.mxu1 %v1248_v14  ;;  %1365 = vmatpush.msra.mxu0 %v1249_v15  ;;  %v1479_v15 = vld [vmem:[#allocation12 + $0xa70] sm:$0xff] }
 0x1e4   : > { %1397 = vmatpush.msra.mxu2 %v1275_v41  ;;  %v1472_v41 = vld [vmem:[#allocation12 + $0xa38] sm:$0xff] }
 0x1e5   : > { %1308 = vmatpush.msra.mxu1 %v1246_v18  ;;  %1366 = vmatpush.msra.mxu0 %v1247_v19 }
 0x1e7   : > { %1309 = vmatpush.msra.mxu1 %v1244_v26  ;;  %1367 = vmatpush.msra.mxu0 %v1245_v27  ;;  %v1475_v26 = vld [vmem:[#allocation12 + $0xa50] sm:$0xff]  ;;  %v1476_v27 = vld [vmem:[#allocation12 + $0xa58] sm:$0xff] }
 0x1e9   : > { %1310 = vmatpush.msra.mxu1 %v1242_v38 }
 0x1eb   : > { %1311 = vmatpush.msra.mxu1 %v1240_v43 }
 0x1ed   : > { %1312 = vmatpush.msra.mxu1 %v1238_v47 }
 0x1ef   : > { %1313 = vmatpush.msra.mxu1 %v1236_v51  ;;  %v1441_v51 = vld [vmem:[#allocation12 + $0x940] sm:$0xff] }
 0x1f1   : > { %1314 = vmatpush.msra.mxu1 %v1234_v56  ;;  %v1439_v56 = vld [vmem:[#allocation12 + $0x930] sm:$0xff] }
 0x240   : > { %v931_v28 = vpop.f32.mrf.mxu1 }
 0x241   : > { %v989_v29 = vpop.f32.mrf.mxu0 }
 0x246   : > { %v960_v34 = vpop.f32.mrf.mxu3 }
 0x247   : > { %v961_v39 = vadd.f32 %v960_v34, %v931_v28  ;;  %v1018_v40 = vpop.f32.mrf.mxu2 }
 0x248   : > { %v1019_v44 = vadd.f32 %v1018_v40, %v989_v29  ;;  %v934_v49 = vpop.f32.mrf.mxu1  ;;  %v1243_v40 = vld [vmem:[#allocation12 + $0x758] sm:$0xff] }
 0x249   : > { %v1030_v46 = vmax.f32 %v961_v39, 0.0  ;;  %v992_v53 = vpop.f32.mrf.mxu0  ;;  %v1274_v39 = vld [vmem:[#allocation12 + $0x850] sm:$0xff]  ;;  %1368 = vmatpush.msra.mxu0 %v1243_v40 }
 0x24a   : > { %v1031_v48 = vmax.f32 %v1019_v44, 0.0  ;;  %1339 = vmatpush.msra.mxu3 %v1274_v39  ;;  %v1272_v44 = vld [vmem:[#allocation12 + $0x840] sm:$0xff]  ;;  %v1471_v40 = vld [vmem:[#allocation12 + $0xa30] sm:$0xff] }
 0x24b   : > { %1123 = vmatmul.f32.vlgmr.msrb.gmra.mxu1 %v1030_v46  ;;  %1181 = vmatmul.f32.vlgmr.msrb.gmra.mxu0 %v1030_v46  ;;  %v1273_v46 = vld [vmem:[#allocation12 + $0x848] sm:$0xff] }
 0x24c   : > { %3165 = vmatmul.msk.f32.vlgmr.msrb.gmra.mxu3 %vm455_vm3, %v1031_v48  ;;  %3169 = vmatmul.msk.f32.vlgmr.msrb.gmra.mxu2 %vm455_vm3, %v1031_v48  ;;  %v1270_v48 = vld [vmem:[#allocation12 + $0x830] sm:$0xff] }
 0x24d   : > { %1340 = vmatpush.msra.mxu3 %v1272_v44  ;;  %1369 = vmatpush.msra.mxu0 %v1241_v45  ;;  %v1443_v45 = vld [vmem:[#allocation12 + $0x950] sm:$0xff] }
 0x24e   : > { %v963_v60 = vpop.f32.mrf.mxu3  ;;  %1398 = vmatpush.msra.mxu2 %v1273_v46  ;;  %v1444_v46 = vld [vmem:[#allocation12 + $0x958] sm:$0xff] }
 0x24f   : > { %v964_v63 = vadd.f32 %v963_v60, %v934_v49  ;;  %v1021_v0 = vpop.f32.mrf.mxu2  ;;  %v1239_v49 = vld [vmem:[#allocation12 + $0x738] sm:$0xff]  ;;  %1341 = vmatpush.msra.mxu3 %v1270_v48  ;;  %v1232_v60 = vld [vmem:[#allocation12 + $0x700] sm:$0xff] }
 0x250   : > { %v1022_v3 = vadd.f32 %v1021_v0, %v992_v53  ;;  %v937_v13 = vpop.f32.mrf.mxu1  ;;  %1370 = vmatpush.msra.mxu0 %v1239_v49  ;;  %1399 = vmatpush.msra.mxu2 %v1271_v50  ;;  %v1268_v53 = vld [vmem:[#allocation12 + $0x820] sm:$0xff]  ;;  %v1470_v50 = vld [vmem:[#allocation12 + $0xa28] sm:$0xff] }
 0x251   : > { %v1032_v6 = vmax.f32 %v964_v63, 0.0  ;;  %v995_v16 = vpop.f32.mrf.mxu0  ;;  %1342 = vmatpush.msra.mxu3 %v1268_v53  ;;  %1315 = vmatpush.msra.mxu1 %v1232_v60  ;;  %v1265_v63 = vld [vmem:[#allocation12 + $0x808] sm:$0xff]  ;;  %v1469_v49 = vld [vmem:[#allocation12 + $0xa20] sm:$0xff] }
 0x252   : > { %v1033_v7 = vmax.f32 %v1022_v3, 0.0  ;;  %1371 = vmatpush.msra.mxu0 %v1237_v54  ;;  %1400 = vmatpush.msra.mxu2 %v1269_v55  ;;  %v1456_v3 = vld [vmem:[#allocation12 + $0x9b8] sm:$0xff]  ;;  %v1442_v53 = vld [vmem:[#allocation12 + $0x948] sm:$0xff] }
 0x253   : > { %1126 = vmatmul.f32.gmra.mxu1 %v1032_v6  ;;  %1184 = vmatmul.f32.gmra.mxu0 %v1032_v6  ;;  %v1453_v6 = vld [vmem:[#allocation12 + $0x9a0] sm:$0xff] }
 0x254   : > { %3166 = vmatmul.msk.f32.gmra.mxu3 %vm455_vm3, %v1033_v7  ;;  %3170 = vmatmul.msk.f32.gmra.mxu2 %vm455_vm3, %v1033_v7  ;;  %v1454_v7 = vld [vmem:[#allocation12 + $0x9a8] sm:$0xff] }
 0x255   : > { %1343 = vmatpush.msra.mxu3 %v1266_v57  ;;  %1372 = vmatpush.msra.mxu0 %v1235_v58  ;;  %v1440_v57 = vld [vmem:[#allocation12 + $0x938] sm:$0xff] }
 0x256   : > { %v966_v17 = vpop.f32.mrf.mxu3  ;;  %1401 = vmatpush.msra.mxu2 %v1267_v59  ;;  %1493 = vmatpush.msrb.mxu1 %v1455_v2 }
 0x257   : > { %v967_v20 = vadd.f32 %v966_v17, %v937_v13  ;;  %v1024_v21 = vpop.f32.mrf.mxu2  ;;  %1344 = vmatpush.msra.mxu3 %v1264_v61  ;;  %1373 = vmatpush.msra.mxu0 %v1233_v62  ;;  %v1477_v17 = vld [vmem:[#allocation12 + $0xa60] sm:$0xff] }
 0x258   : > { %v1025_v22 = vadd.f32 %v1024_v21, %v995_v16  ;;  %v940_v28 = vpop.f32.mrf.mxu1  ;;  %1402 = vmatpush.msra.mxu2 %v1265_v63  ;;  %1494 = vmatpush.msrb.mxu1 %v1453_v6  ;;  %v1480_v16 = vld [vmem:[#allocation12 + $0xa78] sm:$0xff]  ;;  %v1437_v62 = vld [vmem:[#allocation12 + $0x920] sm:$0xff]  ;;  %v1438_v63 = vld [vmem:[#allocation12 + $0x928] sm:$0xff] }
 0x259   : > { %v1034_v23 = vmax.f32 %v967_v20, 0.0  ;;  %v998_v31 = vpop.f32.mrf.mxu0  ;;  %1551 = vmatpush.msrb.mxu0 %v1456_v3  ;;  %1526 = vmatpush.msrb.mxu3 %v1479_v15  ;;  %v1433_v15 = vld [vmem:[#allocation12 + $0x900] sm:$0xff] }
 0x25a   : > { %v1035_v25 = vmax.f32 %v1025_v22, 0.0  ;;  %1584 = vmatpush.msrb.mxu2 %v1480_v16  ;;  %1495 = vmatpush.msrb.mxu1 %v1451_v10  ;;  %v1478_v22 = vld [vmem:[#allocation12 + $0xa68] sm:$0xff]  ;;  %v1435_v10 = vld [vmem:[#allocation12 + $0x910] sm:$0xff]  ;;  %v1465_v16 = vld [vmem:[#allocation12 + $0xa00] sm:$0xff] }
 0x25b   : > { %1129 = vmatmul.f32.gmra.mxu1 %v1034_v23  ;;  %1187 = vmatmul.f32.gmra.mxu0 %v1034_v23  ;;  %v1449_v23 = vld [vmem:[#allocation12 + $0x980] sm:$0xff] }
 0x25c   : > { %3167 = vmatmul.msk.f32.gmra.mxu3 %vm455_vm3, %v1035_v25  ;;  %3171 = vmatmul.msk.f32.gmra.mxu2 %vm455_vm3, %v1035_v25  ;;  %v1450_v25 = vld [vmem:[#allocation12 + $0x988] sm:$0xff] }
 0x25d   : > { %1552 = vmatpush.msrb.mxu0 %v1454_v7  ;;  %1527 = vmatpush.msrb.mxu3 %v1477_v17  ;;  %v1434_v17 = vld [vmem:[#allocation12 + $0x908] sm:$0xff] }
 0x25e   : > { %v969_v29 = vpop.f32.mrf.mxu3  ;;  %1585 = vmatpush.msrb.mxu2 %v1478_v22  ;;  %1496 = vmatpush.msrb.mxu1 %v1449_v23  ;;  %v1464_v22 = vld [vmem:[#allocation12 + $0x9f8] sm:$0xff]  ;;  %v1429_v23 = vld [vmem:[#allocation12 + $0x8e0] sm:$0xff] }
 0x25f   : > { %v970_v32 = vadd.f32 %v969_v29, %v940_v28  ;;  %v1027_v33 = vpop.f32.mrf.mxu2  ;;  %1553 = vmatpush.msrb.mxu0 %v1452_v12  ;;  %v1447_v28 = vld [vmem:[#allocation12 + $0x970] sm:$0xff]  ;;  %v1448_v29 = vld [vmem:[#allocation12 + $0x978] sm:$0xff]  ;;  %1528 = vmatpush.msrb.mxu3 %v1475_v26  ;;  %v1430_v26 = vld [vmem:[#allocation12 + $0x8e8] sm:$0xff] }
 0x260   : > { %v1028_v5 = vadd.f32 %v1027_v33, %v998_v31  ;;  %v1473_v31 = vld [vmem:[#allocation12 + $0xa40] sm:$0xff]  ;;  %1586 = vmatpush.msrb.mxu2 %v1476_v27  ;;  %1497 = vmatpush.msrb.mxu1 %v1447_v28  ;;  %v1467_v12 = vld [vmem:[#allocation12 + $0xa10] sm:$0xff]  ;;  %v1462_v27 = vld [vmem:[#allocation12 + $0x9e8] sm:$0xff] }
 0x261   : > { %v1036_v34 = vmax.f32 %v970_v32, 0.0  ;;  %1554 = vmatpush.msrb.mxu0 %v1450_v25  ;;  %v1474_v32 = vld [vmem:[#allocation12 + $0xa48] sm:$0xff]  ;;  %1529 = vmatpush.msrb.mxu3 %v1473_v31  ;;  %v1461_v25 = vld [vmem:[#allocation12 + $0x9e0] sm:$0xff]  ;;  %v1427_v28 = vld [vmem:[#allocation12 + $0x8d0] sm:$0xff] }
 0x262   : > { %v1037_v35 = vmax.f32 %v1028_v5, 0.0  ;;  %1587 = vmatpush.msrb.mxu2 %v1474_v32  ;;  %v1428_v31 = vld [vmem:[#allocation12 + $0x8d8] sm:$0xff] }
 0x263   : > { %1132 = vmatmul.f32.gmra.mxu1 %v1036_v34  ;;  %1190 = vmatmul.f32.gmra.mxu0 %v1036_v34  ;;  %v1445_v34 = vld [vmem:[#allocation12 + $0x960] sm:$0xff]  ;;  %v1460_v32 = vld [vmem:[#allocation12 + $0x9d8] sm:$0xff] }
 0x264   : > { %3168 = vmatmul.msk.f32.gmra.mxu3 %vm455_vm3, %v1037_v35  ;;  %3172 = vmatmul.msk.f32.gmra.mxu2 %vm455_vm3, %v1037_v35  ;;  %v1446_v35 = vld [vmem:[#allocation12 + $0x968] sm:$0xff] }
 0x265   : > { %1555 = vmatpush.msrb.mxu0 %v1448_v29  ;;  %1498 = vmatpush.msrb.mxu1 %v1445_v34  ;;  %v1459_v29 = vld [vmem:[#allocation12 + $0x9d0] sm:$0xff]  ;;  %v1426_v34 = vld [vmem:[#allocation12 + $0x8c8] sm:$0xff] }
 0x266   : > { %1530 = vmatpush.msrb.mxu3 %v1471_v40  ;;  %1588 = vmatpush.msrb.mxu2 %v1472_v41  ;;  %v1648_v40 = vld [vmem:[#allocation12 + $0xb70] sm:$0xff]  ;;  %v1649_v41 = vld [vmem:[#allocation12 + $0xb78] sm:$0xff] }
 0x267   : > { %1556 = vmatpush.msrb.mxu0 %v1446_v35  ;;  %1499 = vmatpush.msrb.mxu1 %v1443_v45  ;;  %v1458_v35 = vld [vmem:[#allocation12 + $0x9c8] sm:$0xff] }
 0x268   : > { %1531 = vmatpush.msrb.mxu3 %v1469_v49  ;;  %1589 = vmatpush.msrb.mxu2 %v1470_v50  ;;  %v1672_v50 = vld [vmem:[#allocation12 + $0xc30] sm:$0xff] }
 0x269   : > { %1557 = vmatpush.msrb.mxu0 %v1444_v46  ;;  %1500 = vmatpush.msrb.mxu1 %v1441_v51  ;;  %v1644_v46 = vld [vmem:[#allocation12 + $0xb50] sm:$0xff]  ;;  %v1673_v51 = vld [vmem:[#allocation12 + $0xc38] sm:$0xff] }
 0x26a   : > { %1532 = vmatpush.msrb.mxu3 %v1467_v12  ;;  %v1664_v12 = vld [vmem:[#allocation12 + $0xbf0] sm:$0xff] }
 0x26b   : > { %1558 = vmatpush.msrb.mxu0 %v1442_v53  ;;  %1501 = vmatpush.msrb.mxu1 %v1439_v56  ;;  %v1671_v56 = vld [vmem:[#allocation12 + $0xc28] sm:$0xff] }
 0x26c   : > { %1533 = vmatpush.msrb.mxu3 %v1465_v16 }
 0x26d   : > { %1559 = vmatpush.msrb.mxu0 %v1440_v57  ;;  %1502 = vmatpush.msrb.mxu1 %v1437_v62  ;;  %v1668_v62 = vld [vmem:[#allocation12 + $0xc10] sm:$0xff] }
 0x26f   : > { %1560 = vmatpush.msrb.mxu0 %v1438_v63  ;;  %1503 = vmatpush.msrb.mxu1 %v1435_v10  ;;  %v1669_v63 = vld [vmem:[#allocation12 + $0xc18] sm:$0xff] }
 0x271   : > { %1504 = vmatpush.msrb.mxu1 %v1433_v15 }
 0x2c8   : > { %v1124_v0 = vpop.f32.mrf.mxu1  ;;  %v1182_v1 = vpop.f32.mrf.mxu0 }
 0x2cf   : > { %v1153_v8 = vpop.f32.mrf.mxu3  ;;  %v1211_v9 = vpop.f32.mrf.mxu2 }
 0x2d0   : > { %v1154_v13 = vadd.f32 %v1153_v8, %v1124_v0  ;;  %v1212_v14 = vadd.f32 %v1211_v9, %v1182_v1  ;;  %v1127_v20 = vpop.f32.mrf.mxu1  ;;  %v1185_v21 = vpop.f32.mrf.mxu0 }
 0x2d2   : > { %v1223_v18 = vmax.f32 %v1154_v13, 0.0  ;;  %v1224_v19 = vmax.f32 %v1212_v14, 0.0  ;;  %v1436_v13 = vld [vmem:[#allocation12 + $0x918] sm:$0xff] }
 0x2d3   : > { %v1468_v14 = vld [vmem:[#allocation12 + $0xa18] sm:$0xff]  ;;  %1561 = vmatpush.msrb.mxu0 %v1436_v13 }
 0x2d4   : > { %1316 = vmatmul.f32.vlgmr.msra.gmra.mxu1 %v1223_v18  ;;  %3173 = vmatmul.msk.f32.vlgmr.msra.gmra.mxu3 %vm455_vm3, %v1224_v19  ;;  %v1665_v13 = vld [vmem:[#allocation12 + $0xbf8] sm:$0xff] }
 0x2d5   : > { %1374 = vmatmul.f32.vlgmr.msra.gmra.mxu0 %v1223_v18  ;;  %3177 = vmatmul.msk.f32.vlgmr.msra.gmra.mxu2 %vm455_vm3, %v1224_v19  ;;  %v1466_v18 = vld [vmem:[#allocation12 + $0xa08] sm:$0xff]  ;;  %v1431_v19 = vld [vmem:[#allocation12 + $0x8f0] sm:$0xff] }
 0x2d6   : > { %1590 = vmatpush.msrb.mxu2 %v1468_v14  ;;  %1562 = vmatpush.msrb.mxu0 %v1434_v17  ;;  %v1636_v17 = vld [vmem:[#allocation12 + $0xb10] sm:$0xff] }
 0x2d7   : > { %v1156_v33 = vpop.f32.mrf.mxu3  ;;  %v1214_v5 = vpop.f32.mrf.mxu2  ;;  %1505 = vmatpush.msrb.mxu1 %v1431_v19  ;;  %v1662_v19 = vld [vmem:[#allocation12 + $0xbe0] sm:$0xff] }
 0x2d8   : > { %v1157_v38 = vadd.f32 %v1156_v33, %v1127_v20  ;;  %v1215_v39 = vadd.f32 %v1214_v5, %v1185_v21  ;;  %v1130_v47 = vpop.f32.mrf.mxu1  ;;  %v1188_v48 = vpop.f32.mrf.mxu0  ;;  %v1463_v20 = vld [vmem:[#allocation12 + $0x9f0] sm:$0xff]  ;;  %v1432_v21 = vld [vmem:[#allocation12 + $0x8f8] sm:$0xff]  ;;  %1591 = vmatpush.msrb.mxu2 %v1466_v18  ;;  %v1425_v33 = vld [vmem:[#allocation12 + $0x8c0] sm:$0xff] }
 0x2d9   : > { %1534 = vmatpush.msrb.mxu3 %v1463_v20  ;;  %1563 = vmatpush.msrb.mxu0 %v1432_v21  ;;  %v1457_v5 = vld [vmem:[#allocation12 + $0x9c0] sm:$0xff]  ;;  %v1637_v18 = vld [vmem:[#allocation12 + $0xb18] sm:$0xff]  ;;  %v1663_v20 = vld [vmem:[#allocation12 + $0xbe8] sm:$0xff] }
 0x2da   : > { %v1226_v43 = vmax.f32 %v1215_v39, 0.0  ;;  %v1225_v44 = vmax.f32 %v1157_v38, 0.0  ;;  %1592 = vmatpush.msrb.mxu2 %v1464_v22  ;;  %1506 = vmatpush.msrb.mxu1 %v1429_v23  ;;  %v1634_v22 = vld [vmem:[#allocation12 + $0xb00] sm:$0xff]  ;;  %v1635_v23 = vld [vmem:[#allocation12 + $0xb08] sm:$0xff] }
 0x2db   : > { %1535 = vmatpush.msrb.mxu3 %v1461_v25  ;;  %1564 = vmatpush.msrb.mxu0 %v1430_v26 }
 0x2dc   : > { %1319 = vmatmul.f32.gmra.mxu1 %v1225_v44  ;;  %3174 = vmatmul.msk.f32.gmra.mxu3 %vm455_vm3, %v1226_v43 }
 0x2dd   : > { %1377 = vmatmul.f32.gmra.mxu0 %v1225_v44  ;;  %3178 = vmatmul.msk.f32.gmra.mxu2 %vm455_vm3, %v1226_v43  ;;  %v1646_v43 = vld [vmem:[#allocation12 + $0xb60] sm:$0xff]  ;;  %v1647_v44 = vld [vmem:[#allocation12 + $0xb68] sm:$0xff] }
 0x2de   : > { %1593 = vmatpush.msrb.mxu2 %v1462_v27  ;;  %1507 = vmatpush.msrb.mxu1 %v1427_v28  ;;  %v1632_v27 = vld [vmem:[#allocation12 + $0xaf0] sm:$0xff]  ;;  %v1633_v28 = vld [vmem:[#allocation12 + $0xaf8] sm:$0xff] }
 0x2df   : > { %v1159_v54 = vpop.f32.mrf.mxu3  ;;  %v1217_v55 = vpop.f32.mrf.mxu2  ;;  %1536 = vmatpush.msrb.mxu3 %v1459_v29  ;;  %1565 = vmatpush.msrb.mxu0 %v1428_v31 }
 0x2e0   : > { %v1160_v58 = vadd.f32 %v1159_v54, %v1130_v47  ;;  %v1218_v59 = vadd.f32 %v1217_v55, %v1188_v48  ;;  %v1133_v0 = vpop.f32.mrf.mxu1  ;;  %v1191_v1 = vpop.f32.mrf.mxu0  ;;  %1594 = vmatpush.msrb.mxu2 %v1460_v32  ;;  %1508 = vmatpush.msrb.mxu1 %v1425_v33  ;;  %v1645_v47 = vld [vmem:[#allocation12 + $0xb58] sm:$0xff]  ;;  %v1670_v54 = vld [vmem:[#allocation12 + $0xc20] sm:$0xff] }
 0x2e1   : > { %1537 = vmatpush.msrb.mxu3 %v1457_v5  ;;  %1566 = vmatpush.msrb.mxu0 %v1426_v34  ;;  %v1630_v34 = vld [vmem:[#allocation12 + $0xae0] sm:$0xff] }
 0x2e2   : > { %v1228_v60 = vmax.f32 %v1218_v59, 0.0  ;;  %v1227_v61 = vmax.f32 %v1160_v58, 0.0  ;;  %1595 = vmatpush.msrb.mxu2 %v1458_v35  ;;  %1686 = vmatpush.msra.mxu1 %v1648_v40  ;;  %v1642_v59 = vld [vmem:[#allocation12 + $0xb40] sm:$0xff]  ;;  %v1631_v35 = vld [vmem:[#allocation12 + $0xae8] sm:$0xff] }
 0x2e3   : > { %1744 = vmatpush.msra.mxu0 %v1649_v41  ;;  %1719 = vmatpush.msra.mxu3 %v1672_v50  ;;  %v1661_v50 = vld [vmem:[#allocation12 + $0xbd8] sm:$0xff] }
 0x2e4   : > { %1322 = vmatmul.f32.gmra.mxu1 %v1227_v61  ;;  %3175 = vmatmul.msk.f32.gmra.mxu3 %vm455_vm3, %v1228_v60 }
 0x2e5   : > { %1380 = vmatmul.f32.gmra.mxu0 %v1227_v61  ;;  %3179 = vmatmul.msk.f32.gmra.mxu2 %vm455_vm3, %v1228_v60  ;;  %v1643_v60 = vld [vmem:[#allocation12 + $0xb48] sm:$0xff] }
 0x2e6   : > { %1687 = vmatpush.msra.mxu1 %v1646_v43  ;;  %1745 = vmatpush.msra.mxu0 %v1647_v44 }
 0x2e7   : > { %v1162_v2 = vpop.f32.mrf.mxu3  ;;  %v1220_v3 = vpop.f32.mrf.mxu2  ;;  %1777 = vmatpush.msra.mxu2 %v1673_v51  ;;  %1720 = vmatpush.msra.mxu3 %v1670_v54  ;;  %v1626_v51 = vld [vmem:[#allocation12 + $0xac0] sm:$0xff]  ;;  %v1627_v54 = vld [vmem:[#allocation12 + $0xac8] sm:$0xff] }
 0x2e8   : > { %v1163_v6 = vadd.f32 %v1162_v2, %v1133_v0  ;;  %v1221_v7 = vadd.f32 %v1220_v3, %v1191_v1  ;;  %1688 = vmatpush.msra.mxu1 %v1644_v46  ;;  %1746 = vmatpush.msra.mxu0 %v1645_v47  ;;  %v1640_v0 = vld [vmem:[#allocation12 + $0xb30] sm:$0xff]  ;;  %v1641_v1 = vld [vmem:[#allocation12 + $0xb38] sm:$0xff]  ;;  %v1666_v2 = vld [vmem:[#allocation12 + $0xc00] sm:$0xff] }
 0x2e9   : > { %1778 = vmatpush.msra.mxu2 %v1671_v56  ;;  %v1667_v3 = vld [vmem:[#allocation12 + $0xc08] sm:$0xff]  ;;  %1721 = vmatpush.msra.mxu3 %v1668_v62  ;;  %v1628_v47 = vld [vmem:[#allocation12 + $0xad0] sm:$0xff] }
 0x2ea   : > { %v1230_v8 = vmax.f32 %v1221_v7, 0.0  ;;  %v1229_v9 = vmax.f32 %v1163_v6, 0.0  ;;  %1689 = vmatpush.msra.mxu1 %v1642_v59  ;;  %1747 = vmatpush.msra.mxu0 %v1643_v60  ;;  %v1638_v7 = vld [vmem:[#allocation12 + $0xb20] sm:$0xff]  ;;  %v1624_v56 = vld [vmem:[#allocation12 + $0xab0] sm:$0xff]  ;;  %v1657_v59 = vld [vmem:[#allocation12 + $0xbb8] sm:$0xff] }
 0x2eb   : > { %1779 = vmatpush.msra.mxu2 %v1669_v63  ;;  %1722 = vmatpush.msra.mxu3 %v1666_v2  ;;  %v1622_v60 = vld [vmem:[#allocation12 + $0xaa0] sm:$0xff]  ;;  %v1623_v62 = vld [vmem:[#allocation12 + $0xaa8] sm:$0xff]  ;;  %v1621_v2 = vld [vmem:[#allocation12 + $0xa98] sm:$0xff] }
 0x2ec   : > { %1325 = vmatmul.f32.gmra.mxu1 %v1229_v9  ;;  %3176 = vmatmul.msk.f32.gmra.mxu3 %vm455_vm3, %v1230_v8  ;;  %v1655_v63 = vld [vmem:[#allocation12 + $0xba8] sm:$0xff] }
 0x2ed   : > { %1383 = vmatmul.f32.gmra.mxu0 %v1229_v9  ;;  %3180 = vmatmul.msk.f32.gmra.mxu2 %vm455_vm3, %v1230_v8  ;;  %v1639_v8 = vld [vmem:[#allocation12 + $0xb28] sm:$0xff] }
 0x2ee   : > { %1690 = vmatpush.msra.mxu1 %v1640_v0  ;;  %1748 = vmatpush.msra.mxu0 %v1641_v1  ;;  %v1620_v0 = vld [vmem:[#allocation12 + $0xa90] sm:$0xff] }
 0x2ef   : > { %1780 = vmatpush.msra.mxu2 %v1667_v3  ;;  %1723 = vmatpush.msra.mxu3 %v1664_v12  ;;  %v1652_v1 = vld [vmem:[#allocation12 + $0xb90] sm:$0xff]  ;;  %v1653_v3 = vld [vmem:[#allocation12 + $0xb98] sm:$0xff] }
 0x2f0   : > { %1691 = vmatpush.msra.mxu1 %v1638_v7  ;;  %1749 = vmatpush.msra.mxu0 %v1639_v8  ;;  %v1650_v7 = vld [vmem:[#allocation12 + $0xb80] sm:$0xff]  ;;  %v1619_v8 = vld [vmem:[#allocation12 + $0xa88] sm:$0xff] }
 0x2f1   : > { %1781 = vmatpush.msra.mxu2 %v1665_v13  ;;  %1724 = vmatpush.msra.mxu3 %v1662_v19  ;;  %v1841_v13 = vld [vmem:[#allocation12 + $0xd30] sm:$0xff] }
 0x2f2   : > { %1692 = vmatpush.msra.mxu1 %v1636_v17  ;;  %1750 = vmatpush.msra.mxu0 %v1637_v18  ;;  %v1837_v19 = vld [vmem:[#allocation12 + $0xd10] sm:$0xff] }
 0x2f3   : > { %1782 = vmatpush.msra.mxu2 %v1663_v20  ;;  %v1838_v20 = vld [vmem:[#allocation12 + $0xd18] sm:$0xff] }
 0x2f4   : > { %1693 = vmatpush.msra.mxu1 %v1634_v22  ;;  %1751 = vmatpush.msra.mxu0 %v1635_v23  ;;  %v1865_v23 = vld [vmem:[#allocation12 + $0xdf0] sm:$0xff] }
 0x2f5   : > { %1783 = vmatpush.msra.mxu2 %v1661_v50  ;;  %v1858_v50 = vld [vmem:[#allocation12 + $0xdb8] sm:$0xff] }
 0x2f6   : > { %1694 = vmatpush.msra.mxu1 %v1632_v27  ;;  %1752 = vmatpush.msra.mxu0 %v1633_v28 }
 0x2f8   : > { %1695 = vmatpush.msra.mxu1 %v1630_v34  ;;  %1753 = vmatpush.msra.mxu0 %v1631_v35  ;;  %v1861_v34 = vld [vmem:[#allocation12 + $0xdd0] sm:$0xff]  ;;  %v1862_v35 = vld [vmem:[#allocation12 + $0xdd8] sm:$0xff] }
 0x2fa   : > { %1696 = vmatpush.msra.mxu1 %v1628_v47 }
 0x2fc   : > { %1697 = vmatpush.msra.mxu1 %v1626_v51 }
 0x2fe   : > { %1698 = vmatpush.msra.mxu1 %v1624_v56 }
 0x300   : > { %1699 = vmatpush.msra.mxu1 %v1622_v60  ;;  %v1827_v60 = vld [vmem:[#allocation12 + $0xcc0] sm:$0xff] }
 0x302   : > { %1700 = vmatpush.msra.mxu1 %v1620_v0  ;;  %v1825_v0 = vld [vmem:[#allocation12 + $0xcb0] sm:$0xff] }
 0x351   : > { %v1317_v38 = vpop.f32.mrf.mxu1 }
 0x352   : > { %v1375_v39 = vpop.f32.mrf.mxu0 }
 0x357   : > { %v1346_v45 = vpop.f32.mrf.mxu3 }
 0x358   : > { %v1347_v48 = vadd.f32 %v1346_v45, %v1317_v38  ;;  %v1404_v49 = vpop.f32.mrf.mxu2 }
 0x359   : > { %v1405_v53 = vadd.f32 %v1404_v49, %v1375_v39  ;;  %v1320_v58 = vpop.f32.mrf.mxu1  ;;  %v1629_v49 = vld [vmem:[#allocation12 + $0xad8] sm:$0xff] }
 0x35a   : > { %v1416_v55 = vmax.f32 %v1347_v48, 0.0  ;;  %v1378_v61 = vpop.f32.mrf.mxu0  ;;  %v1660_v48 = vld [vmem:[#allocation12 + $0xbd0] sm:$0xff]  ;;  %1754 = vmatpush.msra.mxu0 %v1629_v49 }
 0x35b   : > { %v1417_v57 = vmax.f32 %v1405_v53, 0.0  ;;  %1725 = vmatpush.msra.mxu3 %v1660_v48  ;;  %v1658_v53 = vld [vmem:[#allocation12 + $0xbc0] sm:$0xff]  ;;  %v1857_v49 = vld [vmem:[#allocation12 + $0xdb0] sm:$0xff] }
 0x35c   : > { %1509 = vmatmul.f32.vlgmr.msrb.gmra.mxu1 %v1416_v55  ;;  %1567 = vmatmul.f32.vlgmr.msrb.gmra.mxu0 %v1416_v55  ;;  %v1659_v55 = vld [vmem:[#allocation12 + $0xbc8] sm:$0xff] }
 0x35d   : > { %3181 = vmatmul.msk.f32.vlgmr.msrb.gmra.mxu3 %vm455_vm3, %v1417_v57  ;;  %3185 = vmatmul.msk.f32.vlgmr.msrb.gmra.mxu2 %vm455_vm3, %v1417_v57  ;;  %v1656_v57 = vld [vmem:[#allocation12 + $0xbb0] sm:$0xff] }
 0x35e   : > { %1726 = vmatpush.msra.mxu3 %v1658_v53  ;;  %1755 = vmatpush.msra.mxu0 %v1627_v54  ;;  %v1829_v54 = vld [vmem:[#allocation12 + $0xcd0] sm:$0xff] }
 0x35f   : > { %v1349_v6 = vpop.f32.mrf.mxu3  ;;  %1784 = vmatpush.msra.mxu2 %v1659_v55  ;;  %v1830_v55 = vld [vmem:[#allocation12 + $0xcd8] sm:$0xff] }
 0x360   : > { %v1350_v9 = vadd.f32 %v1349_v6, %v1320_v58  ;;  %v1407_v10 = vpop.f32.mrf.mxu2  ;;  %v1625_v58 = vld [vmem:[#allocation12 + $0xab8] sm:$0xff]  ;;  %1727 = vmatpush.msra.mxu3 %v1656_v57  ;;  %v1618_v6 = vld [vmem:[#allocation12 + $0xa80] sm:$0xff] }
 0x361   : > { %v1408_v14 = vadd.f32 %v1407_v10, %v1378_v61  ;;  %v1323_v21 = vpop.f32.mrf.mxu1  ;;  %1756 = vmatpush.msra.mxu0 %v1625_v58  ;;  %1785 = vmatpush.msra.mxu2 %v1657_v59  ;;  %v1654_v61 = vld [vmem:[#allocation12 + $0xba0] sm:$0xff]  ;;  %v1856_v59 = vld [vmem:[#allocation12 + $0xda8] sm:$0xff] }
 0x362   : > { %v1418_v15 = vmax.f32 %v1350_v9, 0.0  ;;  %v1381_v25 = vpop.f32.mrf.mxu0  ;;  %1728 = vmatpush.msra.mxu3 %v1654_v61  ;;  %1701 = vmatpush.msra.mxu1 %v1618_v6  ;;  %v1651_v9 = vld [vmem:[#allocation12 + $0xb88] sm:$0xff]  ;;  %v1855_v58 = vld [vmem:[#allocation12 + $0xda0] sm:$0xff] }
 0x363   : > { %v1419_v16 = vmax.f32 %v1408_v14, 0.0  ;;  %1757 = vmatpush.msra.mxu0 %v1623_v62  ;;  %1786 = vmatpush.msra.mxu2 %v1655_v63  ;;  %v1842_v14 = vld [vmem:[#allocation12 + $0xd38] sm:$0xff]  ;;  %v1828_v61 = vld [vmem:[#allocation12 + $0xcc8] sm:$0xff] }
 0x364   : > { %1512 = vmatmul.f32.gmra.mxu1 %v1418_v15  ;;  %1570 = vmatmul.f32.gmra.mxu0 %v1418_v15  ;;  %v1839_v15 = vld [vmem:[#allocation12 + $0xd20] sm:$0xff] }
 0x365   : > { %3182 = vmatmul.msk.f32.gmra.mxu3 %vm455_vm3, %v1419_v16  ;;  %3186 = vmatmul.msk.f32.gmra.mxu2 %vm455_vm3, %v1419_v16  ;;  %v1840_v16 = vld [vmem:[#allocation12 + $0xd28] sm:$0xff] }
 0x366   : > { %1729 = vmatpush.msra.mxu3 %v1652_v1  ;;  %1758 = vmatpush.msra.mxu0 %v1621_v2  ;;  %v1826_v1 = vld [vmem:[#allocation12 + $0xcb8] sm:$0xff] }
 0x367   : > { %v1352_v26 = vpop.f32.mrf.mxu3  ;;  %1787 = vmatpush.msra.mxu2 %v1653_v3  ;;  %1879 = vmatpush.msrb.mxu1 %v1841_v13 }
 0x368   : > { %v1353_v29 = vadd.f32 %v1352_v26, %v1323_v21  ;;  %v1410_v31 = vpop.f32.mrf.mxu2  ;;  %1730 = vmatpush.msra.mxu3 %v1650_v7  ;;  %1759 = vmatpush.msra.mxu0 %v1619_v8  ;;  %v1863_v26 = vld [vmem:[#allocation12 + $0xde0] sm:$0xff] }
 0x369   : > { %v1411_v32 = vadd.f32 %v1410_v31, %v1381_v25  ;;  %v1326_v38 = vpop.f32.mrf.mxu1  ;;  %1788 = vmatpush.msra.mxu2 %v1651_v9  ;;  %1880 = vmatpush.msrb.mxu1 %v1839_v15  ;;  %v1866_v25 = vld [vmem:[#allocation12 + $0xdf8] sm:$0xff]  ;;  %v1823_v8 = vld [vmem:[#allocation12 + $0xca0] sm:$0xff]  ;;  %v1824_v9 = vld [vmem:[#allocation12 + $0xca8] sm:$0xff] }
 0x36a   : > { %v1420_v33 = vmax.f32 %v1353_v29, 0.0  ;;  %v1384_v40 = vpop.f32.mrf.mxu0  ;;  %1937 = vmatpush.msrb.mxu0 %v1842_v14  ;;  %1912 = vmatpush.msrb.mxu3 %v1865_v23  ;;  %v1819_v23 = vld [vmem:[#allocation12 + $0xc80] sm:$0xff] }
 0x36b   : > { %v1421_v5 = vmax.f32 %v1411_v32, 0.0  ;;  %1970 = vmatpush.msrb.mxu2 %v1866_v25  ;;  %1881 = vmatpush.msrb.mxu1 %v1837_v19  ;;  %v1864_v32 = vld [vmem:[#allocation12 + $0xde8] sm:$0xff]  ;;  %v1821_v19 = vld [vmem:[#allocation12 + $0xc90] sm:$0xff]  ;;  %v1851_v25 = vld [vmem:[#allocation12 + $0xd80] sm:$0xff] }
 0x36c   : > { %1515 = vmatmul.f32.gmra.mxu1 %v1420_v33  ;;  %1573 = vmatmul.f32.gmra.mxu0 %v1420_v33  ;;  %v1835_v33 = vld [vmem:[#allocation12 + $0xd00] sm:$0xff] }
 0x36d   : > { %3183 = vmatmul.msk.f32.gmra.mxu3 %vm455_vm3, %v1421_v5  ;;  %3187 = vmatmul.msk.f32.gmra.mxu2 %vm455_vm3, %v1421_v5  ;;  %v1836_v5 = vld [vmem:[#allocation12 + $0xd08] sm:$0xff] }
 0x36e   : > { %1938 = vmatpush.msrb.mxu0 %v1840_v16  ;;  %1913 = vmatpush.msrb.mxu3 %v1863_v26  ;;  %v1820_v26 = vld [vmem:[#allocation12 + $0xc88] sm:$0xff] }
 0x36f   : > { %v1355_v39 = vpop.f32.mrf.mxu3  ;;  %1971 = vmatpush.msrb.mxu2 %v1864_v32  ;;  %1882 = vmatpush.msrb.mxu1 %v1835_v33  ;;  %v1850_v32 = vld [vmem:[#allocation12 + $0xd78] sm:$0xff]  ;;  %v1815_v33 = vld [vmem:[#allocation12 + $0xc60] sm:$0xff] }
 0x370   : > { %v1356_v41 = vadd.f32 %v1355_v39, %v1326_v38  ;;  %v1413_v43 = vpop.f32.mrf.mxu2  ;;  %1939 = vmatpush.msrb.mxu0 %v1838_v20  ;;  %v1833_v38 = vld [vmem:[#allocation12 + $0xcf0] sm:$0xff]  ;;  %v1834_v39 = vld [vmem:[#allocation12 + $0xcf8] sm:$0xff]  ;;  %1914 = vmatpush.msrb.mxu3 %v1861_v34  ;;  %v1816_v34 = vld [vmem:[#allocation12 + $0xc68] sm:$0xff] }
 0x371   : > { %v1414_v44 = vadd.f32 %v1413_v43, %v1384_v40  ;;  %v1859_v40 = vld [vmem:[#allocation12 + $0xdc0] sm:$0xff]  ;;  %1972 = vmatpush.msrb.mxu2 %v1862_v35  ;;  %1883 = vmatpush.msrb.mxu1 %v1833_v38  ;;  %v1853_v20 = vld [vmem:[#allocation12 + $0xd90] sm:$0xff]  ;;  %v1848_v35 = vld [vmem:[#allocation12 + $0xd68] sm:$0xff] }
 0x372   : > { %v1422_v45 = vmax.f32 %v1356_v41, 0.0  ;;  %1940 = vmatpush.msrb.mxu0 %v1836_v5  ;;  %v1860_v41 = vld [vmem:[#allocation12 + $0xdc8] sm:$0xff]  ;;  %1915 = vmatpush.msrb.mxu3 %v1859_v40  ;;  %v1847_v5 = vld [vmem:[#allocation12 + $0xd60] sm:$0xff]  ;;  %v1813_v38 = vld [vmem:[#allocation12 + $0xc50] sm:$0xff] }
 0x373   : > { %v1423_v46 = vmax.f32 %v1414_v44, 0.0  ;;  %1973 = vmatpush.msrb.mxu2 %v1860_v41  ;;  %v1814_v40 = vld [vmem:[#allocation12 + $0xc58] sm:$0xff] }
 0x374   : > { %1518 = vmatmul.f32.gmra.mxu1 %v1422_v45  ;;  %1576 = vmatmul.f32.gmra.mxu0 %v1422_v45  ;;  %v1831_v45 = vld [vmem:[#allocation12 + $0xce0] sm:$0xff]  ;;  %v1846_v41 = vld [vmem:[#allocation12 + $0xd58] sm:$0xff] }
 0x375   : > { %3184 = vmatmul.msk.f32.gmra.mxu3 %vm455_vm3, %v1423_v46  ;;  %3188 = vmatmul.msk.f32.gmra.mxu2 %vm455_vm3, %v1423_v46  ;;  %v1832_v46 = vld [vmem:[#allocation12 + $0xce8] sm:$0xff] }
 0x376   : > { %1941 = vmatpush.msrb.mxu0 %v1834_v39  ;;  %1884 = vmatpush.msrb.mxu1 %v1831_v45  ;;  %v1845_v39 = vld [vmem:[#allocation12 + $0xd50] sm:$0xff]  ;;  %v1812_v45 = vld [vmem:[#allocation12 + $0xc48] sm:$0xff] }
 0x377   : > { %1916 = vmatpush.msrb.mxu3 %v1857_v49  ;;  %1974 = vmatpush.msrb.mxu2 %v1858_v50  ;;  %v2368_v49 = vld [vmem:[#allocation14 + $0xd0] sm:$0xff]  ;;  %v2366_v50 = vld [vmem:[#allocation14 + $0xc0] sm:$0xff] }
 0x378   : > { %1942 = vmatpush.msrb.mxu0 %v1832_v46  ;;  %1885 = vmatpush.msrb.mxu1 %v1829_v54  ;;  %v1844_v46 = vld [vmem:[#allocation12 + $0xd48] sm:$0xff]  ;;  %v2360_v54 = vld [vmem:[#allocation14 + $0x90] sm:$0xff] }
 0x379   : > { %1917 = vmatpush.msrb.mxu3 %v1855_v58  ;;  %1975 = vmatpush.msrb.mxu2 %v1856_v59  ;;  %v2352_v59 = vld [vmem:[#allocation14 + $0x50] sm:$0xff] }
 0x37a   : > { %1943 = vmatpush.msrb.mxu0 %v1830_v55  ;;  %1886 = vmatpush.msrb.mxu1 %v1827_v60  ;;  %v2358_v55 = vld [vmem:[#allocation14 + $0x80] sm:$0xff] }
 0x37b   : > { %1918 = vmatpush.msrb.mxu3 %v1853_v20 }
 0x37c   : > { %1944 = vmatpush.msrb.mxu0 %v1828_v61  ;;  %1887 = vmatpush.msrb.mxu1 %v1825_v0  ;;  %v2350_v61 = vld [vmem:[#allocation14 + $0x40] sm:$0xff] }
 0x37d   : > { %1919 = vmatpush.msrb.mxu3 %v1851_v25 }
 0x37e   : > { %1945 = vmatpush.msrb.mxu0 %v1826_v1  ;;  %1888 = vmatpush.msrb.mxu1 %v1823_v8  ;;  %v2344_v1 = vld [vmem:[#allocation14 + $0x10] sm:$0xff] }
 0x380   : > { %1946 = vmatpush.msrb.mxu0 %v1824_v9  ;;  %1889 = vmatpush.msrb.mxu1 %v1821_v19 }
 0x382   : > { %1890 = vmatpush.msrb.mxu1 %v1819_v23 }
 0x3d9   : > { %v1510_v10 = vpop.f32.mrf.mxu1  ;;  %v1568_v12 = vpop.f32.mrf.mxu0 }
 0x3e0   : > { %v1539_v17 = vpop.f32.mrf.mxu3  ;;  %v1597_v18 = vpop.f32.mrf.mxu2 }
 0x3e1   : > { %v1540_v21 = vadd.f32 %v1539_v17, %v1510_v10  ;;  %v1598_v22 = vadd.f32 %v1597_v18, %v1568_v12  ;;  %v1513_v29 = vpop.f32.mrf.mxu1  ;;  %v1571_v31 = vpop.f32.mrf.mxu0 }
 0x3e3   : > { %v1609_v27 = vmax.f32 %v1540_v21, 0.0  ;;  %v1610_v28 = vmax.f32 %v1598_v22, 0.0  ;;  %v1822_v21 = vld [vmem:[#allocation12 + $0xc98] sm:$0xff] }
 0x3e4   : > { %v1854_v22 = vld [vmem:[#allocation12 + $0xd98] sm:$0xff]  ;;  %1947 = vmatpush.msrb.mxu0 %v1822_v21 }
 0x3e5   : > { %1702 = vmatmul.f32.vlgmr.msra.gmra.mxu1 %v1609_v27  ;;  %3189 = vmatmul.msk.f32.vlgmr.msra.gmra.mxu3 %vm455_vm3, %v1610_v28 }
 0x3e6   : > { %1760 = vmatmul.f32.vlgmr.msra.gmra.mxu0 %v1609_v27  ;;  %3193 = vmatmul.msk.f32.vlgmr.msra.gmra.mxu2 %vm455_vm3, %v1610_v28  ;;  %v1852_v27 = vld [vmem:[#allocation12 + $0xd88] sm:$0xff]  ;;  %v1817_v28 = vld [vmem:[#allocation12 + $0xc70] sm:$0xff] }
 0x3e7   : > { %1976 = vmatpush.msrb.mxu2 %v1854_v22  ;;  %1948 = vmatpush.msrb.mxu0 %v1820_v26 }
 0x3e8   : > { %v1542_v43 = vpop.f32.mrf.mxu3  ;;  %v1600_v44 = vpop.f32.mrf.mxu2  ;;  %1891 = vmatpush.msrb.mxu1 %v1817_v28 }
 0x3e9   : > { %v1543_v47 = vadd.f32 %v1542_v43, %v1513_v29  ;;  %v1601_v48 = vadd.f32 %v1600_v44, %v1571_v31  ;;  %v1516_v56 = vpop.f32.mrf.mxu1  ;;  %v1574_v57 = vpop.f32.mrf.mxu0  ;;  %v1849_v29 = vld [vmem:[#allocation12 + $0xd70] sm:$0xff]  ;;  %v1818_v31 = vld [vmem:[#allocation12 + $0xc78] sm:$0xff]  ;;  %1977 = vmatpush.msrb.mxu2 %v1852_v27  ;;  %v1811_v43 = vld [vmem:[#allocation12 + $0xc40] sm:$0xff] }
 0x3ea   : > { %1920 = vmatpush.msrb.mxu3 %v1849_v29  ;;  %1949 = vmatpush.msrb.mxu0 %v1818_v31  ;;  %v1843_v44 = vld [vmem:[#allocation12 + $0xd40] sm:$0xff] }
 0x3eb   : > { %v1611_v51 = vmax.f32 %v1543_v47, 0.0  ;;  %v1612_v53 = vmax.f32 %v1601_v48, 0.0  ;;  %1978 = vmatpush.msrb.mxu2 %v1850_v32  ;;  %1892 = vmatpush.msrb.mxu1 %v1815_v33  ;;  %v2372_v47 = vld [vmem:[#allocation14 + $0xf0] sm:$0xff]  ;;  %v2370_v48 = vld [vmem:[#allocation14 + $0xe0] sm:$0xff] }
 0x3ec   : > { %1921 = vmatpush.msrb.mxu3 %v1847_v5  ;;  %1950 = vmatpush.msrb.mxu0 %v1816_v34 }
 0x3ed   : > { %1705 = vmatmul.f32.gmra.mxu1 %v1611_v51  ;;  %3190 = vmatmul.msk.f32.gmra.mxu3 %vm455_vm3, %v1612_v53 }
 0x3ee   : > { %1763 = vmatmul.f32.gmra.mxu0 %v1611_v51  ;;  %3194 = vmatmul.msk.f32.gmra.mxu2 %vm455_vm3, %v1612_v53  ;;  %v2364_v51 = vld [vmem:[#allocation14 + $0xb0] sm:$0xff]  ;;  %v2362_v53 = vld [vmem:[#allocation14 + $0xa0] sm:$0xff] }
 0x3ef   : > { %1979 = vmatpush.msrb.mxu2 %v1848_v35  ;;  %1893 = vmatpush.msrb.mxu1 %v1813_v38  ;;  %v3984_v38 = vld [vmem:[#allocation6] sm:$0xff] }
 0x3f0   : > { %v1545_v62 = vpop.f32.mrf.mxu3  ;;  %v1603_v63 = vpop.f32.mrf.mxu2  ;;  %1922 = vmatpush.msrb.mxu3 %v1845_v39  ;;  %1951 = vmatpush.msrb.mxu0 %v1814_v40  ;;  %v3988_v39 = vmul.f32 %v3984_v38, %v3885_v4  ;;  %v2189_v40 = vld [vmem:[#allocation6 + $0x18] sm:$0xff] }
 0x3f1   : > { %v1546_v2 = vadd.f32 %v1545_v62, %v1516_v56  ;;  %v1604_v3 = vadd.f32 %v1603_v63, %v1574_v57  ;;  %v1519_v10 = vpop.f32.mrf.mxu1  ;;  %v1577_v12 = vpop.f32.mrf.mxu0  ;;  %1980 = vmatpush.msrb.mxu2 %v1846_v41  ;;  %1894 = vmatpush.msrb.mxu1 %v1811_v43  ;;  %v2356_v56 = vld [vmem:[#allocation14 + $0x70] sm:$0xff]  ;;  %v2354_v57 = vld [vmem:[#allocation14 + $0x60] sm:$0xff]  ;;  %v3992_v41 = vmul.f32 %v2189_v40, %v3898_v36 }
 0x3f2   : > { %1923 = vmatpush.msrb.mxu3 %v1843_v44  ;;  %1952 = vmatpush.msrb.mxu0 %v1812_v45  ;;  %v2348_v62 = vld [vmem:[#allocation14 + $0x30] sm:$0xff]  ;;  %v2346_v63 = vld [vmem:[#allocation14 + $0x20] sm:$0xff]  ;;  %v2195_v45 = vld [vmem:[#allocation6 + $0x48] sm:$0xff] }
 0x3f3   : > { %v1613_v6 = vmax.f32 %v1546_v2, 0.0  ;;  %v1614_v7 = vmax.f32 %v1604_v3, 0.0  ;;  %1981 = vmatpush.msrb.mxu2 %v1844_v46  ;;  %v2192_v43 = vld [vmem:[#allocation6 + $0x30] sm:$0xff]  ;;  %v4000_v46 = vmul.f32 %v2195_v45, %v3922_v42  ;;  %v2389_v45 = vld [vmem:[#allocation14 + $0x178] sm:$0xff] }
 0x3f4   : > { %v3996_v44 = vmul.f32 %v2192_v43, %v3909_v30  ;;  %v2129_v43 = vld [vmem:[#allocation11] sm:$0xff] }
 0x3f5   : > { %1708 = vmatmul.f32.gmra.mxu1 %v1613_v6  ;;  %3191 = vmatmul.msk.f32.gmra.mxu3 %vm455_vm3, %v1614_v7 }
 0x3f6   : > { %1766 = vmatmul.f32.gmra.mxu0 %v1613_v6  ;;  %3195 = vmatmul.msk.f32.gmra.mxu2 %vm455_vm3, %v1614_v7 }
 0x3f7   : > { %2402 = vmatpush.msra.mxu2 %v2372_v47 }
 0x3f8   : > { %v1548_v13 = vpop.f32.mrf.mxu3  ;;  %v1606_v14 = vpop.f32.mrf.mxu2 }
 0x3f9   : > { %v1549_v15 = vadd.f32 %v1548_v13, %v1519_v10  ;;  %v1607_v16 = vadd.f32 %v1606_v14, %v1577_v12  ;;  %2403 = vmatpush.msra.mxu2 %v2370_v48  ;;  %v2342_v10 = vld [vmem:[#allocation14] sm:$0xff] }
 0x3fb   : > { %v1615_v17 = vmax.f32 %v1549_v15, 0.0  ;;  %v1616_v18 = vmax.f32 %v1607_v16, 0.0  ;;  %2404 = vmatpush.msra.mxu2 %v2368_v49 }
 0x3fd   : > { %1711 = vmatmul.f32.gmra.mxu1 %v1615_v17  ;;  %3192 = vmatmul.msk.f32.gmra.mxu3 %vm455_vm3, %v1616_v18 }
 0x3fe   : > { %1769 = vmatmul.f32.gmra.mxu0 %v1615_v17  ;;  %3196 = vmatmul.msk.f32.gmra.mxu2 %vm455_vm3, %v1616_v18 }
 0x3ff   : > { %2405 = vmatpush.msra.mxu2 %v2366_v50 }
 0x401   : > { %2406 = vmatpush.msra.mxu2 %v2364_v51 }
 0x403   : > { %2407 = vmatpush.msra.mxu2 %v2362_v53 }
 0x405   : > { %2408 = vmatpush.msra.mxu2 %v2360_v54 }
 0x407   : > { %2409 = vmatpush.msra.mxu2 %v2358_v55 }
 0x409   : > { %2410 = vmatpush.msra.mxu2 %v2356_v56 }
 0x40b   : > { %2411 = vmatpush.msra.mxu2 %v2354_v57 }
 0x40d   : > { %2412 = vmatpush.msra.mxu2 %v2352_v59 }
 0x40f   : > { %2413 = vmatpush.msra.mxu2 %v2350_v61 }
 0x411   : > { %2414 = vmatpush.msra.mxu2 %v2348_v62 }
 0x413   : > { %2415 = vmatpush.msra.mxu2 %v2346_v63 }
 0x415   : > { %2416 = vmatpush.msra.mxu2 %v2344_v1 }
 0x417   : > { %2417 = vmatpush.msra.mxu2 %v2342_v10 }
 0x462   : > { %v1703_v58 = vpop.f32.mrf.mxu1 }
 0x463   : > { %v1761_v60 = vpop.f32.mrf.mxu0 }
 0x468   : > { %v1732_v0 = vpop.f32.mrf.mxu3 }
 0x469   : > { %v1733_v2 = vadd.f32 %v1732_v0, %v1703_v58  ;;  %v1790_v3 = vpop.f32.mrf.mxu2 }
 0x46a   : > { %v1791_v6 = vadd.f32 %v1790_v3, %v1761_v60  ;;  %v1706_v9 = vpop.f32.mrf.mxu1 }
 0x46b   : > { %v1802_v7 = vmax.f32 %v1733_v2, 0.0  ;;  %v1764_v12 = vpop.f32.mrf.mxu0 }
 0x46c   : > { %v1803_v8 = vmax.f32 %v1791_v6, 0.0 }
 0x46d   : > { %1895 = vmatmul.f32.vlgmr.msrb.gmra.mxu1 %v1802_v7  ;;  %1953 = vmatmul.f32.vlgmr.msrb.gmra.mxu0 %v1802_v7 }
 0x46e   : > { %3197 = vmatmul.msk.f32.vlgmr.msrb.gmra.mxu3 %vm455_vm3, %v1803_v8  ;;  %3201 = vmatmul.msk.f32.vlgmr.msrb.gmra.mxu2 %vm455_vm3, %v1803_v8 }
 0x470   : > { %v1735_v13 = vpop.f32.mrf.mxu3 }
 0x471   : > { %v1736_v14 = vadd.f32 %v1735_v13, %v1706_v9  ;;  %v1793_v15 = vpop.f32.mrf.mxu2 }
 0x472   : > { %v1794_v16 = vadd.f32 %v1793_v15, %v1764_v12  ;;  %v1709_v19 = vpop.f32.mrf.mxu1 }
 0x473   : > { %v1804_v17 = vmax.f32 %v1736_v14, 0.0  ;;  %v1767_v20 = vpop.f32.mrf.mxu0 }
 0x474   : > { %v1805_v18 = vmax.f32 %v1794_v16, 0.0 }
 0x475   : > { %1898 = vmatmul.f32.gmra.mxu1 %v1804_v17  ;;  %1956 = vmatmul.f32.gmra.mxu0 %v1804_v17 }
 0x476   : > { %3198 = vmatmul.msk.f32.gmra.mxu3 %vm455_vm3, %v1805_v18  ;;  %3202 = vmatmul.msk.f32.gmra.mxu2 %vm455_vm3, %v1805_v18 }
 0x478   : > { %v1738_v21 = vpop.f32.mrf.mxu3 }
 0x479   : > { %v1739_v22 = vadd.f32 %v1738_v21, %v1709_v19  ;;  %v1796_v23 = vpop.f32.mrf.mxu2 }
 0x47a   : > { %v1797_v25 = vadd.f32 %v1796_v23, %v1767_v20  ;;  %v1712_v28 = vpop.f32.mrf.mxu1 }
 0x47b   : > { %v1806_v26 = vmax.f32 %v1739_v22, 0.0  ;;  %v1770_v31 = vpop.f32.mrf.mxu0 }
 0x47c   : > { %v1807_v27 = vmax.f32 %v1797_v25, 0.0 }
 0x47d   : > { %1901 = vmatmul.f32.gmra.mxu1 %v1806_v26  ;;  %1959 = vmatmul.f32.gmra.mxu0 %v1806_v26 }
 0x47e   : > { %3199 = vmatmul.msk.f32.gmra.mxu3 %vm455_vm3, %v1807_v27  ;;  %3203 = vmatmul.msk.f32.gmra.mxu2 %vm455_vm3, %v1807_v27 }
 0x480   : > { %v1741_v29 = vpop.f32.mrf.mxu3 }
 0x481   : > { %v1742_v32 = vadd.f32 %v1741_v29, %v1712_v28  ;;  %v1799_v33 = vpop.f32.mrf.mxu2 }
 0x482   : > { %v1800_v5 = vadd.f32 %v1799_v33, %v1770_v31 }
 0x483   : > { %v1808_v34 = vmax.f32 %v1742_v32, 0.0 }
 0x484   : > { %v1809_v35 = vmax.f32 %v1800_v5, 0.0 }
 0x485   : > { %1904 = vmatmul.f32.gmra.mxu1 %v1808_v34  ;;  %1962 = vmatmul.f32.gmra.mxu0 %v1808_v34 }
 0x486   : > { %3200 = vmatmul.msk.f32.gmra.mxu3 %vm455_vm3, %v1809_v35  ;;  %3204 = vmatmul.msk.f32.gmra.mxu2 %vm455_vm3, %v1809_v35 }
 0x48e   : > { %2418 = vmatmul.f32.vlgmr.msra.gmra.mxu2 %v3988_v39 }
 0x496   : > { %2421 = vmatmul.f32.gmra.mxu2 %v3992_v41 }
 0x49e   : > { %2424 = vmatmul.f32.gmra.mxu2 %v3996_v44 }
 0x4a6   : > { %2427 = vmatmul.f32.gmra.mxu2 %v4000_v46 }
 0x4ea   : > { %v1896_v4 = vpop.f32.mrf.mxu1  ;;  %v1954_v36 = vpop.f32.mrf.mxu0 }
 0x4f1   : > { %v1925_v47 = vpop.f32.mrf.mxu3  ;;  %v1983_v49 = vpop.f32.mrf.mxu2 }
 0x4f2   : > { %v1899_v48 = vpop.f32.mrf.mxu1  ;;  %v4003_v51 = vadd.f32 %v1925_v47, %v1896_v4  ;;  %v1957_v56 = vpop.f32.mrf.mxu0  ;;  %v4021_v1 = vadd.f32 %v1983_v49, %v1954_v36  ;;  %v2051_v4 = vld [vmem:[#allocation9] sm:$0xff]  ;;  %v2387_v49 = vld [vmem:[#allocation14 + $0x168] sm:$0xff] }
 0x4f3   : > { %v2055_v47 = vld [vmem:[#allocation9 + $0x20] sm:$0xff] }
 0x4f9   : > { %v1928_v50 = vpop.f32.mrf.mxu3  ;;  %v1986_v42 = vpop.f32.mrf.mxu2 }
 0x4fa   : > { %v4005_v53 = vadd.f32 %v1928_v50, %v1899_v48  ;;  %v1902_v54 = vpop.f32.mrf.mxu1  ;;  %v1960_v63 = vpop.f32.mrf.mxu0  ;;  %v4019_v0 = vadd.f32 %v1986_v42, %v1957_v56  ;;  %v2388_v48 = vld [vmem:[#allocation14 + $0x170] sm:$0xff]  ;;  %v2386_v50 = vld [vmem:[#allocation14 + $0x160] sm:$0xff] }
 0x4fb   : > { %v2384_v56 = vld [vmem:[#allocation14 + $0x150] sm:$0xff] }
 0x4fc   : > { %v3348_v30 = vpack.i.bf16 %v4003_v51, %v4005_v53  ;;  %v3378_v2 = vpack.i.bf16 %v4021_v1, %v4019_v0 }
 0x4fe   : > { %3349 = vrot.lane.b32.xlu1 %v3348_v30, %s3700_s16 }
 0x501   : > { %v1931_v55 = vpop.f32.mrf.mxu3  ;;  %v1989_v61 = vpop.f32.mrf.mxu2 }
 0x502   : > { %v1905_v57 = vpop.f32.mrf.mxu1  ;;  %v4010_v59 = vadd.f32 %v1931_v55, %v1902_v54  ;;  %v1963_v6 = vpop.f32.mrf.mxu0  ;;  %v4030_v8 = vadd.f32 %v1989_v61, %v1960_v63  ;;  %v2385_v54 = vld [vmem:[#allocation14 + $0x158] sm:$0xff]  ;;  %v2130_v55 = vld [vmem:[#allocation11 + $0x8] sm:$0xff]  ;;  %v2380_v61 = vld [vmem:[#allocation14 + $0x130] sm:$0xff] }
 0x503   : > { %v2378_v63 = vld [vmem:[#allocation14 + $0x120] sm:$0xff] }
 0x509   : > { %v1934_v58 = vpop.f32.mrf.mxu3  ;;  %v1992_v3 = vpop.f32.mrf.mxu2 }
 0x50a   : > { %v4012_v60 = vadd.f32 %v1934_v58, %v1905_v57  ;;  %v4028_v7 = vadd.f32 %v1992_v3, %v1963_v6  ;;  %v2382_v58 = vld [vmem:[#allocation14 + $0x140] sm:$0xff]  ;;  %v2131_v3 = vld [vmem:[#allocation11 + $0x10] sm:$0xff] }
 0x50b   : > { %v2376_v6 = vld [vmem:[#allocation14 + $0x110] sm:$0xff] }
 0x50c   : > { %v3363_v62 = vpack.i.bf16 %v4010_v59, %v4012_v60  ;;  %v3383_v9 = vpack.i.bf16 %v4030_v8, %v4028_v7 }
 0x50e   : > { %3364 = vrot.lane.b32.xlu1 %v3363_v62, %s3699_s10  ;;  %3354 = vrot.lane.b32.xlu2 %v3363_v62, %s3701_s19 }
 0x50f   : > { %3344 = vrot.lane.b32.xlu0 %v3363_v62, %s3700_s16  ;;  %v2381_v62 = vld [vmem:[#allocation14 + $0x138] sm:$0xff] }
 0x516   : > { %3379 = vrot.lane.b32.xlu1 %v3378_v2, %s3699_s10  ;;  %3369 = vrot.lane.b32.xlu2 %v3348_v30, %s3699_s10 }
 0x517   : > { %3359 = vrot.lane.b32.xlu0 %v3348_v30, %s3701_s19 }
 0x51e   : > { %3384 = vrot.lane.b32.xlu2 %v3383_v9, %s3701_s19 }
 0x51f   : > { %3374 = vrot.lane.b32.xlu0 %v3383_v9, %s3699_s10  ;;  %v4048_v9 = vld [vmem:[#allocation6 + $0x8] sm:$0xff] }
 0x527   : > { %3389 = vrot.lane.b32.xlu0 %v3378_v2, %s3701_s19  ;;  %v2379_v2 = vld [vmem:[#allocation14 + $0x128] sm:$0xff] }
 0x568   : > { %v3355_v10 = vpop.permute.xlu2 %3354 }
 0x569   : > { %v3356_v23 = vunpack.i.l.bf16 %v3355_v10  ;;  %v3357_v25 = vunpack.i.h.bf16 %v3355_v10  ;;  %v2377_v10 = vld [vmem:[#allocation14 + $0x118] sm:$0xff] }
 0x570   : > { %v3370_v12 = vpop.permute.xlu2 %3369  ;;  %v3350_v18 = vpop.permute.xlu1 %3349 }
 0x571   : > { %v3351_v20 = vunpack.i.l.bf16 %v3350_v18  ;;  %v3352_v21 = vunpack.i.h.bf16 %v3350_v18  ;;  %v3371_v33 = vunpack.i.l.bf16 %v3370_v12  ;;  %v3372_v5 = vunpack.i.h.bf16 %v3370_v12  ;;  %v2374_v12 = vld [vmem:[#allocation14 + $0x100] sm:$0xff] }
 0x578   : > { %v3385_v13 = vpop.permute.xlu2 %3384 }
 0x579   : > { %v3386_v14 = vunpack.i.l.bf16 %v3385_v13  ;;  %v3387_v15 = vunpack.i.h.bf16 %v3385_v13  ;;  %v2211_v13 = vmul.f32 %v4048_v9, %v3878_v11  ;;  %v2369_v11 = vld [vmem:[#allocation14 + $0xd8] sm:$0xff] }
 0x57b   : > { %2169 = vmatpush.msra.mxu0 %v3386_v14  ;;  %v2375_v14 = vld [vmem:[#allocation14 + $0x108] sm:$0xff] }
 0x57d   : > { %2170 = vmatpush.msra.mxu0 %v3387_v15  ;;  %v2373_v15 = vld [vmem:[#allocation14 + $0xf8] sm:$0xff] }
 0x580   : > { %v3365_v27 = vpop.permute.xlu1 %3364 }
 0x581   : > { %v3345_v16 = vpop.permute.xlu0 %3344  ;;  %v3366_v31 = vunpack.i.l.bf16 %v3365_v27  ;;  %v3367_v32 = vunpack.i.h.bf16 %v3365_v27  ;;  %v2355_v27 = vld [vmem:[#allocation14 + $0x68] sm:$0xff] }
 0x582   : > { %v3346_v17 = vunpack.i.l.bf16 %v3345_v16  ;;  %v3347_v19 = vunpack.i.h.bf16 %v3345_v16  ;;  %v2132_v16 = vld [vmem:[#allocation11 + $0x18] sm:$0xff] }
 0x584   : > { %2071 = vmatpush.msra.mxu1 %v3346_v17  ;;  %3230 = vmatpush.msra.mxu3 %v3346_v17  ;;  %v4058_v17 = vld [vmem:[#allocation6 + $0x20] sm:$0xff] }
 0x585   : > { %v2213_v18 = vmul.f32 %v4058_v17, %v3891_v24 }
 0x586   : > { %2072 = vmatpush.msra.mxu1 %v3347_v19  ;;  %3231 = vmatpush.msra.mxu3 %v3347_v19  ;;  %v2365_v19 = vld [vmem:[#allocation14 + $0xb8] sm:$0xff] }
 0x588   : > { %2073 = vmatpush.msra.mxu1 %v3351_v20  ;;  %3232 = vmatpush.msra.mxu3 %v3351_v20  ;;  %v3380_v30 = vpop.permute.xlu1 %3379  ;;  %v2363_v20 = vld [vmem:[#allocation14 + $0xa8] sm:$0xff] }
 0x589   : > { %v3360_v22 = vpop.permute.xlu0 %3359  ;;  %v3381_v57 = vunpack.i.l.bf16 %v3380_v30 }
 0x58a   : > { %2074 = vmatpush.msra.mxu1 %v3352_v21  ;;  %3233 = vmatpush.msra.mxu3 %v3352_v21  ;;  %v3361_v26 = vunpack.i.l.bf16 %v3360_v22  ;;  %v3362_v28 = vunpack.i.h.bf16 %v3360_v22  ;;  %v4065_v21 = vld [vmem:[#allocation6 + $0x38] sm:$0xff] }
 0x58b   : > { %v2361_v22 = vld [vmem:[#allocation14 + $0x98] sm:$0xff]  ;;  %v2215_v24 = vmul.f32 %v4065_v21, %v3902_v37 }
 0x58c   : > { %2075 = vmatpush.msra.mxu1 %v3356_v23  ;;  %3234 = vmatpush.msra.mxu3 %v3356_v23  ;;  %v2359_v23 = vld [vmem:[#allocation14 + $0x88] sm:$0xff] }
 0x58e   : > { %2076 = vmatpush.msra.mxu1 %v3357_v25  ;;  %3235 = vmatpush.msra.mxu3 %v3357_v25  ;;  %v2056_v25 = vld [vmem:[#allocation9 + $0x28] sm:$0xff] }
 0x590   : > { %2077 = vmatpush.msra.mxu1 %v3361_v26  ;;  %3236 = vmatpush.msra.mxu3 %v3361_v26  ;;  %v2357_v26 = vld [vmem:[#allocation14 + $0x78] sm:$0xff] }
 0x591   : > { %v3375_v29 = vpop.permute.xlu0 %3374 }
 0x592   : > { %2078 = vmatpush.msra.mxu1 %v3362_v28  ;;  %3237 = vmatpush.msra.mxu3 %v3362_v28  ;;  %v3376_v36 = vunpack.i.l.bf16 %v3375_v29  ;;  %v3377_v42 = vunpack.i.h.bf16 %v3375_v29  ;;  %v4072_v28 = vld [vmem:[#allocation6 + $0x50] sm:$0xff]  ;;  %v2353_v29 = vld [vmem:[#allocation14 + $0x58] sm:$0xff] }
 0x593   : > { %v2217_v37 = vmul.f32 %v4072_v28, %v3915_v52 }
 0x594   : > { %2079 = vmatpush.msra.mxu1 %v3366_v31  ;;  %3238 = vmatpush.msra.mxu3 %v3366_v31  ;;  %v2351_v31 = vld [vmem:[#allocation14 + $0x48] sm:$0xff] }
 0x596   : > { %2080 = vmatpush.msra.mxu1 %v3367_v32  ;;  %3239 = vmatpush.msra.mxu3 %v3367_v32  ;;  %v2058_v32 = vld [vmem:[#allocation9 + $0x38] sm:$0xff] }
 0x598   : > { %2081 = vmatpush.msra.mxu1 %v3371_v33  ;;  %3240 = vmatpush.msra.mxu3 %v3371_v33  ;;  %v2349_v33 = vld [vmem:[#allocation14 + $0x38] sm:$0xff] }
 0x599   : > { %v3390_v34 = vpop.permute.xlu0 %3389 }
 0x59a   : > { %v3391_v35 = vunpack.i.l.bf16 %v3390_v34  ;;  %2082 = vmatpush.msra.mxu1 %v3372_v5  ;;  %3241 = vmatpush.msra.mxu3 %v3372_v5  ;;  %v3392_v40 = vunpack.i.h.bf16 %v3390_v34  ;;  %v2347_v5 = vld [vmem:[#allocation14 + $0x28] sm:$0xff]  ;;  %v2345_v34 = vld [vmem:[#allocation14 + $0x18] sm:$0xff] }
 0x59c   : > { %2083 = vmatpush.msra.mxu1 %v4012_v60  ;;  %3242 = vmatpush.msra.mxu3 %v4012_v60  ;;  %v2057_v60 = vld [vmem:[#allocation9 + $0x30] sm:$0xff] }
 0x59d   : > { %2171 = vmatpush.msra.mxu0 %v3391_v35  ;;  %v2343_v35 = vld [vmem:[#allocation14 + $0x8] sm:$0xff] }
 0x59e   : > { %2084 = vmatpush.msra.mxu1 %v4010_v59  ;;  %3243 = vmatpush.msra.mxu3 %v4010_v59  ;;  %v3382_v59 = vunpack.i.h.bf16 %v3380_v30 }
 0x59f   : > { %2172 = vmatpush.msra.mxu0 %v3392_v40 }
 0x5a0   : > { %3209 = vmatmul.msk.f32.vlgmr.msra.gmra.mxu0 %vm445_vm1, %v2129_v43  ;;  %2085 = vmatpush.msra.mxu1 %v4005_v53 }
 0x5a1   : > { %3244 = vmatpush.msra.mxu3 %v4005_v53  ;;  %2497 = vmatpush.msrb.mxu0 %v2389_v45  ;;  %v2383_v53 = vld [vmem:[#allocation14 + $0x148] sm:$0xff] }
 0x5a2   : > { %2086 = vmatpush.msra.mxu1 %v4003_v51 }
 0x5a3   : > { %3245 = vmatpush.msra.mxu3 %v4003_v51  ;;  %2087 = vmatmul.f32.vlgmr.msra.gmra.mxu1 %v2051_v4  ;;  %v2053_v51 = vld [vmem:[#allocation9 + $0x10] sm:$0xff] }
 0x5a4   : > { %2093 = vmatmul.f32.vlgmr.msra.gmra.mxu3 %v2055_v47  ;;  %2439 = vmatpush.msrb.mxu1 %v2388_v48 }
 0x5a5   : > { %2108 = vmatpush.msrb.mxu3 %v3376_v36  ;;  %2498 = vmatpush.msrb.mxu0 %v2387_v49 }
 0x5a6   : > { %2440 = vmatpush.msrb.mxu1 %v2386_v50 }
 0x5a7   : > { %2109 = vmatpush.msrb.mxu3 %v3377_v42  ;;  %2499 = vmatpush.msrb.mxu0 %v2385_v54  ;;  %v2612_v54 = vld [vmem:[%s4673_s7 + $0x2f0] sm:$0xff]  ;;  %v2610_v42 = vld [vmem:[%s4673_s7 + $0x2e0] sm:$0xff] }
 0x5a8   : > { %3210 = vmatmul.msk.f32.gmra.mxu0 %vm445_vm1, %v2130_v55  ;;  %2441 = vmatpush.msrb.mxu1 %v2384_v56  ;;  %v2608_v55 = vld [vmem:[%s4673_s7 + $0x2d0] sm:$0xff] }
 0x5a9   : > { %2110 = vmatpush.msrb.mxu3 %v3381_v57  ;;  %2500 = vmatpush.msrb.mxu0 %v2383_v53  ;;  %v2606_v57 = vld [vmem:[%s4673_s7 + $0x2c0] sm:$0xff] }
 0x5aa   : > { %2442 = vmatpush.msrb.mxu1 %v2382_v58  ;;  %v2604_v58 = vld [vmem:[%s4673_s7 + $0x2b0] sm:$0xff] }
 0x5ab   : > { %2111 = vmatpush.msrb.mxu3 %v3382_v59  ;;  %2090 = vmatmul.f32.gmra.mxu1 %v2053_v51  ;;  %v2602_v51 = vld [vmem:[%s4673_s7 + $0x2a0] sm:$0xff]  ;;  %v2600_v59 = vld [vmem:[%s4673_s7 + $0x290] sm:$0xff] }
 0x5ac   : > { %2096 = vmatmul.f32.gmra.mxu3 %v2057_v60  ;;  %2443 = vmatpush.msrb.mxu1 %v2380_v61  ;;  %v4174_v61 = vld [vmem:[#allocation8 + $0x20] sm:$0xff] }
 0x5ad   : > { %2112 = vmatpush.msrb.mxu3 %v4028_v7  ;;  %2501 = vmatpush.msrb.mxu0 %v2381_v62  ;;  %v2052_v7 = vld [vmem:[#allocation9 + $0x8] sm:$0xff]  ;;  %v2598_v62 = vld [vmem:[%s4673_s7 + $0x280] sm:$0xff] }
 0x5ae   : > { %2444 = vmatpush.msrb.mxu1 %v2378_v63  ;;  %v4179_v63 = vld [vmem:[#allocation8 + $0x8] sm:$0xff] }
 0x5af   : > { %2113 = vmatpush.msrb.mxu3 %v4030_v8  ;;  %2502 = vmatpush.msrb.mxu0 %v2379_v2  ;;  %v2371_v8 = vld [vmem:[#allocation14 + $0xe8] sm:$0xff]  ;;  %v2596_v2 = vld [vmem:[%s4673_s7 + $0x270] sm:$0xff] }
 0x5b0   : > { %3211 = vmatmul.msk.f32.gmra.mxu0 %vm445_vm1, %v2131_v3  ;;  %2445 = vmatpush.msrb.mxu1 %v2376_v6  ;;  %v2594_v3 = vld [vmem:[%s4673_s7 + $0x260] sm:$0xff]  ;;  %v2592_v6 = vld [vmem:[%s4673_s7 + $0x250] sm:$0xff] }
 0x5b1   : > { %2114 = vmatpush.msrb.mxu3 %v4019_v0  ;;  %2503 = vmatpush.msrb.mxu0 %v2377_v10  ;;  %v2367_v0 = vld [vmem:[#allocation14 + $0xc8] sm:$0xff] }
 0x5b2   : > { %2446 = vmatpush.msrb.mxu1 %v2374_v12  ;;  %v2203_v12 = vld [vmem:[#allocation8 + $0x28] sm:$0xff] }
 0x5b3   : > { %2115 = vmatpush.msrb.mxu3 %v4021_v1  ;;  %3213 = vmatmul.msk.f32.vlgmr.msrb.gmra.mxu1 %vm450_vm2, %v2211_v13  ;;  %v2054_v1 = vld [vmem:[#allocation9 + $0x18] sm:$0xff] }
 0x5b4   : > { %3205 = vmatmul.msk.f32.vlgmr.msrb.gmra.mxu3 %vm450_vm2, %v2052_v7  ;;  %2504 = vmatpush.msrb.mxu0 %v2375_v14  ;;  %v2588_v7 = vld [vmem:[%s4673_s7 + $0x230] sm:$0xff] }
 0x5b5   : > { %2460 = vmatpush.msra.mxu3 %v2373_v15  ;;  %v2208_v14 = vld [vmem:[#allocation8 + $0x50] sm:$0xff] }
 0x5b7   : > { %2461 = vmatpush.msra.mxu3 %v2371_v8 }
 0x5b8   : > { %3212 = vmatmul.msk.f32.gmra.mxu0 %vm445_vm1, %v2132_v16  ;;  %v2586_v16 = vld [vmem:[%s4673_s7 + $0x220] sm:$0xff] }
 0x5b9   : > { %2462 = vmatpush.msra.mxu3 %v2369_v11  ;;  %v2548_v11 = vld [vmem:[%s4673_s7 + $0xf0] sm:$0xff] }
 0x5ba   : > { %2650 = vmatpush.msrb.mxu2 %v2548_v11 }
 0x5bb   : > { %2463 = vmatpush.msra.mxu3 %v2367_v0  ;;  %3214 = vmatmul.msk.f32.gmra.mxu1 %vm450_vm2, %v2213_v18  ;;  %v2580_v0 = vld [vmem:[%s4673_s7 + $0x1f0] sm:$0xff] }
 0x5bc   : > { %3206 = vmatmul.msk.f32.gmra.mxu3 %vm450_vm2, %v2054_v1  ;;  %2679 = vmatpush.msra.mxu1 %v2580_v0  ;;  %v2549_v1 = vld [vmem:[%s4673_s7 + $0xf8] sm:$0xff]  ;;  %v2520_v0 = vld [vmem:[%s4673_s7 + $0x10] sm:$0xff] }
 0x5bd   : > { %2464 = vmatpush.msra.mxu3 %v2365_v19  ;;  %v2546_v19 = vld [vmem:[%s4673_s7 + $0xe0] sm:$0xff]  ;;  %2737 = vmatpush.msra.mxu0 %v2549_v1  ;;  %v2521_v1 = vld [vmem:[%s4673_s7 + $0x18] sm:$0xff] }
 0x5be   : > { %2651 = vmatpush.msrb.mxu2 %v2546_v19 }
 0x5bf   : > { %2465 = vmatpush.msra.mxu3 %v2363_v20  ;;  %v2578_v20 = vld [vmem:[%s4673_s7 + $0x1e0] sm:$0xff] }
 0x5c0   : > { %3217 = vmatmul.msk.f32.vlgmr.msrb.gmra.mxu0 %vm450_vm2, %v2211_v13  ;;  %v2590_v13 = vld [vmem:[%s4673_s7 + $0x240] sm:$0xff]  ;;  %2680 = vmatpush.msra.mxu1 %v2578_v20  ;;  %v2188_v20 = vld [vmem:[#allocation6 + $0x10] sm:$0xff] }
 0x5c1   : > { %2466 = vmatpush.msra.mxu3 %v2361_v22  ;;  %v2582_v22 = vld [vmem:[%s4673_s7 + $0x200] sm:$0xff] }
 0x5c3   : > { %2467 = vmatpush.msra.mxu3 %v2359_v23  ;;  %3215 = vmatmul.msk.f32.gmra.mxu1 %vm450_vm2, %v2215_v24  ;;  %v2547_v23 = vld [vmem:[%s4673_s7 + $0xe8] sm:$0xff] }
 0x5c4   : > { %3207 = vmatmul.msk.f32.gmra.mxu3 %vm450_vm2, %v2056_v25  ;;  %v2576_v25 = vld [vmem:[%s4673_s7 + $0x1d0] sm:$0xff]  ;;  %2738 = vmatpush.msra.mxu0 %v2547_v23 }
 0x5c5   : > { %2468 = vmatpush.msra.mxu3 %v2357_v26  ;;  %v2545_v26 = vld [vmem:[%s4673_s7 + $0xd8] sm:$0xff]  ;;  %2681 = vmatpush.msra.mxu1 %v2576_v25  ;;  %v2518_v25 = vld [vmem:[%s4673_s7] sm:$0xff] }
 0x5c6   : > { %2739 = vmatpush.msra.mxu0 %v2545_v26  ;;  %v2550_v26 = vld [vmem:[%s4673_s7 + $0x100] sm:$0xff] }
 0x5c7   : > { %2469 = vmatpush.msra.mxu3 %v2355_v27  ;;  %v2542_v27 = vld [vmem:[%s4673_s7 + $0xc0] sm:$0xff] }
 0x5c8   : > { %3218 = vmatmul.msk.f32.gmra.mxu0 %vm450_vm2, %v2213_v18  ;;  %v2584_v18 = vld [vmem:[%s4673_s7 + $0x210] sm:$0xff] }
 0x5c9   : > { %2470 = vmatpush.msra.mxu3 %v2353_v29  ;;  %v2574_v29 = vld [vmem:[%s4673_s7 + $0x1c0] sm:$0xff] }
 0x5ca   : > { %2682 = vmatpush.msra.mxu1 %v2574_v29 }
 0x5cb   : > { %2471 = vmatpush.msra.mxu3 %v2351_v31  ;;  %3216 = vmatmul.msk.f32.gmra.mxu1 %vm450_vm2, %v2217_v37  ;;  %v2543_v31 = vld [vmem:[%s4673_s7 + $0xc8] sm:$0xff] }
 0x5cc   : > { %3208 = vmatmul.msk.f32.gmra.mxu3 %vm450_vm2, %v2058_v32  ;;  %2740 = vmatpush.msra.mxu0 %v2543_v31  ;;  %v2572_v32 = vld [vmem:[%s4673_s7 + $0x1b0] sm:$0xff] }
 0x5cd   : > { %2472 = vmatpush.msra.mxu3 %v2349_v33  ;;  %v2541_v33 = vld [vmem:[%s4673_s7 + $0xb8] sm:$0xff]  ;;  %2683 = vmatpush.msra.mxu1 %v2572_v32  ;;  %v2579_v32 = vld [vmem:[%s4673_s7 + $0x1e8] sm:$0xff] }
 0x5ce   : > { %2741 = vmatpush.msra.mxu0 %v2541_v33  ;;  %v2577_v33 = vld [vmem:[%s4673_s7 + $0x1d8] sm:$0xff] }
 0x5cf   : > { %2473 = vmatpush.msra.mxu3 %v2347_v5  ;;  %v2538_v5 = vld [vmem:[%s4673_s7 + $0xa0] sm:$0xff] }
 0x5d0   : > { %3219 = vmatmul.msk.f32.gmra.mxu0 %vm450_vm2, %v2215_v24  ;;  %v2544_v24 = vld [vmem:[%s4673_s7 + $0xd0] sm:$0xff] }
 0x5d1   : > { %2474 = vmatpush.msra.mxu3 %v2345_v34  ;;  %2652 = vmatpush.msrb.mxu2 %v2544_v24  ;;  %v2570_v34 = vld [vmem:[%s4673_s7 + $0x1a0] sm:$0xff] }
 0x5d2   : > { %2684 = vmatpush.msra.mxu1 %v2570_v34 }
 0x5d3   : > { %2475 = vmatpush.msra.mxu3 %v2343_v35  ;;  %2653 = vmatpush.msrb.mxu2 %v2542_v27  ;;  %v2539_v35 = vld [vmem:[%s4673_s7 + $0xa8] sm:$0xff] }
 0x5d4   : > { %2476 = vmatmul.f32.vlgmr.msra.gmra.mxu3 %v3988_v39  ;;  %2742 = vmatpush.msra.mxu0 %v2539_v35  ;;  %v2519_v27 = vld [vmem:[%s4673_s7 + $0x8] sm:$0xff] }
 0x5d5   : > { %2708 = vmatpush.msrb.mxu3 %v2612_v54  ;;  %v2533_v54 = vld [vmem:[%s4673_s7 + $0x78] sm:$0xff] }
 0x5d7   : > { %2709 = vmatpush.msrb.mxu3 %v2610_v42  ;;  %v2530_v42 = vld [vmem:[%s4673_s7 + $0x60] sm:$0xff] }
 0x5d8   : > { %3220 = vmatmul.msk.f32.gmra.mxu0 %vm450_vm2, %v2217_v37  ;;  %v2540_v37 = vld [vmem:[%s4673_s7 + $0xb0] sm:$0xff] }
 0x5d9   : > { %2710 = vmatpush.msrb.mxu3 %v2608_v55  ;;  %2654 = vmatpush.msrb.mxu2 %v2540_v37  ;;  %v2562_v55 = vld [vmem:[%s4673_s7 + $0x160] sm:$0xff]  ;;  %v2581_v37 = vld [vmem:[%s4673_s7 + $0x1f8] sm:$0xff] }
 0x5db   : > { %2711 = vmatpush.msrb.mxu3 %v2606_v57  ;;  %2655 = vmatpush.msrb.mxu2 %v2538_v5  ;;  %v2531_v57 = vld [vmem:[%s4673_s7 + $0x68] sm:$0xff]  ;;  %v2613_v5 = vld [vmem:[%s4673_s7 + $0x2f8] sm:$0xff] }
 0x5dc   : > { %2479 = vmatmul.f32.gmra.mxu3 %v3992_v41 }
 0x5dd   : > { %2712 = vmatpush.msrb.mxu3 %v2604_v58 }
 0x5df   : > { %2713 = vmatpush.msrb.mxu3 %v2602_v51  ;;  %v2528_v51 = vld [vmem:[%s4673_s7 + $0x50] sm:$0xff] }
 0x5e1   : > { %2714 = vmatpush.msrb.mxu3 %v2600_v59  ;;  %v2560_v59 = vld [vmem:[%s4673_s7 + $0x150] sm:$0xff] }
 0x5e3   : > { %2715 = vmatpush.msrb.mxu3 %v2598_v62  ;;  %v2529_v62 = vld [vmem:[%s4673_s7 + $0x58] sm:$0xff] }
 0x5e4   : > { %2482 = vmatmul.f32.gmra.mxu3 %v3996_v44 }
 0x5e5   : > { %2716 = vmatpush.msrb.mxu3 %v2596_v2  ;;  %v2526_v2 = vld [vmem:[%s4673_s7 + $0x40] sm:$0xff] }
 0x5e7   : > { %2717 = vmatpush.msrb.mxu3 %v2594_v3  ;;  %v2558_v3 = vld [vmem:[%s4673_s7 + $0x140] sm:$0xff] }
 0x5e9   : > { %2718 = vmatpush.msrb.mxu3 %v2592_v6  ;;  %v2527_v6 = vld [vmem:[%s4673_s7 + $0x48] sm:$0xff] }
 0x5eb   : > { %2719 = vmatpush.msrb.mxu3 %v2590_v13  ;;  %v2556_v13 = vld [vmem:[%s4673_s7 + $0x130] sm:$0xff] }
 0x5ec   : > { %2485 = vmatmul.f32.gmra.mxu3 %v4000_v46 }
 0x5ed   : > { %2720 = vmatpush.msrb.mxu3 %v2588_v7  ;;  %v2525_v7 = vld [vmem:[%s4673_s7 + $0x38] sm:$0xff] }
 0x5ef   : > { %2721 = vmatpush.msrb.mxu3 %v2586_v16  ;;  %v2523_v16 = vld [vmem:[%s4673_s7 + $0x28] sm:$0xff] }
 0x5f1   : > { %2722 = vmatpush.msrb.mxu3 %v2584_v18  ;;  %v2552_v18 = vld [vmem:[%s4673_s7 + $0x110] sm:$0xff] }
 0x5f3   : > { %2723 = vmatpush.msrb.mxu3 %v2582_v22 }
 0x61d   : > { %v4085_v52 = vpop.f32.mrf.mxu0 }
 0x61e   : > { %2286 = vrot.lane.b32.xlu1 %v4085_v52, %s3700_s16  ;;  %2274 = vrot.lane.b32.xlu0 %v4085_v52, %s3699_s10 }
 0x61f   : > { %2262 = vrot.lane.b32.xlu2 %v4085_v52, %s3701_s19 }
 0x620   : > { %v2088_v40 = vpop.f32.mrf.mxu1 }
 0x625   : > { %v4093_v39 = vpop.f32.mrf.mxu0 }
 0x626   : > { %2288 = vrot.lane.b32.xlu1 %v4093_v39, %s3700_s16  ;;  %2276 = vrot.lane.b32.xlu0 %v4093_v39, %s3699_s10 }
 0x627   : > { %v2094_v41 = vpop.f32.mrf.mxu3  ;;  %2264 = vrot.lane.b32.xlu2 %v4093_v39, %s3701_s19 }
 0x628   : > { %v2091_v4 = vpop.f32.mrf.mxu1 }
 0x62d   : > { %v4101_v44 = vpop.f32.mrf.mxu0 }
 0x62e   : > { %2290 = vrot.lane.b32.xlu1 %v4101_v44, %s3700_s16  ;;  %2278 = vrot.lane.b32.xlu0 %v4101_v44, %s3699_s10 }
 0x62f   : > { %v2097_v46 = vpop.f32.mrf.mxu3  ;;  %2266 = vrot.lane.b32.xlu2 %v4101_v44, %s3701_s19 }
 0x635   : > { %v4152_v53 = vpop.f32.mrf.mxu0 }
 0x637   : > { %v2117_v43 = vpop.f32.mrf.mxu3 }
 0x638   : > { %v4109_v45 = vadd.f32 %v2117_v43, %v2088_v40  ;;  %v2537_v40 = vld [vmem:[%s4673_s7 + $0x98] sm:$0xff]  ;;  %v2534_v43 = vld [vmem:[%s4673_s7 + $0x80] sm:$0xff] }
 0x639   : > { %2743 = vmatpush.msra.mxu0 %v2537_v40 }
 0x63a   : > { %2246 = vrot.lane.b32.xlu0 %v4109_v45, %s3699_s10  ;;  %2234 = vrot.lane.b32.xlu2 %v4109_v45, %s3701_s19 }
 0x63b   : > { %2222 = vrot.lane.b32.xlu1 %v4109_v45, %s3700_s16 }
 0x63f   : > { %v2120_v47 = vpop.f32.mrf.mxu3 }
 0x640   : > { %v4117_v48 = vadd.f32 %v2120_v47, %v2091_v4  ;;  %v2566_v4 = vld [vmem:[%s4673_s7 + $0x180] sm:$0xff]  ;;  %v2535_v47 = vld [vmem:[%s4673_s7 + $0x88] sm:$0xff] }
 0x641   : > { %2744 = vmatpush.msra.mxu0 %v2535_v47 }
 0x642   : > { %2248 = vrot.lane.b32.xlu0 %v4117_v48, %s3699_s10  ;;  %2236 = vrot.lane.b32.xlu2 %v4117_v48, %s3701_s19 }
 0x643   : > { %2224 = vrot.lane.b32.xlu1 %v4117_v48, %s3700_s16  ;;  %2745 = vmatpush.msra.mxu0 %v2533_v54  ;;  %v2611_v54 = vld [vmem:[%s4673_s7 + $0x2e8] sm:$0xff] }
 0x645   : > { %2746 = vmatpush.msra.mxu0 %v2531_v57  ;;  %v2607_v57 = vld [vmem:[%s4673_s7 + $0x2c8] sm:$0xff] }
 0x647   : > { %v2123_v49 = vpop.f32.mrf.mxu3  ;;  %2747 = vmatpush.msra.mxu0 %v2529_v62  ;;  %v2567_v62 = vld [vmem:[%s4673_s7 + $0x188] sm:$0xff] }
 0x648   : > { %v4125_v36 = vadd.f32 %v2123_v49, %v2094_v41  ;;  %v2536_v41 = vld [vmem:[%s4673_s7 + $0x90] sm:$0xff] }
 0x649   : > { %2656 = vmatpush.msrb.mxu2 %v2536_v41  ;;  %v2532_v49 = vld [vmem:[%s4673_s7 + $0x70] sm:$0xff]  ;;  %2748 = vmatpush.msra.mxu0 %v2527_v6  ;;  %v2575_v41 = vld [vmem:[%s4673_s7 + $0x1c8] sm:$0xff]  ;;  %v2194_v6 = vld [vmem:[#allocation6 + $0x40] sm:$0xff] }
 0x64a   : > { %2250 = vrot.lane.b32.xlu0 %v4125_v36, %s3699_s10  ;;  %2238 = vrot.lane.b32.xlu2 %v4125_v36, %s3701_s19 }
 0x64b   : > { %2226 = vrot.lane.b32.xlu1 %v4125_v36, %s3700_s16  ;;  %2657 = vmatpush.msrb.mxu2 %v2534_v43  ;;  %v2191_v43 = vld [vmem:[#allocation6 + $0x28] sm:$0xff] }
 0x64c   : > { %2749 = vmatpush.msra.mxu0 %v2525_v7 }
 0x64d   : > { %2658 = vmatpush.msrb.mxu2 %v2532_v49 }
 0x64e   : > { %2750 = vmatpush.msra.mxu0 %v2523_v16  ;;  %v2563_v16 = vld [vmem:[%s4673_s7 + $0x168] sm:$0xff] }
 0x64f   : > { %v2126_v50 = vpop.f32.mrf.mxu3  ;;  %2659 = vmatpush.msrb.mxu2 %v2530_v42  ;;  %v2609_v42 = vld [vmem:[%s4673_s7 + $0x2d8] sm:$0xff] }
 0x650   : > { %v4133_v30 = vadd.f32 %v2126_v50, %v2097_v46  ;;  %v2568_v46 = vld [vmem:[%s4673_s7 + $0x190] sm:$0xff]  ;;  %2751 = vmatpush.msra.mxu0 %v2521_v1  ;;  %v2599_v1 = vld [vmem:[%s4673_s7 + $0x288] sm:$0xff] }
 0x651   : > { %2685 = vmatpush.msra.mxu1 %v2568_v46  ;;  %v2564_v50 = vld [vmem:[%s4673_s7 + $0x170] sm:$0xff]  ;;  %2660 = vmatpush.msrb.mxu2 %v2528_v51 }
 0x652   : > { %2252 = vrot.lane.b32.xlu0 %v4133_v30, %s3699_s10  ;;  %2240 = vrot.lane.b32.xlu2 %v4133_v30, %s3701_s19 }
 0x653   : > { %2228 = vrot.lane.b32.xlu1 %v4133_v30, %s3700_s16  ;;  %2686 = vmatpush.msra.mxu1 %v2566_v4 }
 0x654   : > { %2661 = vmatpush.msrb.mxu2 %v2526_v2  ;;  %2752 = vmatpush.msra.mxu0 %v2519_v27  ;;  %v2605_v2 = vld [vmem:[%s4673_s7 + $0x2b8] sm:$0xff] }
 0x655   : > { %2687 = vmatpush.msra.mxu1 %v2564_v50  ;;  %v2573_v50 = vld [vmem:[%s4673_s7 + $0x1b8] sm:$0xff] }
 0x657   : > { %v4150_v56 = vpop.f32.mrf.mxu3  ;;  %2688 = vmatpush.msra.mxu1 %v2562_v55  ;;  %v2569_v55 = vld [vmem:[%s4673_s7 + $0x198] sm:$0xff] }
 0x659   : > { %2689 = vmatpush.msra.mxu1 %v2560_v59 }
 0x65a   : > { %2280 = vrot.lane.b32.xlu0 %v4152_v53, %s3699_s10  ;;  %2268 = vrot.lane.b32.xlu2 %v4152_v53, %s3701_s19 }
 0x65b   : > { %2292 = vrot.lane.b32.xlu1 %v4152_v53, %s3700_s16  ;;  %2690 = vmatpush.msra.mxu1 %v2558_v3 }
 0x65d   : > { %2691 = vmatpush.msra.mxu1 %v2556_v13 }
 0x65f   : > { %v4172_v60 = vpop.f32.mrf.mxu3 }
 0x662   : > { %2626 = vrot.lane.b32.xlu0 %v4174_v61, %s3701_s19 }
 0x663   : > { %2622 = vrot.lane.b32.xlu1 %v4179_v63, %s3701_s19 }
 0x667   : > { %v4194_v10 = vpop.f32.mrf.mxu3 }
 0x66b   : > { %2628 = vrot.lane.b32.xlu1 %v2203_v12, %s3701_s19  ;;  %v2524_v12 = vld [vmem:[%s4673_s7 + $0x30] sm:$0xff] }
 0x66c   : > { %2662 = vmatpush.msrb.mxu2 %v2524_v12 }
 0x66f   : > { %v2486_v15 = vpop.f32.mrf.mxu3 }
 0x670   : > { %v4203_v8 = vadd.f32 %v2486_v15, %v2208_v14  ;;  %v2554_v15 = vld [vmem:[%s4673_s7 + $0x120] sm:$0xff] }
 0x671   : > { %2692 = vmatpush.msra.mxu1 %v2554_v15  ;;  %v2565_v15 = vld [vmem:[%s4673_s7 + $0x178] sm:$0xff] }
 0x673   : > { %2634 = vrot.lane.b32.xlu1 %v2208_v14, %s3701_s19  ;;  %v2522_v14 = vld [vmem:[%s4673_s7 + $0x20] sm:$0xff]  ;;  %2693 = vmatpush.msra.mxu1 %v2552_v18  ;;  %v2561_v18 = vld [vmem:[%s4673_s7 + $0x158] sm:$0xff] }
 0x674   : > { %2663 = vmatpush.msrb.mxu2 %v2522_v14 }
 0x675   : > { %2694 = vmatpush.msra.mxu1 %v2550_v26 }
 0x676   : > { %2664 = vmatpush.msrb.mxu2 %v2520_v0  ;;  %v2601_v0 = vld [vmem:[%s4673_s7 + $0x298] sm:$0xff] }
 0x677   : > { %2795 = vmatpush.msrb.mxu1 %v2613_v5 }
 0x678   : > { %2665 = vmatpush.msrb.mxu2 %v2518_v25  ;;  %v2595_v25 = vld [vmem:[%s4673_s7 + $0x268] sm:$0xff] }
 0x679   : > { %v4305_v58 = vpop.permute.xlu2 %2262  ;;  %2796 = vmatpush.msrb.mxu1 %v2611_v54 }
 0x67a   : > { %2766 = vmatpush.msra.mxu2 %v2581_v37  ;;  %v2593_v37 = vld [vmem:[%s4673_s7 + $0x258] sm:$0xff] }
 0x67b   : > { %2797 = vmatpush.msrb.mxu1 %v2609_v42  ;;  %v2585_v42 = vld [vmem:[%s4673_s7 + $0x218] sm:$0xff] }
 0x67c   : > { %2767 = vmatpush.msra.mxu2 %v2579_v32  ;;  %v2206_v32 = vld [vmem:[#allocation8 + $0x40] sm:$0xff] }
 0x67d   : > { %2798 = vmatpush.msrb.mxu1 %v2607_v57  ;;  %2632 = vrot.lane.b32.xlu0 %v2206_v32, %s3701_s19 }
 0x67e   : > { %2768 = vmatpush.msra.mxu2 %v2577_v33 }
 0x67f   : > { %2799 = vmatpush.msrb.mxu1 %v2605_v2 }
 0x680   : > { %2769 = vmatpush.msra.mxu2 %v2575_v41  ;;  %v2591_v41 = vld [vmem:[%s4673_s7 + $0x248] sm:$0xff] }
 0x681   : > { %v4343_v11 = vpop.permute.xlu2 %2264 }
 0x682   : > { %2770 = vmatpush.msra.mxu2 %v2573_v50  ;;  %v2589_v50 = vld [vmem:[%s4673_s7 + $0x238] sm:$0xff] }
 0x689   : > { %v4396_v46 = vpop.permute.xlu2 %2266 }
 0x690   : > { %v2287_v19 = vpop.permute.xlu1 %2286  ;;  %v4354_v22 = vpop.permute.xlu0 %2274 }
 0x691   : > { %v2318_v23 = vsel %vm445_vm1, %v4085_v52, %v2287_v19  ;;  %v2916_v24 = vsel %vm445_vm1, %v4109_v45, %v2287_v19  ;;  %v2559_v19 = vld [vmem:[%s4673_s7 + $0x148] sm:$0xff] }
 0x692   : > { %v2322_v29 = vsel %vm450_vm2, %v2318_v23, %v4305_v58  ;;  %2948 = vrot.lane.b32.xlu1 %v2916_v24, %s3701_s19  ;;  %v2557_v24 = vld [vmem:[%s4673_s7 + $0x138] sm:$0xff] }
 0x693   : > { %v2326_v52 = vsel %vm455_vm3, %v2322_v29, %v4354_v22 }
 0x694   : > { %v4374_v31 = vmul.f32 %v2326_v52, %v2188_v20  ;;  %v2235_v13 = vpop.permute.xlu2 %2234  ;;  %v2597_v20 = vld [vmem:[%s4673_s7 + $0x278] sm:$0xff]  ;;  %v2555_v52 = vld [vmem:[%s4673_s7 + $0x128] sm:$0xff] }
 0x696   : > { %2724 = vmatmul.f32.vlgmr.msrb.gmra.mxu3 %v4374_v31 }
 0x698   : > { %v4389_v34 = vpop.permute.xlu1 %2288  ;;  %v4391_v35 = vpop.permute.xlu0 %2276 }
 0x699   : > { %v2319_v40 = vsel %vm445_vm1, %v4093_v39, %v4389_v34  ;;  %v2571_v39 = vld [vmem:[%s4673_s7 + $0x1a8] sm:$0xff] }
 0x69a   : > { %v2323_v4 = vsel %vm450_vm2, %v2319_v40, %v4343_v11  ;;  %2771 = vmatpush.msra.mxu2 %v2571_v39 }
 0x69b   : > { %v2327_v47 = vsel %vm455_vm3, %v2323_v4, %v4391_v35 }
 0x69c   : > { %v4405_v49 = vmul.f32 %v2327_v47, %v2191_v43  ;;  %2772 = vmatpush.msra.mxu2 %v2569_v55  ;;  %v2237_v26 = vpop.permute.xlu2 %2236  ;;  %v2551_v47 = vld [vmem:[%s4673_s7 + $0x108] sm:$0xff] }
 0x69e   : > { %2727 = vmatmul.f32.gmra.mxu3 %v4405_v49  ;;  %2773 = vmatpush.msra.mxu2 %v2567_v62 }
 0x6a0   : > { %v4426_v51 = vpop.permute.xlu1 %2290  ;;  %v4428_v59 = vpop.permute.xlu0 %2278  ;;  %2774 = vmatpush.msra.mxu2 %v2565_v15  ;;  %v4527_v15 = vld [vmem:[#allocation8 + $0x38] sm:$0xff] }
 0x6a1   : > { %v2320_v3 = vsel %vm445_vm1, %v4101_v44, %v4426_v51  ;;  %v2603_v44 = vld [vmem:[%s4673_s7 + $0x2a8] sm:$0xff] }
 0x6a2   : > { %v2324_v12 = vsel %vm450_vm2, %v2320_v3, %v4396_v46  ;;  %2800 = vmatpush.msrb.mxu1 %v2603_v44  ;;  %2775 = vmatpush.msra.mxu2 %v2563_v16 }
 0x6a3   : > { %v2328_v7 = vsel %vm455_vm3, %v2324_v12, %v4428_v59 }
 0x6a4   : > { %v4443_v14 = vmul.f32 %v2328_v7, %v2194_v6  ;;  %2801 = vmatpush.msrb.mxu1 %v2601_v0  ;;  %2776 = vmatpush.msra.mxu2 %v2561_v18  ;;  %v2239_v55 = vpop.permute.xlu2 %2238  ;;  %v3417_v6 = vld [vmem:[#allocation6 + $0x18] sm:$0xff]  ;;  %v2583_v7 = vld [vmem:[%s4673_s7 + $0x208] sm:$0xff] }
 0x6a6   : > { %2730 = vmatmul.f32.gmra.mxu3 %v4443_v14  ;;  %2802 = vmatpush.msrb.mxu1 %v2599_v1 }
 0x6a7   : > { %2777 = vmatpush.msra.mxu2 %v2559_v19  ;;  %v3418_v19 = vld [vmem:[#allocation6 + $0x30] sm:$0xff] }
 0x6a8   : > { %2803 = vmatpush.msrb.mxu1 %v2597_v20 }
 0x6a9   : > { %2778 = vmatpush.msra.mxu2 %v2557_v24 }
 0x6aa   : > { %2804 = vmatpush.msrb.mxu1 %v2595_v25 }
 0x6ab   : > { %2779 = vmatpush.msra.mxu2 %v2555_v52 }
 0x6ac   : > { %v2247_v23 = vpop.permute.xlu0 %2246  ;;  %2805 = vmatpush.msrb.mxu1 %v2593_v37  ;;  %v2241_v1 = vpop.permute.xlu2 %2240  ;;  %v2209_v37 = vld [vmem:[#allocation8 + $0x58] sm:$0xff] }
 0x6ad   : > { %v2223_v27 = vpop.permute.xlu1 %2222 }
 0x6ae   : > { %v2298_v29 = vsel %vm445_vm1, %v4109_v45, %v2223_v27  ;;  %v2553_v45 = vld [vmem:[%s4673_s7 + $0x118] sm:$0xff]  ;;  %2806 = vmatpush.msrb.mxu1 %v2591_v41 }
 0x6af   : > { %v2302_v33 = vsel %vm450_vm2, %v2298_v29, %v2235_v13  ;;  %v2310_v5 = vsel %vm450_vm2, %v2298_v29, %v4305_v58  ;;  %2780 = vmatpush.msra.mxu2 %v2553_v45  ;;  %v3419_v29 = vld [vmem:[#allocation6 + $0x48] sm:$0xff] }
 0x6b0   : > { %v2306_v40 = vsel %vm455_vm3, %v2302_v33, %v2247_v23  ;;  %v2314_v43 = vsel %vm455_vm3, %v2310_v5, %v4354_v22  ;;  %v2200_v22 = vld [vmem:[#allocation8 + $0x10] sm:$0xff]  ;;  %2807 = vmatpush.msrb.mxu1 %v2589_v50 }
 0x6b1   : > { %v2330_v4 = vmul.f32 %v2306_v40, %v3984_v38  ;;  %v4499_v58 = vmul.f32 %v2314_v43, %v4048_v9  ;;  %2781 = vmatpush.msra.mxu2 %v2551_v47  ;;  %v2587_v38 = vld [vmem:[%s4673_s7 + $0x228] sm:$0xff]  ;;  %2624 = vrot.lane.b32.xlu2 %v2200_v22, %s3701_s19  ;;  %v2197_v40 = vld [vmem:[#allocation6 + $0x58] sm:$0xff] }
 0x6b2   : > { %2808 = vmatpush.msrb.mxu1 %v2587_v38 }
 0x6b3   : > { %2666 = vmatmul.f32.vlgmr.msrb.gmra.mxu2 %v2330_v4  ;;  %2695 = vmatmul.f32.vlgmr.msra.gmra.mxu1 %v4499_v58 }
 0x6b4   : > { %2753 = vmatmul.f32.vlgmr.msra.gmra.mxu0 %v2330_v4  ;;  %v2249_v54 = vpop.permute.xlu0 %2248  ;;  %2809 = vmatpush.msrb.mxu1 %v2585_v42 }
 0x6b5   : > { %v2225_v9 = vpop.permute.xlu1 %2224 }
 0x6b6   : > { %v2299_v39 = vsel %vm445_vm1, %v4117_v48, %v2225_v9  ;;  %2810 = vmatpush.msrb.mxu1 %v2583_v7  ;;  %v4559_v9 = vpop.f32.mrf.mxu0 }
 0x6b7   : > { %v2303_v57 = vsel %vm450_vm2, %v2299_v39, %v2237_v26  ;;  %v2311_v62 = vsel %vm450_vm2, %v2299_v39, %v4343_v11 }
 0x6b8   : > { %v2307_v2 = vsel %vm455_vm3, %v2303_v57, %v2249_v54  ;;  %v2315_v3 = vsel %vm455_vm3, %v2311_v62, %v4391_v35  ;;  %v2198_v57 = vld [vmem:[#allocation8] sm:$0xff] }
 0x6b9   : > { %v2333_v12 = vmul.f32 %v3417_v6, %v2307_v2  ;;  %v2334_v13 = vmul.f32 %v2315_v3, %v4058_v17  ;;  %2630 = vrot.lane.b32.xlu2 %v4527_v15, %s3701_s19 }
 0x6bb   : > { %2669 = vmatmul.f32.gmra.mxu2 %v2333_v12  ;;  %2698 = vmatmul.f32.gmra.mxu1 %v2334_v13 }
 0x6bc   : > { %2756 = vmatmul.f32.gmra.mxu0 %v2333_v12  ;;  %v2251_v11 = vpop.permute.xlu0 %2250 }
 0x6bd   : > { %v2227_v44 = vpop.permute.xlu1 %2226 }
 0x6be   : > { %v2300_v35 = vsel %vm445_vm1, %v4125_v36, %v2227_v44 }
 0x6bf   : > { %v2304_v17 = vsel %vm450_vm2, %v2300_v35, %v2239_v55  ;;  %v2312_v16 = vsel %vm450_vm2, %v2300_v35, %v4396_v46 }
 0x6c0   : > { %v2308_v0 = vsel %vm455_vm3, %v2304_v17, %v2251_v11  ;;  %v2316_v18 = vsel %vm455_vm3, %v2312_v16, %v4428_v59  ;;  %v2269_v59 = vpop.permute.xlu2 %2268 }
 0x6c1   : > { %v2336_v20 = vmul.f32 %v3418_v19, %v2308_v0  ;;  %v2337_v23 = vmul.f32 %v2316_v18, %v4065_v21  ;;  %2636 = vrot.lane.b32.xlu2 %v2209_v37, %s3701_s19  ;;  %v2201_v18 = vld [vmem:[#allocation8 + $0x18] sm:$0xff] }
 0x6c3   : > { %2672 = vmatmul.f32.gmra.mxu2 %v2336_v20  ;;  %2701 = vmatmul.f32.gmra.mxu1 %v2337_v23 }
 0x6c4   : > { %2759 = vmatmul.f32.gmra.mxu0 %v2336_v20  ;;  %v2253_v24 = vpop.permute.xlu0 %2252 }
 0x6c5   : > { %v2229_v25 = vpop.permute.xlu1 %2228 }
 0x6c6   : > { %v2301_v26 = vsel %vm445_vm1, %v4133_v30, %v2229_v25 }
 0x6c7   : > { %v2305_v46 = vsel %vm450_vm2, %v2301_v26, %v2241_v1  ;;  %v2313_v21 = vsel %vm450_vm2, %v2301_v26, %v2269_v59 }
 0x6c8   : > { %v2309_v27 = vsel %vm455_vm3, %v2305_v46, %v2253_v24 }
 0x6c9   : > { %v2339_v52 = vmul.f32 %v3419_v29, %v2309_v27 }
 0x6cb   : > { %2675 = vmatmul.f32.gmra.mxu2 %v2339_v52 }
 0x6cc   : > { %2762 = vmatmul.f32.gmra.mxu0 %v2339_v52  ;;  %v2281_v32 = vpop.permute.xlu0 %2280 }
 0x6cd   : > { %v2317_v33 = vsel %vm455_vm3, %v2313_v21, %v2281_v32  ;;  %v4547_v5 = vpop.permute.xlu1 %2292  ;;  %v2204_v21 = vld [vmem:[#allocation8 + $0x30] sm:$0xff] }
 0x6ce   : > { %v2340_v45 = vmul.f32 %v2317_v33, %v4072_v28  ;;  %v2321_v41 = vsel %vm445_vm1, %v4152_v53, %v4547_v5  ;;  %v2448_v28 = vpop.f32.mrf.mxu1  ;;  %v2419_v53 = vpop.f32.mrf.mxu2 }
 0x6cf   : > { %v2325_v43 = vsel %vm450_vm2, %v2321_v41, %v2269_v59  ;;  %v2420_v6 = vadd.f32 %v2419_v53, %v2198_v57 }
 0x6d0   : > { %2704 = vmatmul.f32.gmra.mxu1 %v2340_v45  ;;  %v2329_v4 = vsel %vm455_vm3, %v2325_v43, %v2281_v32 }
 0x6d1   : > { %v2341_v47 = vmul.f32 %v2329_v4, %v2197_v40  ;;  %v2449_v11 = vadd.f32 %v2448_v28, %v2420_v6 }
 0x6d3   : > { %2733 = vmatmul.f32.gmra.mxu3 %v2341_v47  ;;  %2782 = vmatmul.f32.vlgmr.msra.gmra.mxu2 %v4499_v58 }
 0x6d6   : > { %v2451_v50 = vpop.f32.mrf.mxu1  ;;  %v2422_v22 = vpop.f32.mrf.mxu2 }
 0x6d7   : > { %v2423_v24 = vadd.f32 %v2422_v22, %v2201_v18 }
 0x6d8   : > { %2811 = vmatmul.f32.vlgmr.msrb.gmra.mxu1 %v4374_v31  ;;  %v4565_v31 = vpop.f32.mrf.mxu0 }
 0x6d9   : > { %v2452_v46 = vadd.f32 %v2451_v50, %v2423_v24  ;;  %v2478_v24 = vadd.f32 %v4150_v56, %v4179_v63 }
 0x6db   : > { %2785 = vmatmul.f32.gmra.mxu2 %v2334_v13  ;;  %v2627_v13 = vpop.permute.xlu0 %2626  ;;  %v2507_v63 = vadd.f32 %v4559_v9, %v2478_v24 }
 0x6de   : > { %v2454_v54 = vpop.f32.mrf.mxu1  ;;  %v2425_v38 = vpop.f32.mrf.mxu2 }
 0x6df   : > { %v2426_v4 = vadd.f32 %v2425_v38, %v2204_v21 }
 0x6e0   : > { %2814 = vmatmul.f32.gmra.mxu1 %v4405_v49  ;;  %v2623_v49 = vpop.permute.xlu1 %2622  ;;  %v4571_v7 = vpop.f32.mrf.mxu0 }
 0x6e1   : > { %v2455_v53 = vadd.f32 %v2454_v54, %v2426_v4 }
 0x6e3   : > { %2788 = vmatmul.f32.gmra.mxu2 %v2337_v23 }
 0x6e6   : > { %v4561_v39 = vpop.f32.mrf.mxu1  ;;  %v4563_v58 = vpop.f32.mrf.mxu2 }
 0x6e8   : > { %2817 = vmatmul.f32.gmra.mxu1 %v4443_v14  ;;  %v4573_v44 = vpop.permute.xlu1 %2628  ;;  %v4581_v59 = vpop.f32.mrf.mxu0 }
 0x6e9   : > { %v2639_v16 = vsel %vm450_vm2, %v2627_v13, %v4573_v44  ;;  %v2207_v13 = vld [vmem:[#allocation8 + $0x48] sm:$0xff] }
 0x6eb   : > { %2791 = vmatmul.f32.gmra.mxu2 %v2340_v45 }
 0x6ef   : > { %v4577_v29 = vpop.permute.xlu0 %2632 }
 0x6f0   : > { %2820 = vmatmul.f32.gmra.mxu1 %v2341_v47  ;;  %v2635_v22 = vpop.permute.xlu1 %2634 }
 0x70b   : > { %v4567_v55 = vpop.permute.xlu2 %2624 }
 0x70c   : > { %v2638_v14 = vsel %vm450_vm2, %v2623_v49, %v4567_v55 }
 0x713   : > { %v2631_v26 = vpop.permute.xlu2 %2630 }
 0x714   : > { %v2640_v52 = vsel %vm450_vm2, %v2631_v26, %v4577_v29 }
 0x719   : > { %v2725_v62 = vpop.f32.mrf.mxu3 }
 0x71b   : > { %v4583_v49 = vpop.permute.xlu2 %2636 }
 0x721   : > { %v2728_v23 = vpop.f32.mrf.mxu3 }
 0x729   : > { %v2731_v28 = vpop.f32.mrf.mxu3 }
 0x730   : > { %v2696_v42 = vpop.f32.mrf.mxu1 }
 0x736   : > { %v2667_v2 = vpop.f32.mrf.mxu2 }
 0x737   : > { %v2668_v3 = vadd.f32 %v2667_v2, %v2638_v14 }
 0x738   : > { %v2699_v17 = vpop.f32.mrf.mxu1 }
 0x739   : > { %v2697_v12 = vadd.f32 %v2696_v42, %v2668_v3  ;;  %v2754_v42 = vpop.f32.mrf.mxu0 }
 0x73a   : > { %v2755_v18 = vadd.f32 %v2754_v42, %v4567_v55  ;;  %v2481_v42 = vadd.f32 %v4172_v60, %v4174_v61 }
 0x73b   : > { %v2726_v35 = vadd.f32 %v2725_v62, %v2697_v12  ;;  %v2641_v62 = vsel %vm450_vm2, %v2635_v22, %v4583_v49 }
 0x73c   : > { %v2510_v60 = vadd.f32 %v4565_v31, %v2481_v42 }
 0x73d   : > { %v2824_v0 = vadd.f32 %v2726_v35, %v2449_v11 }
 0x73e   : > { %v2670_v1 = vpop.f32.mrf.mxu2 }
 0x73f   : > { %v3221_v19 = vmul.f32 -1.442695, %v2824_v0  ;;  %v2671_v20 = vadd.f32 %v2670_v1, %v2639_v16 }
 0x740   : > { %v2702_v32 = vpop.f32.mrf.mxu1 }
 0x741   : > { %3393 = vpow2.f32 %v3221_v19  ;;  %v2700_v25 = vadd.f32 %v2699_v17, %v2671_v20  ;;  %v2429_v17 = vadd.f32 %v4563_v58, %v2207_v13 }
 0x743   : > { %v2729_v27 = vadd.f32 %v2728_v23, %v2700_v25  ;;  %v2458_v23 = vadd.f32 %v4561_v39, %v2429_v17 }
 0x745   : > { %v2825_v37 = vadd.f32 %v2729_v27, %v2452_v46  ;;  %v2757_v27 = vpop.f32.mrf.mxu0 }
 0x746   : > { %v2673_v33 = vpop.f32.mrf.mxu2 }
 0x747   : > { %v3394_v45 = vpop.eup %3393  ;;  %v3222_v41 = vmul.f32 -1.442695, %v2825_v37  ;;  %v2674_v40 = vadd.f32 %v2673_v33, %v2640_v52 }
 0x748   : > { %v2840_v43 = vadd.f32 1.0, %v3394_v45 }
 0x749   : > { %3395 = vpow2.f32 %v3222_v41  ;;  %v2703_v47 = vadd.f32 %v2702_v32, %v2674_v40 }
 0x74a   : > { %3397 = vrcp.f32 %v2840_v43  ;;  %v2853_v16 = vand.u32 2147483647, %v2840_v43  ;;  %v2855_v0 = vand.u32 2147483648, %v2840_v43  ;;  %vm2849_vm5 = vweird.f32 %v2840_v43 }
 0x74b   : > { %v2732_v50 = vadd.f32 %v2731_v28, %v2703_v47  ;;  %v2758_v47 = vadd.f32 %v2757_v27, %v4573_v44 }
 0x74c   : > { %vm2854_vm7 = vcmp.eq.f32.partialorder %v2853_v16, 8.507059e+37  ;;  %v2856_v55 = vor.u32 1.1754944e-38, %v2855_v0 }
 0x74d   : > { %v2826_v14 = vadd.f32 %v2732_v50, %v2455_v53  ;;  %v2705_v57 = vpop.f32.mrf.mxu1 }
 0x74e   : > { %v2676_v2 = vpop.f32.mrf.mxu2 }
 0x74f   : > { %v3396_v3 = vpop.eup %3395  ;;  %v3223_v6 = vmul.f32 -1.442695, %v2826_v14  ;;  %v2677_v11 = vadd.f32 %v2676_v2, %v2641_v62 }
 0x750   : > { %v3398_v12 = vpop.eup %3397  ;;  %v2841_v38 = vadd.f32 1.0, %v3396_v3 }
 0x751   : > { %3399 = vpow2.f32 %v3223_v6  ;;  %v2845_v35 = vmul.f32 %v3398_v12, %v2840_v43  ;;  %v2706_v1 = vadd.f32 %v2705_v57, %v2677_v11  ;;  %vm2850_vm4 = vweird.f32 %v3398_v12  ;;  %v2760_v6 = vpop.f32.mrf.mxu0 }
 0x752   : > { %3401 = vrcp.f32 %v2841_v38  ;;  %vm2851_vm6 = vmor %vm2849_vm5, %vm2850_vm4  ;;  %v2868_v28 = vand.u32 2147483647, %v2841_v38  ;;  %v2870_v53 = vand.u32 2147483648, %v2841_v38  ;;  %vm2864_vm9 = vweird.f32 %v2841_v38 }
 0x753   : > { %v2846_v54 = vsub.f32 1.0, %v2845_v35  ;;  %v2761_v17 = vadd.f32 %v2760_v6, %v4577_v29 }
 0x754   : > { %v2871_v3 = vor.u32 1.1754944e-38, %v2870_v53  ;;  %vm2869_vm11 = vcmp.eq.f32.partialorder %v2868_v28, 8.507059e+37 }
 0x755   : > { %v2812_v19 = vpop.f32.mrf.mxu1  ;;  %v2847_v20 = vmul.f32 %v3398_v12, %v2846_v54 }
 0x756   : > { %v2734_v25 = vpop.f32.mrf.mxu3  ;;  %v2783_v26 = vpop.f32.mrf.mxu2 }
 0x757   : > { %v3400_v46 = vpop.eup %3399  ;;  %v2735_v52 = vadd.f32 %v2734_v25, %v2706_v1  ;;  %v2784_v37 = vadd.f32 %v2783_v26, %v2755_v18  ;;  %v2848_v58 = vadd.f32 %v3398_v12, %v2847_v20  ;;  %v2484_v20 = vadd.f32 %v4194_v10, %v4527_v15 }
 0x758   : > { %v3402_v32 = vpop.eup %3401  ;;  %v4592_v21 = vadd.f32 1.0, %v3400_v46 }
 0x759   : > { %v2827_v33 = vadd.f32 %v2735_v52, %v2458_v23  ;;  %v2813_v45 = vadd.f32 %v2812_v19, %v2784_v37  ;;  %v2852_v39 = vsel %vm2851_vm6, %v3398_v12, %v2848_v58  ;;  %v2860_v41 = vmul.f32 %v3402_v32, %v2841_v38  ;;  %v2763_v37 = vpop.f32.mrf.mxu0 }
 0x75a   : > { %3403 = vrcp.f32 %v4592_v21  ;;  %v4595_v56 = vsel %vm2854_vm7, %v2856_v55, %v2852_v39  ;;  %vm2865_vm8 = vweird.f32 %v3402_v32  ;;  %v2885_v16 = vand.u32 2147483648, %v4592_v21 }
 0x75b   : > { %v3224_v40 = vmul.f32 -1.442695, %v2827_v33  ;;  %v2904_v4 = vmul.f32 %v4595_v56, %v2813_v45  ;;  %v2861_v43 = vsub.f32 1.0, %v2860_v41  ;;  %vm2866_vm10 = vmor %vm2864_vm9, %vm2865_vm8  ;;  %v2883_v19 = vand.u32 2147483647, %v4592_v21 }
 0x75c   : > { %vm2879_vm13 = vweird.f32 %v4592_v21  ;;  %v2886_v25 = vor.u32 1.1754944e-38, %v2885_v16  ;;  %v2513_v52 = vadd.f32 %v4571_v7, %v2484_v20 }
 0x75d   : > { %3405 = vpow2.f32 %v3224_v40  ;;  %v2908_v50 = vadd.f32 %v2904_v4, %v2507_v63  ;;  %v2862_v22 = vmul.f32 %v3402_v32, %v2861_v43  ;;  %v2815_v57 = vpop.f32.mrf.mxu1  ;;  %vm2884_vm15 = vcmp.eq.f32.partialorder %v2883_v19, 8.507059e+37 }
 0x75e   : > { %v2786_v14 = vpop.f32.mrf.mxu2 }
 0x75f   : > { %3407 = vtanh.f32 %v2908_v50  ;;  %v2787_v62 = vadd.f32 %v2786_v14, %v2758_v47  ;;  %v2863_v9 = vadd.f32 %v3402_v32, %v2862_v22  ;;  %v2516_v22 = vadd.f32 %v4581_v59, %v4203_v8  ;;  %v2949_v59 = vpop.permute.xlu1 %2948 }
 0x760   : > { %v3404_v2 = vpop.eup %3403  ;;  %v2920_v8 = vsub.f32 1.0, %v4595_v56 }
 0x761   : > { %v2816_v44 = vadd.f32 %v2815_v57, %v2787_v62  ;;  %v2867_v12 = vsel %vm2866_vm10, %v3402_v32, %v2863_v9  ;;  %v2875_v13 = vmul.f32 %v3404_v2, %v4592_v21  ;;  %vm2880_vm12 = vweird.f32 %v3404_v2 }
 0x762   : > { %v4603_v11 = vsel %vm2869_vm11, %v2871_v3, %v2867_v12  ;;  %vm2881_vm14 = vmor %vm2879_vm13, %vm2880_vm12  ;;  %v2764_v21 = vadd.f32 %v2763_v37, %v4583_v49  ;;  %v2919_v49 = vsel %vm445_vm1, %v4133_v30, %v4547_v5  ;;  %v2917_v57 = vsel %vm445_vm1, %v4117_v48, %v4389_v34 }
 0x763   : > { %v3406_v35 = vpop.eup %3405  ;;  %v2905_v61 = vmul.f32 %v4603_v11, %v2816_v44  ;;  %v2876_v54 = vsub.f32 1.0, %v2875_v13  ;;  %v2918_v30 = vsel %vm445_vm1, %v4125_v36, %v4426_v51  ;;  %v2960_v3 = vmul.f32 %v2949_v59, %v4595_v56 }
 0x764   : > { %v2843_v38 = vadd.f32 1.0, %v3406_v35  ;;  %v2921_v6 = vsub.f32 1.0, %v4603_v11 }
 0x765   : > { %v3408_v0 = vpop.eup %3407  ;;  %v2909_v18 = vadd.f32 %v2905_v61, %v2510_v60  ;;  %v2877_v1 = vmul.f32 %v3404_v2, %v2876_v54  ;;  %v2818_v29 = vpop.f32.mrf.mxu1 }
 0x766   : > { %3409 = vrcp.f32 %v2843_v38  ;;  %v2789_v23 = vpop.f32.mrf.mxu2  ;;  %2928 = vrot.lane.b32.xlu0 %v3408_v0, %s3701_s19  ;;  %v2900_v39 = vand.u32 2147483648, %v2843_v38  ;;  %v2898_v40 = vand.u32 2147483647, %v2843_v38  ;;  %vm2894_vm2 = vweird.f32 %v2843_v38 }
 0x767   : > { %3411 = vtanh.f32 %v2909_v18  ;;  %v2790_v31 = vadd.f32 %v2789_v23, %v2761_v17  ;;  %v2878_v24 = vadd.f32 %v3404_v2, %v2877_v1 }
 0x768   : > { %v2901_v43 = vor.u32 1.1754944e-38, %v2900_v39  ;;  %vm2899_vm4 = vcmp.eq.f32.partialorder %v2898_v40, 8.507059e+37 }
 0x769   : > { %v2819_v26 = vadd.f32 %v2818_v29, %v2790_v31  ;;  %v2882_v46 = vsel %vm2881_vm14, %v3404_v2, %v2878_v24 }
 0x76a   : > { %v4614_v27 = vsel %vm2884_vm15, %v2886_v25, %v2882_v46 }
 0x76b   : > { %v2906_v10 = vmul.f32 %v4614_v27, %v2819_v26  ;;  %v2922_v56 = vsub.f32 1.0, %v4614_v27 }
 0x76c   : > { %v3410_v15 = vpop.eup %3409 }
 0x76d   : > { %v3412_v58 = vpop.eup %3411  ;;  %v2910_v32 = vadd.f32 %v2906_v10, %v2513_v52  ;;  %v2890_v55 = vmul.f32 %v3410_v15, %v2843_v38  ;;  %vm2895_vm0 = vweird.f32 %v3410_v15  ;;  %v2821_v4 = vpop.f32.mrf.mxu1 }
 0x76e   : > { %v2792_v33 = vpop.f32.mrf.mxu2  ;;  %2930 = vrot.lane.b32.xlu1 %v3412_v58, %s3701_s19  ;;  %vm2896_vm3 = vmor %vm2894_vm2, %vm2895_vm0 }
 0x76f   : > { %3413 = vtanh.f32 %v2910_v32  ;;  %v2891_v45 = vsub.f32 1.0, %v2890_v55  ;;  %v2793_v41 = vadd.f32 %v2792_v33, %v2764_v21 }
 0x771   : > { %v2892_v63 = vmul.f32 %v3410_v15, %v2891_v45  ;;  %v2822_v28 = vadd.f32 %v2821_v4, %v2793_v41 }
 0x773   : > { %v2893_v7 = vadd.f32 %v3410_v15, %v2892_v63 }
 0x775   : > { %v3414_v47 = vpop.eup %3413  ;;  %v2897_v53 = vsel %vm2896_vm3, %v3410_v15, %v2893_v7 }
 0x776   : > { %v2902_v50 = vsel %vm2899_vm4, %v2901_v43, %v2897_v53  ;;  %2932 = vrot.lane.b32.xlu2 %v3414_v47, %s3701_s19  ;;  %2954 = vrot.lane.b32.xlu1 %v2919_v49, %s3701_s19 }
 0x777   : > { %v2907_v42 = vmul.f32 %v2902_v50, %v2822_v28  ;;  %v2923_v35 = vsub.f32 1.0, %v2902_v50 }
 0x779   : > { %v2911_v14 = vadd.f32 %v2907_v42, %v2516_v22 }
 0x77b   : > { %3415 = vtanh.f32 %v2911_v14 }
 0x77e   : > { %2950 = vrot.lane.b32.xlu2 %v2917_v57, %s3701_s19 }
 0x781   : > { %v3416_v62 = vpop.eup %3415 }
 0x782   : > { %2934 = vrot.lane.b32.xlu0 %v3416_v62, %s3701_s19 }
 0x78a   : > { %2952 = vrot.lane.b32.xlu0 %v2918_v30, %s3701_s19 }
 0x7d0   : > { %v2933_v5 = vpop.permute.xlu2 %2932 }
 0x7d1   : > { %v2942_v16 = vmul.f32 %v2933_v5, %v2922_v56 }
 0x7d8   : > { %v2929_v9 = vpop.permute.xlu0 %2928  ;;  %v2951_v34 = vpop.permute.xlu2 %2950 }
 0x7d9   : > { %v2940_v2 = vmul.f32 %v2929_v9, %v2920_v8  ;;  %v2961_v12 = vmul.f32 %v2951_v34, %v4603_v11 }
 0x7db   : > { %v2964_v48 = vadd.f32 %v2960_v3, %v2940_v2 }
 0x7dd   : > { %2972 = vrot.lane.b32.xlu2 %v2964_v48, %s3699_s10 }
 0x7e0   : > { %v2931_v44 = vpop.permute.xlu1 %2930 }
 0x7e1   : > { %v2941_v36 = vmul.f32 %v2931_v44, %v2921_v6 }
 0x7e3   : > { %v2965_v51 = vadd.f32 %v2961_v12, %v2941_v36 }
 0x7e5   : > { %2974 = vrot.lane.b32.xlu0 %v2965_v51, %s3699_s10 }
 0x7e8   : > { %v2955_v13 = vpop.permute.xlu1 %2954 }
 0x7e9   : > { %v2963_v61 = vmul.f32 %v2955_v13, %v2902_v50 }
 0x7f4   : > { %v2935_v60 = vpop.permute.xlu0 %2934 }
 0x7f5   : > { %v2943_v54 = vmul.f32 %v2935_v60, %v2923_v35 }
 0x7f7   : > { %v2967_v17 = vadd.f32 %v2963_v61, %v2943_v54 }
 0x7f9   : > { %2978 = vrot.lane.b32.xlu2 %v2967_v17, %s3699_s10 }
 0x7fc   : > { %v2953_v38 = vpop.permute.xlu0 %2952 }
 0x7fd   : > { %v2962_v0 = vmul.f32 %v2953_v38, %v4614_v27 }
 0x7ff   : > { %v2966_v18 = vadd.f32 %v2962_v0, %v2942_v16 }
 0x801   : > { %2976 = vrot.lane.b32.xlu1 %v2966_v18, %s3699_s10 }
 0x837   : > { %v2973_v11 = vpop.permute.xlu2 %2972 }
 0x838   : > { %v2984_v1 = vadd.f32 %v2973_v11, %v2964_v48 }
 0x83a   : > { %2992 = vrot.lane.b32.xlu0 %v2984_v1, %s3701_s19 }
 0x853   : > { %v2979_v19 = vpop.permute.xlu2 %2978 }
 0x854   : > { %v2987_v20 = vadd.f32 %v2979_v19, %v2967_v17 }
 0x856   : > { %2998 = vrot.lane.b32.xlu0 %v2987_v20, %s3701_s19 }
 0x857   : > { %v2975_v23 = vpop.permute.xlu0 %2974 }
 0x858   : > { %v2985_v31 = vadd.f32 %v2975_v23, %v2965_v51 }
 0x85a   : > { %2994 = vrot.lane.b32.xlu1 %v2985_v31, %s3701_s19 }
 0x873   : > { %v2977_v24 = vpop.permute.xlu1 %2976 }
 0x874   : > { %v2986_v29 = vadd.f32 %v2977_v24, %v2966_v18 }
 0x876   : > { %2996 = vrot.lane.b32.xlu2 %v2986_v29, %s3701_s19 }
 0x8ac   : > { %v2993_v25 = vpop.permute.xlu0 %2992 }
 0x8ad   : > { %3004 = vst.msk [vmem:[#allocation2] sm:$0xff] %vm445_vm1, %v2993_v25 }
 0x8c8   : > { %v2999_v26 = vpop.permute.xlu0 %2998 }
 0x8c9   : > { %3007 = vst.msk [vmem:[#allocation2 + $0x18] sm:$0xff] %vm445_vm1, %v2999_v26 }
 0x8cc   : > { %v2995_v46 = vpop.permute.xlu1 %2994 }
 0x8cd   : > { %3005 = vst.msk [vmem:[#allocation2 + $0x8] sm:$0xff] %vm445_vm1, %v2995_v46  ;;  %3011 = sbr.rel (%p3225_p7) target bundleno = 2262 (0x8d6), region = 88 }
 0x8d0   : > { %v2997_v27 = vpop.permute.xlu2 %2996 }
 0x8d1   : > { %3006 = vst.msk [vmem:[#allocation2 + $0x10] sm:$0xff] %vm445_vm1, %v2997_v27 }
 0x8d2   : > { %3012 = vst.msk [vmem:[#allocation15] sm:$0xff] %vm445_vm1, %v2993_v25 }
 0x8d3   : > { %3013 = vst.msk [vmem:[#allocation15 + $0x8] sm:$0xff] %vm445_vm1, %v2995_v46 }
 0x8d4   : > { %3014 = vst.msk [vmem:[#allocation15 + $0x10] sm:$0xff] %vm445_vm1, %v2997_v27 }
 0x8d5   : > { %3015 = vst.msk [vmem:[#allocation15 + $0x18] sm:$0xff] %vm445_vm1, %v2999_v26 }
 0x8d6 PF: > { %p3314_p8 = scmp.eq.s32.totalorder %s3759_s9, 1  ;;  %s3702_s10 = smov [#allocation15]  }
 0x8d7   : > { %s3021_s19 = sshll.u32 %s3702_s10, 4  ;;  %s3023_s12 = sshll.u32 %s4674_s8, 4  ;;  %s3022_s19 = int_to_ptr.vmem [resolvable:$true] %s3021_s19  ;;  %s3024_s12 = int_to_ptr.hbm [resolvable:$true] %s3023_s12 }
 0x8d8   : > { %s3703_s15 = smov 128   ;;  %s3704_s22 = smov 8  }
 0x8d9   : > { %3275 = dma.vmem_to_hbm [thread:$0]  (%p3314_p8), %s3022_s19, 512, %s3024_s12, [#allocation5], %s3703_s15, %s3703_s15, %s3704_s22  }
 0x8da   : > { %3679 = dma.done.wait (%p3314_p8), [#allocation5], 512  }
 0x8db   : > { %3681 = vsyncadd (%p3314_p8), [#allocation5], 4294966784 }
 0x8dc PF: > { %s23_s27 = sadd.s32 1, %s3684_s27  }
 0x8dd   : > { %p20_p9 = scmp.ge.s32.totalorder %s23_s27, 4  }
 0x8df   :  { %22 = sbr.rel (!%p20_p9) target bundleno = 5 (0x5), region = 120 }
 0x8e4   :  { %3040 = vsyncpa [#allocation4], 1 }
 0x8e5   :  { %3042 = vsyncpa [#allocation4 + $0x1], 1 }
 0x8e6   :  { %3043 = vsyncpa [#allocation7], 1 }
 0x8e7   :  { %3044 = vsyncpa [#allocation10], 1 }
 0x8e8   :  { %3045 = vsyncpa [#allocation13], 1 }
 0x8e9   :  { %3046 = vsyncpa [#allocation5], 1 }
 0x8ea   :  { %3048 = vsyncpa [#allocation5 + $0x1], 1 }

</bundles_post_ra>
